<compile_context>
chip_gen: v7x
topology: tpu7x:2x2x1
jax: 0.10.0
libtpu: 0.0.40
codegen_flags: <defaults>
</compile_context>

<pallas_src>
import functools

import jax
import jax.numpy as jnp
from jax import lax
from jax.experimental import pallas as pl
from jax.experimental.pallas import tpu as pltpu

EPS = 1e-5          # PyTorch BatchNorm2d default eps
LANES = 128         # TPU lane width


# ------------------------------ helpers --------------------------------------

def _round_up(x, m):
    return (x + m - 1) // m * m


def _row_tile(m):
    # Largest power-of-two row tile (<= 4096) dividing M.  M is always a
    # multiple of 8 here (Wp % 8 == 0), so this never degenerates to tm == M.
    for t in (4096, 2048, 1024, 512, 256, 128, 64, 32, 16, 8):
        if m % t == 0:
            return t
    return 8   # unreachable (defensive)


def _vmem_limit_bytes():
    try:
        cap = int(pltpu.get_tpu_info().vmem_capacity_bytes)
    except Exception:
        cap = 64 * 1024 * 1024
    # leave headroom for Mosaic internal scratch, cap for v5e/v6e
    return max(32 * 1024 * 1024, min(cap - 16 * 1024 * 1024, 112 * 1024 * 1024))


# --------------------------- Pallas kernels -----------------------------------

def _conv3x3_stats_kernel(x_ref, w_ref, ml_ref, mr_ref, mreal_ref,
                          h_ref, stats_ref, patch_ref, *, hh, wp):
    """3x3 'SAME' conv on one flat, H-halo-padded image + per-image BN stats.

    x_ref    : (1, (hh+2)*wp, Cpi) bf16  flat image; first/last wp rows are zero
    w_ref    : (3, 3*Cpi, Cpo)     bf16  VMEM-resident, K-major over (kx, ci)
    ml/mr    : (hh*wp, 1)          bf16  row-boundary masks (source aligned)
    mreal_ref: (hh*wp, 1)          f32   1.0 on real (non-pad) columns
    h_ref    : (1, hh*wp, Cpo)     bf16  conv output rows
    stats_ref: (1, 2, Cpo)         f32   per-image [sum; sumsq] (reduced in XLA)
    patch_ref: (hh*wp, 3*Cpi)      bf16  VMEM scratch (lane-partitioned taps)
    """
    m = hh * wp
    cpi = x_ref.shape[-1]
    cpo = h_ref.shape[-1]

    # Boundary rows of the shifted taps are constant zero across ky.
    patch_ref[0:1, 0:cpi] = jnp.zeros((1, cpi), patch_ref.dtype)
    patch_ref[m - 1:m, 2 * cpi:3 * cpi] = jnp.zeros((1, cpi), patch_ref.dtype)

    ml = ml_ref[...]                       # (m, 1) bf16
    mr = mr_ref[...]                       # (m, 1) bf16
    acc = jnp.zeros((m, cpo), jnp.float32)
    for ky in range(3):                                    # unrolled
        s = x_ref[0, ky * wp:ky * wp + m, :]               # aligned sublane slice
        patch_ref[:, cpi:2 * cpi] = s                      # centre tap (kx=1)
        patch_ref[1:m, 0:cpi] = (s * ml)[0:m - 1, :]       # left tap   (kx=0)
        patch_ref[0:m - 1, 2 * cpi:3 * cpi] = (s * mr)[1:m, :]   # right tap (kx=2)
        acc = acc + jnp.dot(patch_ref[...], w_ref[ky],
                            preferred_element_type=jnp.float32)

    h_ref[0] = acc.astype(h_ref.dtype)                     # bf16 intermediate
    am = acc * mreal_ref[...]                              # drop pad columns
    # NOTE: one-pass variance (E[x^2]-E[x]^2) accumulated in f32.
    stats_ref[0, 0:1, :] = jnp.sum(am, axis=0, keepdims=True)
    stats_ref[0, 1:2, :] = jnp.sum(acc * am, axis=0, keepdims=True)


def _bn1_relu_pad_kernel(h_ref, scale_ref, shift_ref, mreal_ref, yp_ref,
                         *, hh, wp):
    """BN1 apply + ReLU; writes directly into the halo-padded conv2 input."""
    cpo = yp_ref.shape[-1]
    y = h_ref[0].astype(jnp.float32) * scale_ref[...] + shift_ref[...]
    y = jnp.maximum(y, 0.0) * mreal_ref[...]               # zero pad columns
    zrow = jnp.zeros((wp, cpo), yp_ref.dtype)
    yp_ref[0, 0:wp, :] = zrow                              # top halo row
    yp_ref[0, (hh + 1) * wp:(hh + 2) * wp, :] = zrow       # bottom halo row
    yp_ref[0, wp:(hh + 1) * wp, :] = y.astype(yp_ref.dtype)


def _bn2_ident_kernel(h_ref, r_ref, scale_ref, shift_ref, o_ref):
    y = h_ref[...].astype(jnp.float32) * scale_ref[...] + shift_ref[...]
    o_ref[...] = jnp.maximum(y + r_ref[...].astype(jnp.float32),
                             0.0).astype(o_ref.dtype)


def _bn2_proj_kernel(h_ref, x_ref, ws_ref, scale_ref, shift_ref, o_ref):
    res = jnp.dot(x_ref[...], ws_ref[...], preferred_element_type=jnp.float32)
    y = h_ref[...].astype(jnp.float32) * scale_ref[...] + shift_ref[...]
    o_ref[...] = jnp.maximum(y + res, 0.0).astype(o_ref.dtype)


# -------------------------- pallas_call wrappers ------------------------------

def _conv3x3_stats(xflat, wflat, ml, mr, mreal, hh, wp):
    n = xflat.shape[0]
    cpi = xflat.shape[-1]
    cpo = wflat.shape[-1]
    m = hh * wp
    cost = pl.CostEstimate(
        flops=2 * n * m * (3 * cpi) * cpo * 3,
        transcendentals=0,
        bytes_accessed=(xflat.size * 2 + wflat.size * 2
                        + n * m * cpo * 2 + n * 2 * cpo * 4 + 3 * m * 4))
    return pl.pallas_call(
        functools.partial(_conv3x3_stats_kernel, hh=hh, wp=wp),
        out_shape=(jax.ShapeDtypeStruct((n, m, cpo), jnp.bfloat16),
                   jax.ShapeDtypeStruct((n, 2, cpo), jnp.float32)),
        grid=(n,),
        in_specs=[
            pl.BlockSpec((1, (hh + 2) * wp, cpi), lambda i: (i, 0, 0)),
            pl.BlockSpec((3, 3 * cpi, cpo), lambda i: (0, 0, 0)),   # resident
            pl.BlockSpec((m, 1), lambda i: (0, 0)),
            pl.BlockSpec((m, 1), lambda i: (0, 0)),
            pl.BlockSpec((m, 1), lambda i: (0, 0)),
        ],
        out_specs=(
            pl.BlockSpec((1, m, cpo), lambda i: (i, 0, 0)),
            pl.BlockSpec((1, 2, cpo), lambda i: (i, 0, 0)),   # per-step stats
        ),
        scratch_shapes=[pltpu.VMEM((m, 3 * cpi), jnp.bfloat16)],
        compiler_params=pltpu.CompilerParams(
            dimension_semantics=("parallel",),
            vmem_limit_bytes=_vmem_limit_bytes()),
        cost_estimate=cost,
    )(xflat, wflat, ml, mr, mreal)


def _bn1_relu_pad(h1, scale, shift, mreal, hh, wp):
    n, m, cpo = h1.shape
    return pl.pallas_call(
        functools.partial(_bn1_relu_pad_kernel, hh=hh, wp=wp),
        out_shape=jax.ShapeDtypeStruct((n, (hh + 2) * wp, cpo), jnp.bfloat16),
        grid=(n,),
        in_specs=[
            pl.BlockSpec((1, m, cpo), lambda i: (i, 0, 0)),
            pl.BlockSpec((1, cpo), lambda i: (0, 0)),
            pl.BlockSpec((1, cpo), lambda i: (0, 0)),
            pl.BlockSpec((m, 1), lambda i: (0, 0)),
        ],
        out_specs=pl.BlockSpec((1, (hh + 2) * wp, cpo), lambda i: (i, 0, 0)),
        compiler_params=pltpu.CompilerParams(
            dimension_semantics=("parallel",),
            vmem_limit_bytes=_vmem_limit_bytes()),
    )(h1, scale, shift, mreal)


def _bn2_ident_add_relu(h_rows, r_rows, scale, shift, tm):
    m, cpo = h_rows.shape
    return pl.pallas_call(
        _bn2_ident_kernel,
        out_shape=jax.ShapeDtypeStruct((m, cpo), jnp.bfloat16),
        grid=(m // tm,),
        in_specs=[
            pl.BlockSpec((tm, cpo), lambda i: (i, 0)),
            pl.BlockSpec((tm, cpo), lambda i: (i, 0)),
            pl.BlockSpec((1, cpo), lambda i: (0, 0)),
            pl.BlockSpec((1, cpo), lambda i: (0, 0)),
        ],
        out_specs=pl.BlockSpec((tm, cpo), lambda i: (i, 0)),
        compiler_params=pltpu.CompilerParams(
            dimension_semantics=("parallel",),
            vmem_limit_bytes=_vmem_limit_bytes()),
    )(h_rows, r_rows, scale, shift)


def _bn2_proj_add_relu(h_rows, x_rows, ws, scale, shift, tm):
    m, cpo = h_rows.shape
    cpi = x_rows.shape[-1]
    return pl.pallas_call(
        _bn2_proj_kernel,
        out_shape=jax.ShapeDtypeStruct((m, cpo), jnp.bfloat16),
        grid=(m // tm,),
        in_specs=[
            pl.BlockSpec((tm, cpo), lambda i: (i, 0)),
            pl.BlockSpec((tm, cpi), lambda i: (i, 0)),
            pl.BlockSpec((cpi, cpo), lambda i: (0, 0)),   # resident 1x1 skip
            pl.BlockSpec((1, cpo), lambda i: (0, 0)),
            pl.BlockSpec((1, cpo), lambda i: (0, 0)),
        ],
        out_specs=pl.BlockSpec((tm, cpo), lambda i: (i, 0)),
        compiler_params=pltpu.CompilerParams(
            dimension_semantics=("parallel",),
            vmem_limit_bytes=_vmem_limit_bytes()),
    )(h_rows, x_rows, ws, scale, shift)


# ------------------------------ forward ---------------------------------------

def _bn_affine(stats_per_image, gamma_p, beta_p, count):
    s = jnp.sum(stats_per_image, axis=0)          # (2, Cpo) reduction over images
    mean = s[0] / count
    var = s[1] / count - mean * mean
    scale = gamma_p * lax.rsqrt(var + EPS)
    shift = beta_p - mean * scale
    return scale.reshape(1, -1), shift.reshape(1, -1)


@jax.jit
def residual_block_forward(x_nchw, params):
    """ResidualBlock forward (training-mode BatchNorm).  NCHW in / NCHW out."""
    w1, g1, b1, w2, g2, b2, w_skip = params
    n, c_in, h, w = x_nchw.shape
    c_out = w1.shape[-1]
    if w_skip is None and c_in != c_out:
        raise ValueError("identity skip requires in_channels == out_channels")

    cpi = _round_up(c_in, LANES)
    cpo = _round_up(c_out, LANES)
    wp = _round_up(w, 8)                 # sublane-aligned row width
    m_img = h * wp
    m_tot = n * m_img
    tm = _row_tile(m_tot)
    count = float(n * h * w)             # real pixels per channel

    # ---- layout prep (cheap XLA glue on the small input / params) ----------
    x_nhwc = jnp.transpose(x_nchw, (0, 2, 3, 1)).astype(jnp.float32)
    x_p = jnp.pad(x_nhwc, ((0, 0), (0, 0), (0, wp - w), (0, cpi - c_in)))
    xflat1 = jnp.pad(x_p, ((0, 0), (1, 1), (0, 0), (0, 0)))         # H halo
    xflat1 = xflat1.reshape(n, (h + 2) * wp, cpi).astype(jnp.bfloat16)

    w1f = jnp.pad(w1, ((0, 0), (0, 0), (0, cpi - c_in), (0, cpo - c_out)))
    w1f = w1f.reshape(3, 3 * cpi, cpo).astype(jnp.bfloat16)
    w2f = jnp.pad(w2, ((0, 0), (0, 0), (0, cpo - c_out), (0, cpo - c_out)))
    w2f = w2f.reshape(3, 3 * cpo, cpo).astype(jnp.bfloat16)
    g1p = jnp.pad(g1.astype(jnp.float32), (0, cpo - c_out))
    b1p = jnp.pad(b1.astype(jnp.float32), (0, cpo - c_out))
    g2p = jnp.pad(g2.astype(jnp.float32), (0, cpo - c_out))
    b2p = jnp.pad(b2.astype(jnp.float32), (0, cpo - c_out))

    # row masks (depend only on H, W, Wp; resident in the conv/BN kernels)
    col = jnp.arange(m_img, dtype=jnp.int32) % wp
    ml = ((col + 1) % wp != 0).astype(jnp.bfloat16).reshape(m_img, 1)
    mr = ((col - 1) % wp != (w - 1)).astype(jnp.bfloat16).reshape(m_img, 1)
    mreal = (col < w).astype(jnp.float32).reshape(m_img, 1)

    # ---- conv1 + per-image BN1 statistics -----------------------------------
    h1, stats1 = _conv3x3_stats(xflat1, w1f, ml, mr, mreal, h, wp)
    scale1, shift1 = _bn_affine(stats1, g1p, b1p, count)

    # ---- BN1 + ReLU, halo pad fused -> conv2 input (no XLA jnp.pad) ---------
    y1flat = _bn1_relu_pad(h1, scale1, shift1, mreal, h, wp)

    # ---- conv2 + per-image BN2 statistics -----------------------------------
    h2, stats2 = _conv3x3_stats(y1flat, w2f, ml, mr, mreal, h, wp)
    scale2, shift2 = _bn_affine(stats2, g2p, b2p, count)

    # ---- BN2 + skip + ReLU (row-tiled, bf16 in/out) --------------------------
    h2_rows = h2.reshape(m_tot, cpo)
    x_rows = x_p.reshape(m_tot, cpi).astype(jnp.bfloat16)
    if w_skip is None:
        out_rows = _bn2_ident_add_relu(h2_rows, x_rows, scale2, shift2, tm)
    else:
        ws_p = jnp.pad(w_skip, ((0, cpi - c_in), (0, cpo - c_out)))
        out_rows = _bn2_proj_add_relu(h2_rows, x_rows,
                                      ws_p.astype(jnp.bfloat16),
                                      scale2, shift2, tm)

    out = out_rows.reshape(n, h, wp, cpo)[:, :, :w, :c_out].astype(jnp.float32)
    return jnp.transpose(out, (0, 3, 1, 2))                  # back to NCHW


# --------------------------- pure-JAX references ------------------------------

def _reference_forward(x_nchw, params, matched):
    """matched=True mirrors the kernel's bf16 rounding points exactly;
    matched=False is the plain f32 (PyTorch-style) reference."""
    w1, g1, b1, w2, g2, b2, w_skip = params

    def rnd(t):
        return t.astype(jnp.bfloat16).astype(jnp.float32) if matched else t

    def conv(x, wk):
        if matched:
            x = x.astype(jnp.bfloat16)
            wk = wk.astype(jnp.bfloat16)
        return lax.conv_general_dilated(
            x, wk, (1, 1), "SAME",
            dimension_numbers=("NHWC", "HWIO", "NHWC"),
            preferred_element_type=jnp.float32)

    def bn(hraw, g, b):
        mean = jnp.mean(hraw, axis=(0, 1, 2))
        var = jnp.mean(hraw * hraw, axis=(0, 1, 2)) - mean * mean
        scale = g * lax.rsqrt(var + EPS)
        shift = b - mean * scale
        return rnd(hraw) * scale + shift

    x = jnp.transpose(x_nchw, (0, 2, 3, 1)).astype(jnp.float32)
    if w_skip is None:
        residual = rnd(x)
    else:
        xs = x.astype(jnp.bfloat16) if matched else x
        ws = w_skip.astype(jnp.bfloat16) if matched else w_skip
        residual = jnp.einsum("nhwc,cd->nhwd", xs, ws,
                              preferred_element_type=jnp.float32)
    y = rnd(jax.nn.relu(bn(conv(x, w1), g1, b1)))
    y = bn(conv(y, w2), g2, b2)
    out = rnd(jax.nn.relu(y + residual))
    return jnp.transpose(out, (0, 3, 1, 2))


def _check(out, x, params, tag):
    ref_m = _reference_forward(x, params, matched=True)
    ref_f = _reference_forward(x, params, matched=False)
    assert out.shape == ref_f.shape, f"{tag}: shape {out.shape} vs {ref_f.shape}"
    if not jnp.allclose(out, ref_m, atol=8e-3, rtol=8e-3):
        err = float(jnp.max(jnp.abs(out - ref_m)))
        raise AssertionError(f"{tag}: mismatch vs matched reference (max {err})")
    if not jnp.allclose(out, ref_f, atol=1e-1, rtol=1e-1):
        err = float(jnp.max(jnp.abs(out - ref_f)))
        raise AssertionError(f"{tag}: mismatch vs f32 reference (max {err})")


# --------------------------------- main ----------------------------------------

if __name__ == "__main__":
    N, C_IN, C_OUT, H, W = 2, 4, 8, 16, 16

    key = jax.random.PRNGKey(0)
    kx, k1, k2, ks, kg1, kb1, kg2, kb2, kx2, k1b = jax.random.split(key, 10)

    # Case 1: in_channels != out_channels (1x1-conv skip projection).
    x = jax.random.normal(kx, (N, C_IN, H, W), dtype=jnp.float32)
    w1 = 0.2 * jax.random.normal(k1, (3, 3, C_IN, C_OUT), dtype=jnp.float32)
    w2 = 0.2 * jax.random.normal(k2, (3, 3, C_OUT, C_OUT), dtype=jnp.float32)
    w_skip = 0.2 * jax.random.normal(ks, (C_IN, C_OUT), dtype=jnp.float32)
    g1 = 1.0 + 0.1 * jax.random.normal(kg1, (C_OUT,), dtype=jnp.float32)
    b1 = 0.1 * jax.random.normal(kb1, (C_OUT,), dtype=jnp.float32)
    g2 = 1.0 + 0.1 * jax.random.normal(kg2, (C_OUT,), dtype=jnp.float32)
    b2 = 0.1 * jax.random.normal(kb2, (C_OUT,), dtype=jnp.float32)
    params = (w1, g1, b1, w2, g2, b2, w_skip)

    out = jax.block_until_ready(residual_block_forward(x, params))
    _check(out, x, params, "projection-skip")

    # Case 2: in_channels == out_channels (identity skip, no skip matmul).
    x2 = jax.random.normal(kx2, (N, C_OUT, H, W), dtype=jnp.float32)
    w1b = 0.2 * jax.random.normal(k1b, (3, 3, C_OUT, C_OUT), dtype=jnp.float32)
    params2 = (w1b, g1, b1, w2, g2, b2, None)

    out2 = jax.block_until_ready(residual_block_forward(x2, params2))
    _check(out2, x2, params2, "identity-skip")

    print("KERNEL_OK")
</pallas_src>

<mosaic_0001>
module attributes {stable_mosaic.version = 11 : i64} {
  func.func @_conv3x3_stats_kernel(%arg0: i32, %arg1: memref<1x288x128xbf16, #tpu.memory_space<vmem>>, %arg2: memref<3x384x128xbf16, #tpu.memory_space<vmem>>, %arg3: memref<256x1xbf16, #tpu.memory_space<vmem>>, %arg4: memref<256x1xbf16, #tpu.memory_space<vmem>>, %arg5: memref<256x1xf32, #tpu.memory_space<vmem>>, %arg6: memref<1x256x128xbf16, #tpu.memory_space<vmem>>, %arg7: memref<1x2x128xf32, #tpu.memory_space<vmem>>, %arg8: memref<256x384xbf16, #tpu.memory_space<vmem>>) attributes {dimension_semantics = [#tpu.dimension_semantics<parallel>], iteration_bounds = array<i64: 2>, scalar_prefetch = 0 : i64, scratch_operands = 1 : i64, tpu.core_type = #tpu.core_type<tc>, window_params = [{transform_indices = @transform_0, window_bounds = array<i64: 1, 288, 128>}, {pipeline_mode = #tpu.pipeline_mode<synchronous>, transform_indices = @transform_1, window_bounds = array<i64: 3, 384, 128>}, {pipeline_mode = #tpu.pipeline_mode<synchronous>, transform_indices = @transform_2, window_bounds = array<i64: 256, 1>}, {pipeline_mode = #tpu.pipeline_mode<synchronous>, transform_indices = @transform_3, window_bounds = array<i64: 256, 1>}, {pipeline_mode = #tpu.pipeline_mode<synchronous>, transform_indices = @transform_4, window_bounds = array<i64: 256, 1>}, {transform_indices = @transform_5, window_bounds = array<i64: 1, 256, 128>}, {transform_indices = @transform_6, window_bounds = array<i64: 1, 2, 128>}]} {
    %cst = arith.constant 0.000000e+00 : bf16
    %0 = vector.broadcast %cst : bf16 to vector<1x128xbf16>
    %c0 = arith.constant 0 : index
    %c0_0 = arith.constant 0 : index
    %1 = vector.load %arg8[%c0, %c0_0] : memref<256x384xbf16, #tpu.memory_space<vmem>>, vector<1x128xbf16>
    tpu.vector_store %arg8[%c0, %c0_0], %0 {strides = array<i32>} : memref<256x384xbf16, #tpu.memory_space<vmem>>, vector<1x128xbf16>,
    %cst_1 = arith.constant 0.000000e+00 : bf16
    %2 = vector.broadcast %cst_1 : bf16 to vector<1x128xbf16>
    %c255 = arith.constant 255 : index
    %c256 = arith.constant 256 : index
    %3 = vector.load %arg8[%c255, %c256] : memref<256x384xbf16, #tpu.memory_space<vmem>>, vector<1x128xbf16>
    tpu.vector_store %arg8[%c255, %c256], %2 {strides = array<i32>} : memref<256x384xbf16, #tpu.memory_space<vmem>>, vector<1x128xbf16>,
    %c0_2 = arith.constant 0 : index
    %c0_3 = arith.constant 0 : index
    %4 = vector.load %arg3[%c0_2, %c0_3] : memref<256x1xbf16, #tpu.memory_space<vmem>>, vector<256x1xbf16>
    %c0_4 = arith.constant 0 : index
    %c0_5 = arith.constant 0 : index
    %5 = vector.load %arg4[%c0_4, %c0_5] : memref<256x1xbf16, #tpu.memory_space<vmem>>, vector<256x1xbf16>
    %cst_6 = arith.constant 0.000000e+00 : f32
    %6 = vector.broadcast %cst_6 : f32 to vector<256x128xf32>
    %c0_7 = arith.constant 0 : index
    %c0_8 = arith.constant 0 : index
    %c0_9 = arith.constant 0 : index
    %7 = vector.load %arg1[%c0_7, %c0_8, %c0_9] : memref<1x288x128xbf16, #tpu.memory_space<vmem>>, vector<1x256x128xbf16>
    %8 = vector.shape_cast %7 : vector<1x256x128xbf16> to vector<256x128xbf16>
    %c0_10 = arith.constant 0 : index
    %c128 = arith.constant 128 : index
    %9 = vector.load %arg8[%c0_10, %c128] : memref<256x384xbf16, #tpu.memory_space<vmem>>, vector<256x128xbf16>
    tpu.vector_store %arg8[%c0_10, %c128], %8 {strides = array<i32>} : memref<256x384xbf16, #tpu.memory_space<vmem>>, vector<256x128xbf16>,
    %10 = vector.broadcast %4 : vector<256x1xbf16> to vector<256x128xbf16>
    %11 = arith.mulf %8, %10 : vector<256x128xbf16>
    %12 = vector.extract_strided_slice %11 {offsets = [0, 0], sizes = [255, 128], strides = [1, 1]} : vector<256x128xbf16> to vector<255x128xbf16>
    %c1 = arith.constant 1 : index
    %c0_11 = arith.constant 0 : index
    %13 = vector.load %arg8[%c1, %c0_11] : memref<256x384xbf16, #tpu.memory_space<vmem>>, vector<255x128xbf16>
    tpu.vector_store %arg8[%c1, %c0_11], %12 {strides = array<i32>} : memref<256x384xbf16, #tpu.memory_space<vmem>>, vector<255x128xbf16>,
    %14 = vector.broadcast %5 : vector<256x1xbf16> to vector<256x128xbf16>
    %15 = arith.mulf %8, %14 : vector<256x128xbf16>
    %16 = vector.extract_strided_slice %15 {offsets = [1, 0], sizes = [255, 128], strides = [1, 1]} : vector<256x128xbf16> to vector<255x128xbf16>
    %c0_12 = arith.constant 0 : index
    %c256_13 = arith.constant 256 : index
    %17 = vector.load %arg8[%c0_12, %c256_13] : memref<256x384xbf16, #tpu.memory_space<vmem>>, vector<255x128xbf16>
    tpu.vector_store %arg8[%c0_12, %c256_13], %16 {strides = array<i32>} : memref<256x384xbf16, #tpu.memory_space<vmem>>, vector<255x128xbf16>,
    %c0_14 = arith.constant 0 : index
    %c0_15 = arith.constant 0 : index
    %18 = vector.load %arg8[%c0_14, %c0_15] : memref<256x384xbf16, #tpu.memory_space<vmem>>, vector<256x384xbf16>
    %c0_16 = arith.constant 0 : index
    %c0_17 = arith.constant 0 : index
    %c0_18 = arith.constant 0 : index
    %19 = vector.load %arg2[%c0_16, %c0_17, %c0_18] : memref<3x384x128xbf16, #tpu.memory_space<vmem>>, vector<1x384x128xbf16>
    %20 = vector.shape_cast %19 : vector<1x384x128xbf16> to vector<384x128xbf16>
    %cst_19 = arith.constant dense<0.000000e+00> : vector<256x128xf32>
    %21 = tpu.matmul %18, %20, %cst_19 {dimension_numbers = #tpu.dot_dimension_numbers<[1], [0], [0], [1], [0, 0, 1, 1], [], []>} : vector<256x384xbf16>, vector<384x128xbf16>, vector<256x128xf32> -> vector<256x128xf32>
    %22 = arith.addf %6, %21 : vector<256x128xf32>
    %c0_20 = arith.constant 0 : index
    %c16 = arith.constant 16 : index
    %c0_21 = arith.constant 0 : index
    %23 = vector.load %arg1[%c0_20, %c16, %c0_21] : memref<1x288x128xbf16, #tpu.memory_space<vmem>>, vector<1x256x128xbf16>
    %24 = vector.shape_cast %23 : vector<1x256x128xbf16> to vector<256x128xbf16>
    %c0_22 = arith.constant 0 : index
    %c128_23 = arith.constant 128 : index
    %25 = vector.load %arg8[%c0_22, %c128_23] : memref<256x384xbf16, #tpu.memory_space<vmem>>, vector<256x128xbf16>
    tpu.vector_store %arg8[%c0_22, %c128_23], %24 {strides = array<i32>} : memref<256x384xbf16, #tpu.memory_space<vmem>>, vector<256x128xbf16>,
    %26 = vector.broadcast %4 : vector<256x1xbf16> to vector<256x128xbf16>
    %27 = arith.mulf %24, %26 : vector<256x128xbf16>
    %28 = vector.extract_strided_slice %27 {offsets = [0, 0], sizes = [255, 128], strides = [1, 1]} : vector<256x128xbf16> to vector<255x128xbf16>
    %c1_24 = arith.constant 1 : index
    %c0_25 = arith.constant 0 : index
    %29 = vector.load %arg8[%c1_24, %c0_25] : memref<256x384xbf16, #tpu.memory_space<vmem>>, vector<255x128xbf16>
    tpu.vector_store %arg8[%c1_24, %c0_25], %28 {strides = array<i32>} : memref<256x384xbf16, #tpu.memory_space<vmem>>, vector<255x128xbf16>,
    %30 = vector.broadcast %5 : vector<256x1xbf16> to vector<256x128xbf16>
    %31 = arith.mulf %24, %30 : vector<256x128xbf16>
    %32 = vector.extract_strided_slice %31 {offsets = [1, 0], sizes = [255, 128], strides = [1, 1]} : vector<256x128xbf16> to vector<255x128xbf16>
    %c0_26 = arith.constant 0 : index
    %c256_27 = arith.constant 256 : index
    %33 = vector.load %arg8[%c0_26, %c256_27] : memref<256x384xbf16, #tpu.memory_space<vmem>>, vector<255x128xbf16>
    tpu.vector_store %arg8[%c0_26, %c256_27], %32 {strides = array<i32>} : memref<256x384xbf16, #tpu.memory_space<vmem>>, vector<255x128xbf16>,
    %c0_28 = arith.constant 0 : index
    %c0_29 = arith.constant 0 : index
    %34 = vector.load %arg8[%c0_28, %c0_29] : memref<256x384xbf16, #tpu.memory_space<vmem>>, vector<256x384xbf16>
    %c1_30 = arith.constant 1 : index
    %c0_31 = arith.constant 0 : index
    %c0_32 = arith.constant 0 : index
    %35 = vector.load %arg2[%c1_30, %c0_31, %c0_32] : memref<3x384x128xbf16, #tpu.memory_space<vmem>>, vector<1x384x128xbf16>
    %36 = vector.shape_cast %35 : vector<1x384x128xbf16> to vector<384x128xbf16>
    %cst_33 = arith.constant dense<0.000000e+00> : vector<256x128xf32>
    %37 = tpu.matmul %34, %36, %cst_33 {dimension_numbers = #tpu.dot_dimension_numbers<[1], [0], [0], [1], [0, 0, 1, 1], [], []>} : vector<256x384xbf16>, vector<384x128xbf16>, vector<256x128xf32> -> vector<256x128xf32>
    %38 = arith.addf %22, %37 : vector<256x128xf32>
    %c0_34 = arith.constant 0 : index
    %c32 = arith.constant 32 : index
    %c0_35 = arith.constant 0 : index
    %39 = vector.load %arg1[%c0_34, %c32, %c0_35] : memref<1x288x128xbf16, #tpu.memory_space<vmem>>, vector<1x256x128xbf16>
    %40 = vector.shape_cast %39 : vector<1x256x128xbf16> to vector<256x128xbf16>
    %c0_36 = arith.constant 0 : index
    %c128_37 = arith.constant 128 : index
    %41 = vector.load %arg8[%c0_36, %c128_37] : memref<256x384xbf16, #tpu.memory_space<vmem>>, vector<256x128xbf16>
    tpu.vector_store %arg8[%c0_36, %c128_37], %40 {strides = array<i32>} : memref<256x384xbf16, #tpu.memory_space<vmem>>, vector<256x128xbf16>,
    %42 = vector.broadcast %4 : vector<256x1xbf16> to vector<256x128xbf16>
    %43 = arith.mulf %40, %42 : vector<256x128xbf16>
    %44 = vector.extract_strided_slice %43 {offsets = [0, 0], sizes = [255, 128], strides = [1, 1]} : vector<256x128xbf16> to vector<255x128xbf16>
    %c1_38 = arith.constant 1 : index
    %c0_39 = arith.constant 0 : index
    %45 = vector.load %arg8[%c1_38, %c0_39] : memref<256x384xbf16, #tpu.memory_space<vmem>>, vector<255x128xbf16>
    tpu.vector_store %arg8[%c1_38, %c0_39], %44 {strides = array<i32>} : memref<256x384xbf16, #tpu.memory_space<vmem>>, vector<255x128xbf16>,
    %46 = vector.broadcast %5 : vector<256x1xbf16> to vector<256x128xbf16>
    %47 = arith.mulf %40, %46 : vector<256x128xbf16>
    %48 = vector.extract_strided_slice %47 {offsets = [1, 0], sizes = [255, 128], strides = [1, 1]} : vector<256x128xbf16> to vector<255x128xbf16>
    %c0_40 = arith.constant 0 : index
    %c256_41 = arith.constant 256 : index
    %49 = vector.load %arg8[%c0_40, %c256_41] : memref<256x384xbf16, #tpu.memory_space<vmem>>, vector<255x128xbf16>
    tpu.vector_store %arg8[%c0_40, %c256_41], %48 {strides = array<i32>} : memref<256x384xbf16, #tpu.memory_space<vmem>>, vector<255x128xbf16>,
    %c0_42 = arith.constant 0 : index
    %c0_43 = arith.constant 0 : index
    %50 = vector.load %arg8[%c0_42, %c0_43] : memref<256x384xbf16, #tpu.memory_space<vmem>>, vector<256x384xbf16>
    %c2 = arith.constant 2 : index
    %c0_44 = arith.constant 0 : index
    %c0_45 = arith.constant 0 : index
    %51 = vector.load %arg2[%c2, %c0_44, %c0_45] : memref<3x384x128xbf16, #tpu.memory_space<vmem>>, vector<1x384x128xbf16>
    %52 = vector.shape_cast %51 : vector<1x384x128xbf16> to vector<384x128xbf16>
    %cst_46 = arith.constant dense<0.000000e+00> : vector<256x128xf32>
    %53 = tpu.matmul %50, %52, %cst_46 {dimension_numbers = #tpu.dot_dimension_numbers<[1], [0], [0], [1], [0, 0, 1, 1], [], []>} : vector<256x384xbf16>, vector<384x128xbf16>, vector<256x128xf32> -> vector<256x128xf32>
    %54 = arith.addf %38, %53 : vector<256x128xf32>
    %55 = arith.truncf %54 : vector<256x128xf32> to vector<256x128xbf16>
    %c0_47 = arith.constant 0 : index
    %c0_48 = arith.constant 0 : index
    %c0_49 = arith.constant 0 : index
    %56 = vector.load %arg6[%c0_47, %c0_48, %c0_49] : memref<1x256x128xbf16, #tpu.memory_space<vmem>>, vector<1x256x128xbf16>
    %57 = vector.shape_cast %56 : vector<1x256x128xbf16> to vector<256x128xbf16>
    %58 = vector.shape_cast %55 : vector<256x128xbf16> to vector<1x256x128xbf16>
    tpu.vector_store %arg6[%c0_47, %c0_48, %c0_49], %58 {strides = array<i32>} : memref<1x256x128xbf16, #tpu.memory_space<vmem>>, vector<1x256x128xbf16>,
    %c0_50 = arith.constant 0 : index
    %c0_51 = arith.constant 0 : index
    %59 = vector.load %arg5[%c0_50, %c0_51] : memref<256x1xf32, #tpu.memory_space<vmem>>, vector<256x1xf32>
    %60 = vector.broadcast %59 : vector<256x1xf32> to vector<256x128xf32>
    %61 = arith.mulf %54, %60 : vector<256x128xf32>
    %cst_52 = arith.constant dense<0.000000e+00> : vector<128xf32>
    %62 = vector.multi_reduction <add>, %61, %cst_52 [0] : vector<256x128xf32> to vector<128xf32>
    %63 = vector.shape_cast %62 : vector<128xf32> to vector<1x128xf32>
    %c0_53 = arith.constant 0 : index
    %c0_54 = arith.constant 0 : index
    %c0_55 = arith.constant 0 : index
    %64 = vector.load %arg7[%c0_53, %c0_54, %c0_55] : memref<1x2x128xf32, #tpu.memory_space<vmem>>, vector<1x1x128xf32>
    %65 = vector.shape_cast %64 : vector<1x1x128xf32> to vector<1x128xf32>
    %66 = vector.shape_cast %63 : vector<1x128xf32> to vector<1x1x128xf32>
    tpu.vector_store %arg7[%c0_53, %c0_54, %c0_55], %66 {strides = array<i32>} : memref<1x2x128xf32, #tpu.memory_space<vmem>>, vector<1x1x128xf32>,
    %67 = arith.mulf %54, %61 : vector<256x128xf32>
    %cst_56 = arith.constant dense<0.000000e+00> : vector<128xf32>
    %68 = vector.multi_reduction <add>, %67, %cst_56 [0] : vector<256x128xf32> to vector<128xf32>
    %69 = vector.shape_cast %68 : vector<128xf32> to vector<1x128xf32>
    %c0_57 = arith.constant 0 : index
    %c1_58 = arith.constant 1 : index
    %c0_59 = arith.constant 0 : index
    %70 = vector.load %arg7[%c0_57, %c1_58, %c0_59] : memref<1x2x128xf32, #tpu.memory_space<vmem>>, vector<1x1x128xf32>
    %71 = vector.shape_cast %70 : vector<1x1x128xf32> to vector<1x128xf32>
    %72 = vector.shape_cast %69 : vector<1x128xf32> to vector<1x1x128xf32>
    tpu.vector_store %arg7[%c0_57, %c1_58, %c0_59], %72 {strides = array<i32>} : memref<1x2x128xf32, #tpu.memory_space<vmem>>, vector<1x1x128xf32>,
    return
  }
  func.func @transform_0(%arg0: i32) -> (i32, i32, i32) {
    %c0_i32 = arith.constant 0 : i32
    %c0_i32_0 = arith.constant 0 : i32
    %c0_i32_1 = arith.constant 0 : i32
    return %arg0, %c0_i32, %c0_i32_0 : i32, i32, i32
  }
  func.func @transform_1(%arg0: i32) -> (i32, i32, i32) {
    %c0_i32 = arith.constant 0 : i32
    %c0_i32_0 = arith.constant 0 : i32
    %c0_i32_1 = arith.constant 0 : i32
    %c0_i32_2 = arith.constant 0 : i32
    return %c0_i32, %c0_i32_0, %c0_i32_1 : i32, i32, i32
  }
  func.func @transform_2(%arg0: i32) -> (i32, i32) {
    %c0_i32 = arith.constant 0 : i32
    %c0_i32_0 = arith.constant 0 : i32
    %c0_i32_1 = arith.constant 0 : i32
    return %c0_i32, %c0_i32_0 : i32, i32
  }
  func.func @transform_3(%arg0: i32) -> (i32, i32) {
    %c0_i32 = arith.constant 0 : i32
    %c0_i32_0 = arith.constant 0 : i32
    %c0_i32_1 = arith.constant 0 : i32
    return %c0_i32, %c0_i32_0 : i32, i32
  }
  func.func @transform_4(%arg0: i32) -> (i32, i32) {
    %c0_i32 = arith.constant 0 : i32
    %c0_i32_0 = arith.constant 0 : i32
    %c0_i32_1 = arith.constant 0 : i32
    return %c0_i32, %c0_i32_0 : i32, i32
  }
  func.func @transform_5(%arg0: i32) -> (i32, i32, i32) {
    %c0_i32 = arith.constant 0 : i32
    %c0_i32_0 = arith.constant 0 : i32
    %c0_i32_1 = arith.constant 0 : i32
    return %arg0, %c0_i32, %c0_i32_0 : i32, i32, i32
  }
  func.func @transform_6(%arg0: i32) -> (i32, i32, i32) {
    %c0_i32 = arith.constant 0 : i32
    %c0_i32_0 = arith.constant 0 : i32
    %c0_i32_1 = arith.constant 0 : i32
    return %arg0, %c0_i32, %c0_i32_0 : i32, i32, i32
  }
}

module attributes {stable_mosaic.version = 11 : i64} {
  func.func @_bn1_relu_pad_kernel(%arg0: i32, %arg1: memref<1x256x128xbf16, #tpu.memory_space<vmem>>, %arg2: memref<1x128xf32, #tpu.memory_space<vmem>>, %arg3: memref<1x128xf32, #tpu.memory_space<vmem>>, %arg4: memref<256x1xf32, #tpu.memory_space<vmem>>, %arg5: memref<1x288x128xbf16, #tpu.memory_space<vmem>>) attributes {dimension_semantics = [#tpu.dimension_semantics<parallel>], iteration_bounds = array<i64: 2>, scalar_prefetch = 0 : i64, scratch_operands = 0 : i64, tpu.core_type = #tpu.core_type<tc>, window_params = [{transform_indices = @transform_0, window_bounds = array<i64: 1, 256, 128>}, {pipeline_mode = #tpu.pipeline_mode<synchronous>, transform_indices = @transform_1, window_bounds = array<i64: 1, 128>}, {pipeline_mode = #tpu.pipeline_mode<synchronous>, transform_indices = @transform_2, window_bounds = array<i64: 1, 128>}, {pipeline_mode = #tpu.pipeline_mode<synchronous>, transform_indices = @transform_3, window_bounds = array<i64: 256, 1>}, {transform_indices = @transform_4, window_bounds = array<i64: 1, 288, 128>}]} {
    %c0 = arith.constant 0 : index
    %c0_0 = arith.constant 0 : index
    %c0_1 = arith.constant 0 : index
    %0 = vector.load %arg1[%c0, %c0_0, %c0_1] : memref<1x256x128xbf16, #tpu.memory_space<vmem>>, vector<1x256x128xbf16>
    %1 = vector.shape_cast %0 : vector<1x256x128xbf16> to vector<256x128xbf16>
    %2 = arith.extf %1 : vector<256x128xbf16> to vector<256x128xf32>
    %c0_2 = arith.constant 0 : index
    %c0_3 = arith.constant 0 : index
    %3 = vector.load %arg2[%c0_2, %c0_3] : memref<1x128xf32, #tpu.memory_space<vmem>>, vector<1x128xf32>
    %4 = vector.broadcast %3 : vector<1x128xf32> to vector<256x128xf32>
    %5 = arith.mulf %2, %4 : vector<256x128xf32>
    %c0_4 = arith.constant 0 : index
    %c0_5 = arith.constant 0 : index
    %6 = vector.load %arg3[%c0_4, %c0_5] : memref<1x128xf32, #tpu.memory_space<vmem>>, vector<1x128xf32>
    %7 = vector.broadcast %6 : vector<1x128xf32> to vector<256x128xf32>
    %8 = arith.addf %5, %7 : vector<256x128xf32>
    %cst = arith.constant 0.000000e+00 : f32
    %9 = vector.broadcast %cst : f32 to vector<256x128xf32>
    %10 = arith.maximumf %8, %9 : vector<256x128xf32>
    %c0_6 = arith.constant 0 : index
    %c0_7 = arith.constant 0 : index
    %11 = vector.load %arg4[%c0_6, %c0_7] : memref<256x1xf32, #tpu.memory_space<vmem>>, vector<256x1xf32>
    %12 = vector.broadcast %11 : vector<256x1xf32> to vector<256x128xf32>
    %13 = arith.mulf %10, %12 : vector<256x128xf32>
    %cst_8 = arith.constant 0.000000e+00 : bf16
    %14 = vector.broadcast %cst_8 : bf16 to vector<16x128xbf16>
    %c0_9 = arith.constant 0 : index
    %c0_10 = arith.constant 0 : index
    %c0_11 = arith.constant 0 : index
    %15 = vector.load %arg5[%c0_9, %c0_10, %c0_11] : memref<1x288x128xbf16, #tpu.memory_space<vmem>>, vector<1x16x128xbf16>
    %16 = vector.shape_cast %15 : vector<1x16x128xbf16> to vector<16x128xbf16>
    %17 = vector.shape_cast %14 : vector<16x128xbf16> to vector<1x16x128xbf16>
    tpu.vector_store %arg5[%c0_9, %c0_10, %c0_11], %17 {strides = array<i32>} : memref<1x288x128xbf16, #tpu.memory_space<vmem>>, vector<1x16x128xbf16>,
    %c0_12 = arith.constant 0 : index
    %c272 = arith.constant 272 : index
    %c0_13 = arith.constant 0 : index
    %18 = vector.load %arg5[%c0_12, %c272, %c0_13] : memref<1x288x128xbf16, #tpu.memory_space<vmem>>, vector<1x16x128xbf16>
    %19 = vector.shape_cast %18 : vector<1x16x128xbf16> to vector<16x128xbf16>
    %20 = vector.shape_cast %14 : vector<16x128xbf16> to vector<1x16x128xbf16>
    tpu.vector_store %arg5[%c0_12, %c272, %c0_13], %20 {strides = array<i32>} : memref<1x288x128xbf16, #tpu.memory_space<vmem>>, vector<1x16x128xbf16>,
    %21 = arith.truncf %13 : vector<256x128xf32> to vector<256x128xbf16>
    %c0_14 = arith.constant 0 : index
    %c16 = arith.constant 16 : index
    %c0_15 = arith.constant 0 : index
    %22 = vector.load %arg5[%c0_14, %c16, %c0_15] : memref<1x288x128xbf16, #tpu.memory_space<vmem>>, vector<1x256x128xbf16>
    %23 = vector.shape_cast %22 : vector<1x256x128xbf16> to vector<256x128xbf16>
    %24 = vector.shape_cast %21 : vector<256x128xbf16> to vector<1x256x128xbf16>
    tpu.vector_store %arg5[%c0_14, %c16, %c0_15], %24 {strides = array<i32>} : memref<1x288x128xbf16, #tpu.memory_space<vmem>>, vector<1x256x128xbf16>,
    return
  }
  func.func @transform_0(%arg0: i32) -> (i32, i32, i32) {
    %c0_i32 = arith.constant 0 : i32
    %c0_i32_0 = arith.constant 0 : i32
    %c0_i32_1 = arith.constant 0 : i32
    return %arg0, %c0_i32, %c0_i32_0 : i32, i32, i32
  }
  func.func @transform_1(%arg0: i32) -> (i32, i32) {
    %c0_i32 = arith.constant 0 : i32
    %c0_i32_0 = arith.constant 0 : i32
    %c0_i32_1 = arith.constant 0 : i32
    return %c0_i32, %c0_i32_0 : i32, i32
  }
  func.func @transform_2(%arg0: i32) -> (i32, i32) {
    %c0_i32 = arith.constant 0 : i32
    %c0_i32_0 = arith.constant 0 : i32
    %c0_i32_1 = arith.constant 0 : i32
    return %c0_i32, %c0_i32_0 : i32, i32
  }
  func.func @transform_3(%arg0: i32) -> (i32, i32) {
    %c0_i32 = arith.constant 0 : i32
    %c0_i32_0 = arith.constant 0 : i32
    %c0_i32_1 = arith.constant 0 : i32
    return %c0_i32, %c0_i32_0 : i32, i32
  }
  func.func @transform_4(%arg0: i32) -> (i32, i32, i32) {
    %c0_i32 = arith.constant 0 : i32
    %c0_i32_0 = arith.constant 0 : i32
    %c0_i32_1 = arith.constant 0 : i32
    return %arg0, %c0_i32, %c0_i32_0 : i32, i32, i32
  }
}

module attributes {stable_mosaic.version = 11 : i64} {
  func.func @_bn2_proj_kernel(%arg0: i32, %arg1: memref<512x128xbf16, #tpu.memory_space<vmem>>, %arg2: memref<512x128xbf16, #tpu.memory_space<vmem>>, %arg3: memref<128x128xbf16, #tpu.memory_space<vmem>>, %arg4: memref<1x128xf32, #tpu.memory_space<vmem>>, %arg5: memref<1x128xf32, #tpu.memory_space<vmem>>, %arg6: memref<512x128xbf16, #tpu.memory_space<vmem>>) attributes {dimension_semantics = [#tpu.dimension_semantics<parallel>], iteration_bounds = array<i64: 1>, scalar_prefetch = 0 : i64, scratch_operands = 0 : i64, tpu.core_type = #tpu.core_type<tc>, window_params = [{transform_indices = @transform_0, window_bounds = array<i64: 512, 128>}, {transform_indices = @transform_1, window_bounds = array<i64: 512, 128>}, {pipeline_mode = #tpu.pipeline_mode<synchronous>, transform_indices = @transform_2, window_bounds = array<i64: 128, 128>}, {pipeline_mode = #tpu.pipeline_mode<synchronous>, transform_indices = @transform_3, window_bounds = array<i64: 1, 128>}, {pipeline_mode = #tpu.pipeline_mode<synchronous>, transform_indices = @transform_4, window_bounds = array<i64: 1, 128>}, {transform_indices = @transform_5, window_bounds = array<i64: 512, 128>}]} {
    %c0 = arith.constant 0 : index
    %c0_0 = arith.constant 0 : index
    %0 = vector.load %arg2[%c0, %c0_0] : memref<512x128xbf16, #tpu.memory_space<vmem>>, vector<512x128xbf16>
    %c0_1 = arith.constant 0 : index
    %c0_2 = arith.constant 0 : index
    %1 = vector.load %arg3[%c0_1, %c0_2] : memref<128x128xbf16, #tpu.memory_space<vmem>>, vector<128x128xbf16>
    %cst = arith.constant dense<0.000000e+00> : vector<512x128xf32>
    %2 = tpu.matmul %0, %1, %cst {dimension_numbers = #tpu.dot_dimension_numbers<[1], [0], [0], [1], [0, 0, 1, 1], [], []>} : vector<512x128xbf16>, vector<128x128xbf16>, vector<512x128xf32> -> vector<512x128xf32>
    %c0_3 = arith.constant 0 : index
    %c0_4 = arith.constant 0 : index
    %3 = vector.load %arg1[%c0_3, %c0_4] : memref<512x128xbf16, #tpu.memory_space<vmem>>, vector<512x128xbf16>
    %4 = arith.extf %3 : vector<512x128xbf16> to vector<512x128xf32>
    %c0_5 = arith.constant 0 : index
    %c0_6 = arith.constant 0 : index
    %5 = vector.load %arg4[%c0_5, %c0_6] : memref<1x128xf32, #tpu.memory_space<vmem>>, vector<1x128xf32>
    %6 = vector.broadcast %5 : vector<1x128xf32> to vector<512x128xf32>
    %7 = arith.mulf %4, %6 : vector<512x128xf32>
    %c0_7 = arith.constant 0 : index
    %c0_8 = arith.constant 0 : index
    %8 = vector.load %arg5[%c0_7, %c0_8] : memref<1x128xf32, #tpu.memory_space<vmem>>, vector<1x128xf32>
    %9 = vector.broadcast %8 : vector<1x128xf32> to vector<512x128xf32>
    %10 = arith.addf %7, %9 : vector<512x128xf32>
    %11 = arith.addf %10, %2 : vector<512x128xf32>
    %cst_9 = arith.constant 0.000000e+00 : f32
    %12 = vector.broadcast %cst_9 : f32 to vector<512x128xf32>
    %13 = arith.maximumf %11, %12 : vector<512x128xf32>
    %14 = arith.truncf %13 : vector<512x128xf32> to vector<512x128xbf16>
    %c0_10 = arith.constant 0 : index
    %c0_11 = arith.constant 0 : index
    %15 = vector.load %arg6[%c0_10, %c0_11] : memref<512x128xbf16, #tpu.memory_space<vmem>>, vector<512x128xbf16>
    tpu.vector_store %arg6[%c0_10, %c0_11], %14 {strides = array<i32>} : memref<512x128xbf16, #tpu.memory_space<vmem>>, vector<512x128xbf16>,
    return
  }
  func.func @transform_0(%arg0: i32) -> (i32, i32) {
    %c0_i32 = arith.constant 0 : i32
    %c0_i32_0 = arith.constant 0 : i32
    return %arg0, %c0_i32 : i32, i32
  }
  func.func @transform_1(%arg0: i32) -> (i32, i32) {
    %c0_i32 = arith.constant 0 : i32
    %c0_i32_0 = arith.constant 0 : i32
    return %arg0, %c0_i32 : i32, i32
  }
  func.func @transform_2(%arg0: i32) -> (i32, i32) {
    %c0_i32 = arith.constant 0 : i32
    %c0_i32_0 = arith.constant 0 : i32
    %c0_i32_1 = arith.constant 0 : i32
    return %c0_i32, %c0_i32_0 : i32, i32
  }
  func.func @transform_3(%arg0: i32) -> (i32, i32) {
    %c0_i32 = arith.constant 0 : i32
    %c0_i32_0 = arith.constant 0 : i32
    %c0_i32_1 = arith.constant 0 : i32
    return %c0_i32, %c0_i32_0 : i32, i32
  }
  func.func @transform_4(%arg0: i32) -> (i32, i32) {
    %c0_i32 = arith.constant 0 : i32
    %c0_i32_0 = arith.constant 0 : i32
    %c0_i32_1 = arith.constant 0 : i32
    return %c0_i32, %c0_i32_0 : i32, i32
  }
  func.func @transform_5(%arg0: i32) -> (i32, i32) {
    %c0_i32 = arith.constant 0 : i32
    %c0_i32_0 = arith.constant 0 : i32
    return %arg0, %c0_i32 : i32, i32
  }
}

</mosaic_0001>

<bundles_post_ra>
// kernel: residual_block_forward.5
= control target key start
LH: loop header
LB: loop body
LE: loop exit
PB: predicated region body
PF: predicated region fallthrough
CT: control target
= control target key end

     0   :  { %s1114_s15 = smov 0   ;;  %s1345_s0 = inlined_call_operand.vmem [shape: bf16[2,256,128], index: 0, kind: input, shape index: {}]   ;;  %s1346_s1 = inlined_call_operand.vmem [shape: f32[1,128], index: 1, kind: input, shape index: {}]   ;;  %s1347_s2 = inlined_call_operand.vmem [shape: f32[1,128], index: 2, kind: input, shape index: {}]   ;;  %s1348_s3 = inlined_call_operand.vmem [shape: f32[256,1], index: 3, kind: input, shape index: {}]   ;;  %s1349_s4 = inlined_call_operand.vmem [shape: bf16[2,288,128], index: 4, kind: output, shape index: {}]  }
   0x1 LB: > { %s816_s16 = sadd.s32 4294967295, %s1086_s15   ;;  %p820_p0 = scmp.ge.s32.totalorder %s1086_s15, 1  ;;  %s1086_s15 = sphi %s1114_s15, %s14_s15  }
   0x2   : > { %p162_p1 = scmp.lt.s32.totalorder %s1086_s15, 3 }
   0x4   : > { %p163_p2 = pnand %p820_p0, %p162_p1 }
   0x5   : > { %p188_p3 = scmp.lt.s32.totalorder (!%p163_p2), %s816_s16, 1  ;;  %v375_v0 = vld [vmem:[%s1348_s3 + $0x10] sm:$0xff] (!%p163_p2)  ;;  %v373_v1 = vld [vmem:[%s1348_s3] sm:$0xff] (!%p163_p2)  ;;  %v1088_v2 = vmov (!%p163_p2), 0   ;;  %v376_v3 = vld [vmem:[%s1348_s3 + $0x18] sm:$0xff] (!%p163_p2) }
   0x6   : > { %166 = sbr.rel (%p163_p2) target bundleno = 200 (0xc8), region = 36  ;;  %1079 = vset.pattern.permute.xlu1 (!%p163_p2), %v1088_v2  ;;  %1078 = vset.pattern.permute.xlu0 (!%p163_p2), %v1088_v2  ;;  %v374_v4 = vld [vmem:[%s1348_s3 + $0x8] sm:$0xff] (!%p163_p2)  ;;  %v377_v6 = vld [vmem:[%s1348_s3 + $0x20] sm:$0xff] (!%p163_p2)  ;;  %v380_v7 = vld [vmem:[%s1348_s3 + $0x38] sm:$0xff] (!%p163_p2) }
   0x7   : > { %417 = vperm.xlu1 (!%p163_p2), %1079, %v375_v0   ;;  %407 = vperm.xlu0 (!%p163_p2), %1078, %v373_v1   ;;  %v378_v5 = vld [vmem:[%s1348_s3 + $0x28] sm:$0xff] (!%p163_p2)  ;;  %v379_v8 = vld [vmem:[%s1348_s3 + $0x30] sm:$0xff] (!%p163_p2)  ;;  %v381_v10 = vld [vmem:[%s1348_s3 + $0x40] sm:$0xff] (!%p163_p2) }
   0x8   : > { %v382_v9 = vld [vmem:[%s1348_s3 + $0x48] sm:$0xff] (!%p163_p2)  ;;  %v384_v11 = vld [vmem:[%s1348_s3 + $0x58] sm:$0xff] (!%p163_p2)  ;;  %v383_v12 = vld [vmem:[%s1348_s3 + $0x50] sm:$0xff] (!%p163_p2) }
   0x9   : > { %v386_v13 = vld [vmem:[%s1348_s3 + $0x68] sm:$0xff] (!%p163_p2)  ;;  %v385_v14 = vld [vmem:[%s1348_s3 + $0x60] sm:$0xff] (!%p163_p2)  ;;  %v388_v15 = vld [vmem:[%s1348_s3 + $0x78] sm:$0xff] (!%p163_p2) }
   0xa   : > { %v387_v16 = vld [vmem:[%s1348_s3 + $0x70] sm:$0xff] (!%p163_p2)  ;;  %v390_v17 = vld [vmem:[%s1348_s3 + $0x88] sm:$0xff] (!%p163_p2)  ;;  %v389_v18 = vld [vmem:[%s1348_s3 + $0x80] sm:$0xff] (!%p163_p2) }
   0xb   : > { %422 = vperm.xlu1 (!%p163_p2), %1079, %v376_v3   ;;  %412 = vperm.xlu0 (!%p163_p2), %1078, %v374_v4   ;;  %v392_v19 = vld [vmem:[%s1348_s3 + $0x98] sm:$0xff] (!%p163_p2)  ;;  %v391_v20 = vld [vmem:[%s1348_s3 + $0x90] sm:$0xff] (!%p163_p2)  ;;  %v394_v21 = vld [vmem:[%s1348_s3 + $0xa8] sm:$0xff] (!%p163_p2) }
   0xc   : > { %v393_v22 = vld [vmem:[%s1348_s3 + $0xa0] sm:$0xff] (!%p163_p2)  ;;  %v396_v23 = vld [vmem:[%s1348_s3 + $0xb8] sm:$0xff] (!%p163_p2)  ;;  %v395_v24 = vld [vmem:[%s1348_s3 + $0xb0] sm:$0xff] (!%p163_p2) }
   0xd   : > { %s1351_s16 = smov (!%p188_p3, %s816_s16), 1  ;;  %v398_v25 = vld [vmem:[%s1348_s3 + $0xc8] sm:$0xff]  ;;  %v397_v26 = vld [vmem:[%s1348_s3 + $0xc0] sm:$0xff]  ;;  %v400_v27 = vld [vmem:[%s1348_s3 + $0xd8] sm:$0xff] }
   0xe   : > { %s1068_s25 = smul.u32 144, %s1351_s16  ;;  %v399_v28 = vld [vmem:[%s1348_s3 + $0xd0] sm:$0xff]  ;;  %v402_v29 = vld [vmem:[%s1348_s3 + $0xe8] sm:$0xff]  ;;  %v401_v30 = vld [vmem:[%s1348_s3 + $0xe0] sm:$0xff]  ;;  %s860_s13 = sshll.u32 %s1351_s16, 7 }
   0xf   : > { %432 = vperm.xlu1 %1079, %v378_v5   ;;  %427 = vperm.xlu0 %1078, %v377_v6   ;;  %v404_v31 = vld [vmem:[%s1348_s3 + $0xf8] sm:$0xff]  ;;  %v403_v32 = vld [vmem:[%s1348_s3 + $0xf0] sm:$0xff]  ;;  %s1234_s18 = scalar_lea.vmem %s1345_s0, %s860_s13  ;;  %v1242_v40 = vld [vmem:[%s1346_s1] ss:$0 sm:$0xff] }
  0x10   : > { %s1140_s28 = scalar_lea.vmem %s1349_s4, %s1068_s25  ;;  %v1037_v33 = vld [vmem:[%s1234_s18 + $0x8] sm:$0xff]   ;;  %v894_v34 = vld [vmem:[%s1234_s18] sm:$0xff]   ;;  %v1038_v35 = vld [vmem:[%s1234_s18 + $0x10] sm:$0xff]  }
  0x11   : > { %597 = vst [vmem:[%s1140_s28] sm:$0xf] %v1088_v2  ;;  %598 = vst [vmem:[%s1140_s28 + $0x4] sm:$0xf] %v1088_v2  ;;  %v899_v36 = vunpack.c.l.bf16 %v1037_v33  ;;  %v895_v37 = vunpack.c.l.bf16 %v894_v34  ;;  %v900_v38 = vunpack.c.h.bf16 %v1037_v33  ;;  %v896_v39 = vunpack.c.h.bf16 %v894_v34  ;;  %v1039_v43 = vld [vmem:[%s1234_s18 + $0x18] sm:$0xff]   ;;  %v1252_v48 = vld [vmem:[%s1347_s2] ss:$0 sm:$0xff] }
  0x12   : > { %599 = vst [vmem:[%s1140_s28 + $0x88] sm:$0xf] %v1088_v2  ;;  %600 = vst [vmem:[%s1140_s28 + $0x8c] sm:$0xf] %v1088_v2  ;;  %v904_v41 = vunpack.c.h.bf16 %v1038_v35  ;;  %v903_v42 = vunpack.c.l.bf16 %v1038_v35  ;;  %v908_v51 = vunpack.c.h.bf16 %v1039_v43  ;;  %v907_v52 = vunpack.c.l.bf16 %v1039_v43  ;;  %v1040_v57 = vld [vmem:[%s1234_s18 + $0x20] sm:$0xff]   ;;  %v1041_v6 = vld [vmem:[%s1234_s18 + $0x28] sm:$0xff]  }
  0x13   : > { %442 = vperm.xlu1 %1079, %v380_v7   ;;  %437 = vperm.xlu0 %1078, %v379_v8   ;;  %v272_v44 = vmul.f32 %v899_v36, %v1242_v40  ;;  %v270_v45 = vmul.f32 %v895_v37, %v1242_v40  ;;  %v273_v46 = vmul.f32 %v900_v38, %v1242_v40  ;;  %v912_v0 = vunpack.c.h.bf16 %v1040_v57 }
  0x14   : > { %v271_v47 = vmul.f32 %v896_v39, %v1242_v40  ;;  %v275_v49 = vmul.f32 %v904_v41, %v1242_v40  ;;  %v274_v50 = vmul.f32 %v903_v42, %v1242_v40  ;;  %v277_v60 = vmul.f32 %v908_v51, %v1242_v40 }
  0x15   : > { %v311_v53 = vadd.f32 %v1252_v48, %v272_v44  ;;  %v309_v54 = vadd.f32 %v1252_v48, %v270_v45  ;;  %v312_v55 = vadd.f32 %v1252_v48, %v273_v46  ;;  %v276_v61 = vmul.f32 %v907_v52, %v1242_v40 }
  0x16   : > { %v310_v56 = vadd.f32 %v1252_v48, %v271_v47  ;;  %v314_v58 = vadd.f32 %v1252_v48, %v275_v49  ;;  %v313_v59 = vadd.f32 %v1252_v48, %v274_v50  ;;  %v911_v1 = vunpack.c.l.bf16 %v1040_v57  ;;  %v1044_v47 = vld [vmem:[%s1234_s18 + $0x40] sm:$0xff]  }
  0x17   : > { %452 = vperm.xlu1 %1079, %v382_v9   ;;  %447 = vperm.xlu0 %1078, %v381_v10   ;;  %v343_v2 = vmax.f32 %v311_v53, 0.0  ;;  %v341_v3 = vmax.f32 %v309_v54, 0.0  ;;  %v344_v4 = vmax.f32 %v312_v55, 0.0  ;;  %v316_v9 = vadd.f32 %v1252_v48, %v277_v60 }
  0x18   : > { %v342_v5 = vmax.f32 %v310_v56, 0.0  ;;  %v346_v7 = vmax.f32 %v314_v58, 0.0  ;;  %v345_v8 = vmax.f32 %v313_v59, 0.0  ;;  %v315_v10 = vadd.f32 %v1252_v48, %v276_v61 }
  0x19   : > { %v928_v54 = vunpack.c.h.bf16 %v1044_v47  ;;  %v927_v55 = vunpack.c.l.bf16 %v1044_v47 }
  0x1b   : > { %462 = vperm.xlu1 %1079, %v384_v11   ;;  %457 = vperm.xlu0 %1078, %v383_v12  }
  0x1f   : > { %472 = vperm.xlu1 %1079, %v386_v13   ;;  %467 = vperm.xlu0 %1078, %v385_v14   ;;  %v279_v13 = vmul.f32 %v912_v0, %v1242_v40  ;;  %v278_v14 = vmul.f32 %v911_v1, %v1242_v40 }
  0x21   : > { %v318_v35 = vadd.f32 %v1252_v48, %v279_v13  ;;  %v317_v36 = vadd.f32 %v1252_v48, %v278_v14 }
  0x23   : > { %482 = vperm.xlu1 %1079, %v388_v15   ;;  %477 = vperm.xlu0 %1078, %v387_v16   ;;  %v916_v15 = vunpack.c.h.bf16 %v1041_v6  ;;  %v915_v16 = vunpack.c.l.bf16 %v1041_v6  ;;  %v350_v51 = vmax.f32 %v318_v35, 0.0  ;;  %v349_v52 = vmax.f32 %v317_v36, 0.0 }
  0x27   : > { %492 = vperm.xlu1 %1079, %v390_v17   ;;  %487 = vperm.xlu0 %1078, %v389_v18  }
  0x2b   : > { %502 = vperm.xlu1 %1079, %v392_v19   ;;  %497 = vperm.xlu0 %1078, %v391_v20  }
  0x2f   : > { %512 = vperm.xlu1 %1079, %v394_v21   ;;  %507 = vperm.xlu0 %1078, %v393_v22   ;;  %v1042_v21 = vld [vmem:[%s1234_s18 + $0x30] sm:$0xff]  }
  0x33   : > { %522 = vperm.xlu1 %1079, %v396_v23   ;;  %517 = vperm.xlu0 %1078, %v395_v24   ;;  %v348_v24 = vmax.f32 %v316_v9, 0.0 }
  0x37   : > { %532 = vperm.xlu1 %1079, %v398_v25   ;;  %527 = vperm.xlu0 %1078, %v397_v26   ;;  %v347_v25 = vmax.f32 %v315_v10, 0.0 }
  0x3b   : > { %542 = vperm.xlu1 %1079, %v400_v27   ;;  %537 = vperm.xlu0 %1078, %v399_v28   ;;  %v281_v28 = vmul.f32 %v916_v15, %v1242_v40 }
  0x3d   : > { %v320_v43 = vadd.f32 %v1252_v48, %v281_v28 }
  0x3f   : > { %552 = vperm.xlu1 %1079, %v402_v29   ;;  %547 = vperm.xlu0 %1078, %v401_v30   ;;  %v280_v29 = vmul.f32 %v915_v16, %v1242_v40  ;;  %v920_v30 = vunpack.c.h.bf16 %v1042_v21  ;;  %v352_v0 = vmax.f32 %v320_v43, 0.0  ;;  %v1046_v16 = vld [vmem:[%s1234_s18 + $0x50] sm:$0xff]  }
  0x41   : > { %v319_v44 = vadd.f32 %v1252_v48, %v280_v29  ;;  %v283_v45 = vmul.f32 %v920_v30, %v1242_v40  ;;  %v1047_v30 = vld [vmem:[%s1234_s18 + $0x58] sm:$0xff]  }
  0x43   : > { %562 = vperm.xlu1 %1079, %v404_v31   ;;  %557 = vperm.xlu0 %1078, %v403_v32   ;;  %v919_v31 = vunpack.c.l.bf16 %v1042_v21  ;;  %v1043_v32 = vld [vmem:[%s1234_s18 + $0x38] sm:$0xff]   ;;  %v322_v58 = vadd.f32 %v1252_v48, %v283_v45  ;;  %v351_v1 = vmax.f32 %v319_v44, 0.0  ;;  %v940_v44 = vunpack.c.h.bf16 %v1047_v30 }
  0x44   : > { %v924_v38 = vunpack.c.h.bf16 %v1043_v32  ;;  %v923_v39 = vunpack.c.l.bf16 %v1043_v32  ;;  %v939_v45 = vunpack.c.l.bf16 %v1047_v30 }
  0x45   : > { %v282_v46 = vmul.f32 %v919_v31, %v1242_v40  ;;  %v354_v14 = vmax.f32 %v322_v58, 0.0  ;;  %v293_v58 = vmul.f32 %v940_v44, %v1242_v40 }
  0x46   : > { %v285_v60 = vmul.f32 %v924_v38, %v1242_v40  ;;  %v284_v61 = vmul.f32 %v923_v39, %v1242_v40 }
  0x47   : > { %v321_v59 = vadd.f32 %v1252_v48, %v282_v46 }
  0x48   : > { %v323_v9 = vadd.f32 %v1252_v48, %v284_v61 }
  0x49   : > { %v353_v15 = vmax.f32 %v321_v59, 0.0  ;;  %v292_v59 = vmul.f32 %v939_v45, %v1242_v40 }
  0x4a   : > { %v355_v29 = vmax.f32 %v323_v9, 0.0 }
  0x4b   : > { %v331_v9 = vadd.f32 %v1252_v48, %v292_v59 }
  0x86   : > { %v418_v62 = vpop.permute.xlu1 %417  ;;  %v408_v63 = vpop.permute.xlu0 %407 }
  0x87   : > { %v567_v17 = vmul.f32 %v418_v62, %v343_v2  ;;  %v565_v18 = vmul.f32 %v408_v63, %v341_v3  ;;  %v1045_v2 = vld [vmem:[%s1234_s18 + $0x48] sm:$0xff]  }
  0x88   : > { %v932_v10 = vunpack.c.h.bf16 %v1045_v2 }
  0x8a   : > { %v423_v11 = vpop.permute.xlu1 %422  ;;  %v413_v12 = vpop.permute.xlu0 %412 }
  0x8b   : > { %v568_v19 = vmul.f32 %v423_v11, %v344_v4  ;;  %v566_v20 = vmul.f32 %v413_v12, %v342_v5  ;;  %v287_v4 = vmul.f32 %v928_v54, %v1242_v40  ;;  %v286_v5 = vmul.f32 %v927_v55, %v1242_v40 }
  0x8c   : > { %v931_v11 = vunpack.c.l.bf16 %v1045_v2 }
  0x8d   : > { %v965_v22 = vpack.c.bf16 %v568_v19, %v567_v17  ;;  %v960_v23 = vpack.c.bf16 %v566_v20, %v565_v18  ;;  %v326_v18 = vadd.f32 %v1252_v48, %v287_v4  ;;  %v325_v19 = vadd.f32 %v1252_v48, %v286_v5 }
  0x8e   : > { %v433_v26 = vpop.permute.xlu1 %432  ;;  %v428_v27 = vpop.permute.xlu0 %427 }
  0x8f   : > { %1053 = vst [vmem:[%s1140_s28 + $0x10] sm:$0xff] %v965_v22   ;;  %1052 = vst [vmem:[%s1140_s28 + $0x8] sm:$0xff] %v960_v23   ;;  %v570_v33 = vmul.f32 %v433_v26, %v346_v7  ;;  %v569_v34 = vmul.f32 %v428_v27, %v345_v8  ;;  %v324_v8 = vadd.f32 %v1252_v48, %v285_v60  ;;  %v358_v32 = vmax.f32 %v326_v18, 0.0  ;;  %v1049_v60 = vld [vmem:[%s1234_s18 + $0x68] sm:$0xff]  }
  0x90   : > { %v289_v22 = vmul.f32 %v932_v10, %v1242_v40  ;;  %v288_v23 = vmul.f32 %v931_v11, %v1242_v40  ;;  %v948_v4 = vunpack.c.h.bf16 %v1049_v60  ;;  %v947_v5 = vunpack.c.l.bf16 %v1049_v60  ;;  %v1050_v10 = vld [vmem:[%s1234_s18 + $0x70] sm:$0xff]  }
  0x91   : > { %v970_v37 = vpack.c.bf16 %v570_v33, %v569_v34  ;;  %v356_v28 = vmax.f32 %v324_v8, 0.0  ;;  %v357_v33 = vmax.f32 %v325_v19, 0.0  ;;  %v332_v8 = vadd.f32 %v1252_v48, %v293_v58 }
  0x92   : > { %v443_v41 = vpop.permute.xlu1 %442  ;;  %v438_v42 = vpop.permute.xlu0 %437  ;;  %v328_v36 = vadd.f32 %v1252_v48, %v289_v22  ;;  %v952_v18 = vunpack.c.h.bf16 %v1050_v10  ;;  %v951_v19 = vunpack.c.l.bf16 %v1050_v10 }
  0x93   : > { %1054 = vst [vmem:[%s1140_s28 + $0x18] sm:$0xff] %v970_v37   ;;  %v572_v49 = vmul.f32 %v443_v41, %v348_v24  ;;  %v571_v50 = vmul.f32 %v438_v42, %v347_v25  ;;  %v936_v24 = vunpack.c.h.bf16 %v1046_v16  ;;  %v935_v25 = vunpack.c.l.bf16 %v1046_v16  ;;  %v1048_v41 = vld [vmem:[%s1234_s18 + $0x60] sm:$0xff]  }
  0x94   : > { %v327_v37 = vadd.f32 %v1252_v48, %v288_v23  ;;  %v944_v47 = vunpack.c.h.bf16 %v1048_v41  ;;  %v297_v16 = vmul.f32 %v948_v4, %v1242_v40  ;;  %v364_v22 = vmax.f32 %v332_v8, 0.0 }
  0x95   : > { %v975_v53 = vpack.c.bf16 %v572_v49, %v571_v50  ;;  %v291_v38 = vmul.f32 %v936_v24, %v1242_v40  ;;  %v290_v39 = vmul.f32 %v935_v25, %v1242_v40  ;;  %v943_v49 = vunpack.c.l.bf16 %v1048_v41  ;;  %v1051_v24 = vld [vmem:[%s1234_s18 + $0x78] sm:$0xff]  }
  0x96   : > { %v453_v56 = vpop.permute.xlu1 %452  ;;  %v448_v57 = vpop.permute.xlu0 %447  ;;  %v363_v23 = vmax.f32 %v331_v9, 0.0  ;;  %v336_v30 = vadd.f32 %v1252_v48, %v297_v16 }
  0x97   : > { %1055 = vst [vmem:[%s1140_s28 + $0x20] sm:$0xff] %v975_v53   ;;  %v574_v62 = vmul.f32 %v453_v56, %v350_v51  ;;  %v573_v63 = vmul.f32 %v448_v57, %v349_v52  ;;  %v360_v52 = vmax.f32 %v328_v36, 0.0  ;;  %v359_v53 = vmax.f32 %v327_v37, 0.0 }
  0x98   : > { %v330_v54 = vadd.f32 %v1252_v48, %v291_v38  ;;  %v329_v55 = vadd.f32 %v1252_v48, %v290_v39  ;;  %v956_v36 = vunpack.c.h.bf16 %v1051_v24  ;;  %v955_v37 = vunpack.c.l.bf16 %v1051_v24 }
  0x99   : > { %v980_v3 = vpack.c.bf16 %v574_v62, %v573_v63  ;;  %v295_v62 = vmul.f32 %v944_v47, %v1242_v40  ;;  %v294_v63 = vmul.f32 %v943_v49, %v1242_v40 }
  0x9a   : > { %v463_v6 = vpop.permute.xlu1 %462  ;;  %v458_v7 = vpop.permute.xlu0 %457  ;;  %v362_v2 = vmax.f32 %v330_v54, 0.0  ;;  %v301_v49 = vmul.f32 %v956_v36, %v1242_v40 }
  0x9b   : > { %1056 = vst [vmem:[%s1140_s28 + $0x28] sm:$0xff] %v980_v3   ;;  %v576_v12 = vmul.f32 %v463_v6, %v352_v0  ;;  %v575_v13 = vmul.f32 %v458_v7, %v351_v1  ;;  %v361_v3 = vmax.f32 %v329_v55, 0.0 }
  0x9c   : > { %v340_v58 = vadd.f32 %v1252_v48, %v301_v49 }
  0x9d   : > { %v985_v17 = vpack.c.bf16 %v576_v12, %v575_v13  ;;  %v334_v12 = vadd.f32 %v1252_v48, %v295_v62  ;;  %v333_v13 = vadd.f32 %v1252_v48, %v294_v63 }
  0x9e   : > { %v473_v20 = vpop.permute.xlu1 %472  ;;  %v468_v21 = vpop.permute.xlu0 %467 }
  0x9f   : > { %1057 = vst [vmem:[%s1140_s28 + $0x30] sm:$0xff] %v985_v17   ;;  %v578_v26 = vmul.f32 %v473_v20, %v354_v14  ;;  %v577_v27 = vmul.f32 %v468_v21, %v353_v15  ;;  %v296_v17 = vmul.f32 %v947_v5, %v1242_v40 }
  0xa1   : > { %v990_v31 = vpack.c.bf16 %v578_v26, %v577_v27  ;;  %v366_v26 = vmax.f32 %v334_v12, 0.0  ;;  %v365_v27 = vmax.f32 %v333_v13, 0.0 }
  0xa2   : > { %v483_v34 = vpop.permute.xlu1 %482  ;;  %v478_v35 = vpop.permute.xlu0 %477 }
  0xa3   : > { %1058 = vst [vmem:[%s1140_s28 + $0x38] sm:$0xff] %v990_v31   ;;  %v580_v42 = vmul.f32 %v483_v34, %v356_v28  ;;  %v579_v43 = vmul.f32 %v478_v35, %v355_v29  ;;  %v335_v31 = vadd.f32 %v1252_v48, %v296_v17 }
  0xa5   : > { %v995_v46 = vpack.c.bf16 %v580_v42, %v579_v43  ;;  %v368_v42 = vmax.f32 %v336_v30, 0.0  ;;  %v367_v43 = vmax.f32 %v335_v31, 0.0 }
  0xa6   : > { %v493_v50 = vpop.permute.xlu1 %492  ;;  %v488_v51 = vpop.permute.xlu0 %487 }
  0xa7   : > { %1059 = vst [vmem:[%s1140_s28 + $0x40] sm:$0xff] %v995_v46   ;;  %v582_v56 = vmul.f32 %v493_v50, %v358_v32  ;;  %v581_v57 = vmul.f32 %v488_v51, %v357_v33  ;;  %v299_v32 = vmul.f32 %v952_v18, %v1242_v40  ;;  %v298_v33 = vmul.f32 %v951_v19, %v1242_v40 }
  0xa8   : > { %v300_v50 = vmul.f32 %v955_v37, %v1242_v40 }
  0xa9   : > { %v1000_v61 = vpack.c.bf16 %v582_v56, %v581_v57  ;;  %v338_v44 = vadd.f32 %v1252_v48, %v299_v32  ;;  %v337_v45 = vadd.f32 %v1252_v48, %v298_v33 }
  0xaa   : > { %v503_v0 = vpop.permute.xlu1 %502  ;;  %v498_v1 = vpop.permute.xlu0 %497  ;;  %v339_v59 = vadd.f32 %v1252_v48, %v300_v50 }
  0xab   : > { %1060 = vst [vmem:[%s1140_s28 + $0x48] sm:$0xff] %v1000_v61   ;;  %v584_v6 = vmul.f32 %v503_v0, %v360_v52  ;;  %v583_v7 = vmul.f32 %v498_v1, %v359_v53  ;;  %v370_v54 = vmax.f32 %v338_v44, 0.0  ;;  %v369_v55 = vmax.f32 %v337_v45, 0.0 }
  0xac   : > { %v372_v0 = vmax.f32 %v340_v58, 0.0  ;;  %v371_v1 = vmax.f32 %v339_v59, 0.0 }
  0xad   : > { %v1005_v11 = vpack.c.bf16 %v584_v6, %v583_v7 }
  0xae   : > { %v513_v14 = vpop.permute.xlu1 %512  ;;  %v508_v15 = vpop.permute.xlu0 %507 }
  0xaf   : > { %1061 = vst [vmem:[%s1140_s28 + $0x50] sm:$0xff] %v1005_v11   ;;  %v586_v20 = vmul.f32 %v513_v14, %v362_v2  ;;  %v585_v21 = vmul.f32 %v508_v15, %v361_v3 }
  0xb1   : > { %v1010_v25 = vpack.c.bf16 %v586_v20, %v585_v21 }
  0xb2   : > { %v523_v28 = vpop.permute.xlu1 %522  ;;  %v518_v29 = vpop.permute.xlu0 %517 }
  0xb3   : > { %1062 = vst [vmem:[%s1140_s28 + $0x58] sm:$0xff] %v1010_v25   ;;  %v588_v34 = vmul.f32 %v523_v28, %v364_v22  ;;  %v587_v35 = vmul.f32 %v518_v29, %v363_v23 }
  0xb5   : > { %v1015_v38 = vpack.c.bf16 %v588_v34, %v587_v35 }
  0xb6   : > { %v533_v39 = vpop.permute.xlu1 %532  ;;  %v528_v41 = vpop.permute.xlu0 %527 }
  0xb7   : > { %1063 = vst [vmem:[%s1140_s28 + $0x60] sm:$0xff] %v1015_v38   ;;  %v590_v46 = vmul.f32 %v533_v39, %v366_v26  ;;  %v589_v47 = vmul.f32 %v528_v41, %v365_v27 }
  0xb9   : > { %v1020_v51 = vpack.c.bf16 %v590_v46, %v589_v47 }
  0xba   : > { %v543_v52 = vpop.permute.xlu1 %542  ;;  %v538_v53 = vpop.permute.xlu0 %537 }
  0xbb   : > { %1064 = vst [vmem:[%s1140_s28 + $0x68] sm:$0xff] %v1020_v51   ;;  %v592_v56 = vmul.f32 %v543_v52, %v368_v42  ;;  %v591_v57 = vmul.f32 %v538_v53, %v367_v43 }
  0xbd   : > { %v1025_v60 = vpack.c.bf16 %v592_v56, %v591_v57 }
  0xbe   : > { %v553_v61 = vpop.permute.xlu1 %552  ;;  %v548_v62 = vpop.permute.xlu0 %547 }
  0xbf   : > { %1065 = vst [vmem:[%s1140_s28 + $0x70] sm:$0xff] %v1025_v60   ;;  %v594_v63 = vmul.f32 %v553_v61, %v370_v54  ;;  %v593_v40 = vmul.f32 %v548_v62, %v369_v55 }
  0xc1   : > { %v1030_v2 = vpack.c.bf16 %v594_v63, %v593_v40 }
  0xc2   : > { %v563_v3 = vpop.permute.xlu1 %562  ;;  %v558_v4 = vpop.permute.xlu0 %557 }
  0xc3   : > { %1066 = vst [vmem:[%s1140_s28 + $0x78] sm:$0xff] %v1030_v2   ;;  %v596_v5 = vmul.f32 %v563_v3, %v372_v0  ;;  %v595_v6 = vmul.f32 %v558_v4, %v371_v1 }
  0xc5   : > { %v1035_v7 = vpack.c.bf16 %v596_v5, %v595_v6 }
  0xc7   : > { %1067 = vst [vmem:[%s1140_s28 + $0x80] sm:$0xff] %v1035_v7  }
  0xc8 PF: > { %s14_s15 = sadd.s32 1, %s1086_s15  }
  0xc9   : > { %p11_p4 = scmp.ge.s32.totalorder %s14_s15, 4  }
  0xcb   :  { %13 = sbr.rel (!%p11_p4) target bundleno = 1 (0x1), region = 66 }

// kernel: residual_block_forward.7
= control target key start
LH: loop header
LB: loop body
LE: loop exit
PB: predicated region body
PF: predicated region fallthrough
CT: control target
= control target key end

     0   :  { %s2732_s2 = inlined_call_operand.vmem [shape: bf16[128,128], index: 2, kind: input, shape index: {}]   ;;  %s2733_s1 = inlined_call_operand.vmem [shape: bf16[512,128], index: 1, kind: input, shape index: {}]   ;;  %s2734_s0 = inlined_call_operand.vmem [shape: bf16[512,128], index: 0, kind: input, shape index: {}]   ;;  %s2735_s3 = inlined_call_operand.vmem [shape: f32[1,128], index: 3, kind: input, shape index: {}]   ;;  %s2736_s4 = inlined_call_operand.vmem [shape: f32[1,128], index: 4, kind: input, shape index: {}]   ;;  %s2737_s5 = inlined_call_operand.vmem [shape: bf16[512,128], index: 5, kind: output, shape index: {}]  }
   0x1   :  { %v2008_v0 = vld [vmem:[%s2732_s2] sm:$0xff]   ;;  %v2009_v1 = vld [vmem:[%s2732_s2 + $0x8] sm:$0xff]   ;;  %v2010_v2 = vld [vmem:[%s2732_s2 + $0x10] sm:$0xff]  }
   0x2   :  { %1912 = vmatprep.subr.bf16.mxu0 %v2008_v0  ;;  %1992 = vmatprep.subr.bf16.mxu1 %v2008_v0  ;;  %v2011_v3 = vld [vmem:[%s2732_s2 + $0x18] sm:$0xff]   ;;  %v2016_v4 = vld [vmem:[%s2733_s1] sm:$0xff]   ;;  %v2013_v7 = vld [vmem:[%s2732_s2 + $0x28] sm:$0xff]  }
   0x3   :  { %1913 = vmatpush3.bf16.msra.mxu0 %v2008_v0  ;;  %2000 = vmatpush3.bf16.msra.mxu1 %v2008_v0  ;;  %v2017_v5 = vld [vmem:[%s2733_s1 + $0x80] sm:$0xff]   ;;  %v2014_v8 = vld [vmem:[%s2732_s2 + $0x30] sm:$0xff]   ;;  %v2015_v9 = vld [vmem:[%s2732_s2 + $0x38] sm:$0xff]  }
   0x4   :  { %1914 = vmatprep.subr.bf16.mxu0 %v2009_v1  ;;  %1993 = vmatprep.subr.bf16.mxu1 %v2009_v1  ;;  %v2012_v6 = vld [vmem:[%s2732_s2 + $0x20] sm:$0xff]   ;;  %v2018_v10 = vld [vmem:[%s2733_s1 + $0x8] sm:$0xff]   ;;  %v2020_v12 = vld [vmem:[%s2733_s1 + $0x10] sm:$0xff]  }
   0x5   :  { %1928 = vmatprep.mubr.bf16.mxu0 %v2016_v4  ;;  %1960 = vmatprep.mubr.bf16.mxu1 %v2017_v5  ;;  %v2019_v11 = vld [vmem:[%s2733_s1 + $0x88] sm:$0xff]   ;;  %v2021_v13 = vld [vmem:[%s2733_s1 + $0x90] sm:$0xff]   ;;  %v2022_v14 = vld [vmem:[%s2733_s1 + $0x18] sm:$0xff]  }
   0x6   :  { %v2023_v15 = vld [vmem:[%s2733_s1 + $0x98] sm:$0xff]   ;;  %v2024_v16 = vld [vmem:[%s2733_s1 + $0x20] sm:$0xff]   ;;  %v2026_v18 = vld [vmem:[%s2733_s1 + $0x28] sm:$0xff]  }
   0x7   :  { %1915 = vmatpush3.bf16.msra.mxu0 %v2009_v1  ;;  %2001 = vmatpush3.bf16.msra.mxu1 %v2009_v1  ;;  %v2025_v17 = vld [vmem:[%s2733_s1 + $0xa0] sm:$0xff]   ;;  %v2027_v19 = vld [vmem:[%s2733_s1 + $0xa8] sm:$0xff]   ;;  %v2028_v20 = vld [vmem:[%s2733_s1 + $0x30] sm:$0xff]  }
   0x8   :  { %1916 = vmatprep.subr.bf16.mxu0 %v2010_v2  ;;  %1994 = vmatprep.subr.bf16.mxu1 %v2010_v2  ;;  %v2029_v21 = vld [vmem:[%s2733_s1 + $0xb0] sm:$0xff]   ;;  %v2030_v22 = vld [vmem:[%s2733_s1 + $0x38] sm:$0xff]   ;;  %v2032_v24 = vld [vmem:[%s2733_s1 + $0x40] sm:$0xff]  }
   0x9   :  { %v2031_v23 = vld [vmem:[%s2733_s1 + $0xb8] sm:$0xff]   ;;  %v2033_v25 = vld [vmem:[%s2733_s1 + $0xc0] sm:$0xff]   ;;  %v2034_v26 = vld [vmem:[%s2733_s1 + $0x48] sm:$0xff]  }
   0xa   :  { %v2035_v27 = vld [vmem:[%s2733_s1 + $0xc8] sm:$0xff]   ;;  %v2036_v28 = vld [vmem:[%s2733_s1 + $0x50] sm:$0xff]   ;;  %v2038_v30 = vld [vmem:[%s2733_s1 + $0x58] sm:$0xff]  }
   0xb   :  { %1917 = vmatpush3.bf16.msra.mxu0 %v2010_v2  ;;  %2002 = vmatpush3.bf16.msra.mxu1 %v2010_v2  ;;  %v2037_v29 = vld [vmem:[%s2733_s1 + $0xd0] sm:$0xff]   ;;  %v2039_v31 = vld [vmem:[%s2733_s1 + $0xd8] sm:$0xff]   ;;  %v2040_v32 = vld [vmem:[%s2733_s1 + $0x60] sm:$0xff]  }
   0xc   :  { %1918 = vmatprep.subr.bf16.mxu0 %v2011_v3  ;;  %1995 = vmatprep.subr.bf16.mxu1 %v2011_v3  ;;  %v2041_v33 = vld [vmem:[%s2733_s1 + $0xe0] sm:$0xff]   ;;  %v2042_v34 = vld [vmem:[%s2733_s1 + $0x68] sm:$0xff]   ;;  %v2044_v36 = vld [vmem:[%s2733_s1 + $0x70] sm:$0xff]  }
   0xd   :  { %v2043_v35 = vld [vmem:[%s2733_s1 + $0xe8] sm:$0xff]   ;;  %v2045_v37 = vld [vmem:[%s2733_s1 + $0xf0] sm:$0xff]   ;;  %v2046_v38 = vld [vmem:[%s2733_s1 + $0x78] sm:$0xff]  }
   0xe   :  { %v2047_v39 = vld [vmem:[%s2733_s1 + $0xf8] sm:$0xff]   ;;  %v1810_v40 = vld [vmem:[%s2734_s0 + $0x8] sm:$0xff]   ;;  %v1523_v42 = vld [vmem:[%s2734_s0] sm:$0xff]  }
   0xf   :  { %1919 = vmatpush3.bf16.msra.mxu0 %v2011_v3  ;;  %2003 = vmatpush3.bf16.msra.mxu1 %v2011_v3  ;;  %v1826_v41 = vld [vmem:[%s2734_s0 + $0x88] sm:$0xff]   ;;  %v1825_v43 = vld [vmem:[%s2734_s0 + $0x80] sm:$0xff]   ;;  %v1528_v44 = vunpack.c.l.bf16 %v1810_v40  ;;  %v1524_v47 = vunpack.c.l.bf16 %v1523_v42  ;;  %v1529_v52 = vunpack.c.h.bf16 %v1810_v40  ;;  %v1812_v54 = vld [vmem:[%s2734_s0 + $0x18] sm:$0xff]   ;;  %v1525_v60 = vunpack.c.h.bf16 %v1523_v42 }
  0x10   :  { %1920 = vmatprep.subr.bf16.mxu0 %v2012_v6  ;;  %1996 = vmatprep.subr.bf16.mxu1 %v2012_v6  ;;  %v1592_v45 = vunpack.c.l.bf16 %v1826_v41  ;;  %v2213_v46 = vld [vmem:[%s2735_s3] ss:$0 sm:$0xff]  ;;  %v1588_v48 = vunpack.c.l.bf16 %v1825_v43  ;;  %v1593_v53 = vunpack.c.h.bf16 %v1826_v41  ;;  %v1828_v55 = vld [vmem:[%s2734_s0 + $0x98] sm:$0xff]   ;;  %v1811_v58 = vld [vmem:[%s2734_s0 + $0x10] sm:$0xff]   ;;  %v1589_v61 = vunpack.c.h.bf16 %v1825_v43 }
  0x11   :  { %v767_v49 = vmul.f32 %v1528_v44, %v2213_v46  ;;  %v2220_v51 = vld [vmem:[%s2736_s4] ss:$0 sm:$0xff]  ;;  %v765_v56 = vmul.f32 %v1524_v47, %v2213_v46  ;;  %v1827_v59 = vld [vmem:[%s2734_s0 + $0x90] sm:$0xff]   ;;  %v1536_v0 = vunpack.c.l.bf16 %v1812_v54  ;;  %v1600_v1 = vunpack.c.l.bf16 %v1828_v55  ;;  %v1816_v42 = vld [vmem:[%s2734_s0 + $0x38] sm:$0xff]  }
  0x12   :  { %v799_v50 = vmul.f32 %v1592_v45, %v2213_v46  ;;  %v797_v57 = vmul.f32 %v1588_v48, %v2213_v46  ;;  %v768_v2 = vmul.f32 %v1529_v52, %v2213_v46  ;;  %v800_v3 = vmul.f32 %v1593_v53, %v2213_v46  ;;  %v1832_v43 = vld [vmem:[%s2734_s0 + $0xb8] sm:$0xff]  }
  0x13   :  { %1921 = vmatpush3.bf16.msra.mxu0 %v2012_v6  ;;  %2004 = vmatpush3.bf16.msra.mxu1 %v2012_v6  ;;  %v2237_v62 = vadd.f32 %v2220_v51, %v767_v49  ;;  %v1532_v4 = vunpack.c.l.bf16 %v1811_v58  ;;  %v1596_v5 = vunpack.c.l.bf16 %v1827_v59  ;;  %v1814_v6 = vld [vmem:[%s2734_s0 + $0x28] sm:$0xff]   ;;  %v1815_v49 = vld [vmem:[%s2734_s0 + $0x30] sm:$0xff]  }
  0x14   :  { %1922 = vmatprep.subr.bf16.mxu0 %v2013_v7  ;;  %1997 = vmatprep.subr.bf16.mxu1 %v2013_v7  ;;  %v2240_v63 = vadd.f32 %v2220_v51, %v799_v50  ;;  %v1545_v40 = vunpack.c.h.bf16 %v1814_v6  ;;  %v1831_v50 = vld [vmem:[%s2734_s0 + $0xb0] sm:$0xff]  }
  0x17   :  { %1923 = vmatpush3.bf16.msra.mxu0 %v2013_v7  ;;  %2005 = vmatpush3.bf16.msra.mxu1 %v2013_v7  ;;  %v1830_v7 = vld [vmem:[%s2734_s0 + $0xa8] sm:$0xff]  }
  0x18   :  { %1924 = vmatprep.subr.bf16.mxu0 %v2014_v8  ;;  %1998 = vmatprep.subr.bf16.mxu1 %v2014_v8  ;;  %v1609_v41 = vunpack.c.h.bf16 %v1830_v7 }
  0x1b   :  { %1925 = vmatpush3.bf16.msra.mxu0 %v2014_v8  ;;  %2006 = vmatpush3.bf16.msra.mxu1 %v2014_v8  ;;  %v2251_v8 = vadd.f32 %v2220_v51, %v765_v56 }
  0x1c   :  { %1926 = vmatprep.subr.bf16.mxu0 %v2015_v9  ;;  %1999 = vmatprep.subr.bf16.mxu1 %v2015_v9 }
  0x1f   :  { %1927 = vmatpush3.bf16.msra.mxu0 %v2015_v9  ;;  %2007 = vmatpush3.bf16.msra.mxu1 %v2015_v9  ;;  %v2254_v9 = vadd.f32 %v2220_v51, %v797_v57 }
  0x22   :  { %1929 = vmatmul.mubr.bf16.vlgmr.msra.gmra.mrb[0].mxu0 %v2018_v10  ;;  %1961 = vmatmul.mubr.bf16.vlgmr.msra.gmra.mrb[0].mxu1 %v2019_v11  ;;  %v1537_v10 = vunpack.c.h.bf16 %v1812_v54  ;;  %v1601_v11 = vunpack.c.h.bf16 %v1828_v55 }
  0x23   :  { %1932 = vmatprep.mubr.bf16.mxu0 %v2020_v12  ;;  %1964 = vmatprep.mubr.bf16.mxu1 %v2021_v13  ;;  %v766_v12 = vmul.f32 %v1525_v60, %v2213_v46  ;;  %v798_v13 = vmul.f32 %v1589_v61, %v2213_v46  ;;  %v776_v60 = vmul.f32 %v1545_v40, %v2213_v46 }
  0x24   :  { %v808_v61 = vmul.f32 %v1609_v41, %v2213_v46 }
  0x2a   :  { %1933 = vmatmul.mubr.bf16.gmra.mrb[4].mxu0 %v2022_v14  ;;  %1965 = vmatmul.mubr.bf16.gmra.mrb[4].mxu1 %v2023_v15  ;;  %v1533_v14 = vunpack.c.h.bf16 %v1811_v58  ;;  %v1597_v15 = vunpack.c.h.bf16 %v1827_v59  ;;  %v1552_v58 = vunpack.c.l.bf16 %v1816_v42  ;;  %v1616_v59 = vunpack.c.l.bf16 %v1832_v43 }
  0x2b   :  { %1936 = vmatprep.mubr.bf16.mxu0 %v2024_v16  ;;  %1968 = vmatprep.mubr.bf16.mxu1 %v2025_v17  ;;  %v1813_v16 = vld [vmem:[%s2734_s0 + $0x20] sm:$0xff]  }
  0x2c   :  { %v1829_v17 = vld [vmem:[%s2734_s0 + $0xa0] sm:$0xff]   ;;  %v1541_v54 = vunpack.c.h.bf16 %v1813_v16 }
  0x2d   :  { %v1605_v55 = vunpack.c.h.bf16 %v1829_v17 }
  0x32   :  { %1937 = vmatmul.mubr.bf16.gmra.mrb[8].mxu0 %v2026_v18  ;;  %1969 = vmatmul.mubr.bf16.gmra.mrb[8].mxu1 %v2027_v19  ;;  %v771_v18 = vmul.f32 %v1536_v0, %v2213_v46  ;;  %v803_v19 = vmul.f32 %v1600_v1, %v2213_v46  ;;  %v1548_v0 = vunpack.c.l.bf16 %v1815_v49  ;;  %v1612_v1 = vunpack.c.l.bf16 %v1831_v50 }
  0x33   :  { %1940 = vmatprep.mubr.bf16.mxu0 %v2028_v20  ;;  %1972 = vmatprep.mubr.bf16.mxu1 %v2029_v21  ;;  %v1544_v20 = vunpack.c.l.bf16 %v1814_v6  ;;  %v1608_v21 = vunpack.c.l.bf16 %v1830_v7  ;;  %v1553_v6 = vunpack.c.h.bf16 %v1816_v42  ;;  %v1617_v7 = vunpack.c.h.bf16 %v1832_v43 }
  0x3a   :  { %1941 = vmatmul.mubr.bf16.gmra.mrb[12].mxu0 %v2030_v22  ;;  %1973 = vmatmul.mubr.bf16.gmra.mrb[12].mxu1 %v2031_v23  ;;  %v2267_v22 = vadd.f32 %v2220_v51, %v768_v2  ;;  %v2270_v23 = vadd.f32 %v2220_v51, %v800_v3  ;;  %v1818_v2 = vld [vmem:[%s2734_s0 + $0x48] sm:$0xff]  }
  0x3b   :  { %1944 = vmatprep.mubr.bf16.mxu0 %v2032_v24  ;;  %1976 = vmatprep.mubr.bf16.mxu1 %v2033_v25  ;;  %v769_v24 = vmul.f32 %v1532_v4, %v2213_v46  ;;  %v801_v25 = vmul.f32 %v1596_v5, %v2213_v46  ;;  %v1834_v3 = vld [vmem:[%s2734_s0 + $0xc8] sm:$0xff]  }
  0x42   :  { %1945 = vmatmul.mubr.bf16.gmra.mrb[16].mxu0 %v2034_v26  ;;  %1977 = vmatmul.mubr.bf16.gmra.mrb[16].mxu1 %v2035_v27  ;;  %v772_v26 = vmul.f32 %v1537_v10, %v2213_v46  ;;  %v804_v27 = vmul.f32 %v1601_v11, %v2213_v46  ;;  %v774_v10 = vmul.f32 %v1541_v54, %v2213_v46 }
  0x43   :  { %1948 = vmatprep.mubr.bf16.mxu0 %v2036_v28  ;;  %1980 = vmatprep.mubr.bf16.mxu1 %v2037_v29  ;;  %v1540_v28 = vunpack.c.l.bf16 %v1813_v16  ;;  %v1604_v29 = vunpack.c.l.bf16 %v1829_v17  ;;  %v806_v11 = vmul.f32 %v1605_v55, %v2213_v46  ;;  %v779_v16 = vmul.f32 %v1552_v58, %v2213_v46 }
  0x44   :  { %v2305_v44 = vadd.f32 %v2220_v51, %v772_v26  ;;  %v2308_v45 = vadd.f32 %v2220_v51, %v804_v27  ;;  %v811_v17 = vmul.f32 %v1616_v59, %v2213_v46  ;;  %v780_v26 = vmul.f32 %v1553_v6, %v2213_v46 }
  0x45   :  { %v773_v47 = vmul.f32 %v1540_v28, %v2213_v46  ;;  %v805_v48 = vmul.f32 %v1604_v29, %v2213_v46  ;;  %v812_v27 = vmul.f32 %v1617_v7, %v2213_v46  ;;  %v2373_v40 = vadd.f32 %v2220_v51, %v779_v16 }
  0x46   :  { %v2376_v41 = vadd.f32 %v2220_v51, %v811_v17  ;;  %v2387_v54 = vadd.f32 %v2220_v51, %v780_v26 }
  0x47   :  { %v2339_v4 = vadd.f32 %v2220_v51, %v773_v47  ;;  %v2342_v5 = vadd.f32 %v2220_v51, %v805_v48  ;;  %v2390_v55 = vadd.f32 %v2220_v51, %v812_v27 }
  0x4a   :  { %1949 = vmatmul.mubr.bf16.gmra.mrb[20].mxu0 %v2038_v30  ;;  %1981 = vmatmul.mubr.bf16.gmra.mrb[20].mxu1 %v2039_v31  ;;  %v2277_v30 = vadd.f32 %v2220_v51, %v766_v12  ;;  %v2280_v31 = vadd.f32 %v2220_v51, %v798_v13  ;;  %v1549_v12 = vunpack.c.h.bf16 %v1815_v49  ;;  %v1613_v13 = vunpack.c.h.bf16 %v1831_v50 }
  0x4b   :  { %1952 = vmatprep.mubr.bf16.mxu0 %v2040_v32  ;;  %1984 = vmatprep.mubr.bf16.mxu1 %v2041_v33  ;;  %v770_v32 = vmul.f32 %v1533_v14, %v2213_v46  ;;  %v802_v33 = vmul.f32 %v1597_v15, %v2213_v46  ;;  %v1817_v14 = vld [vmem:[%s2734_s0 + $0x40] sm:$0xff]   ;;  %v1561_v49 = vunpack.c.h.bf16 %v1818_v2  ;;  %v1625_v50 = vunpack.c.h.bf16 %v1834_v3 }
  0x4c   :  { %v1833_v15 = vld [vmem:[%s2734_s0 + $0xc0] sm:$0xff]   ;;  %v1556_v28 = vunpack.c.l.bf16 %v1817_v14 }
  0x4d   :  { %v2319_v52 = vadd.f32 %v2220_v51, %v770_v32  ;;  %v2322_v53 = vadd.f32 %v2220_v51, %v802_v33  ;;  %v1620_v29 = vunpack.c.l.bf16 %v1833_v15  ;;  %v2365_v32 = vadd.f32 %v2220_v51, %v774_v10 }
  0x4e   :  { %v2368_v33 = vadd.f32 %v2220_v51, %v806_v11  ;;  %v781_v58 = vmul.f32 %v1556_v28, %v2213_v46 }
  0x4f   :  { %v813_v59 = vmul.f32 %v1620_v29, %v2213_v46 }
  0x50   :  { %v2415_v26 = vadd.f32 %v2220_v51, %v781_v58 }
  0x51   :  { %v2418_v27 = vadd.f32 %v2220_v51, %v813_v59 }
  0x52   :  { %1953 = vmatmul.mubr.bf16.gmra.mrb[24].mxu0 %v2042_v34  ;;  %1985 = vmatmul.mubr.bf16.gmra.mrb[24].mxu1 %v2043_v35  ;;  %v2285_v34 = vadd.f32 %v2220_v51, %v771_v18  ;;  %v2288_v35 = vadd.f32 %v2220_v51, %v803_v19  ;;  %v1560_v18 = vunpack.c.l.bf16 %v1818_v2  ;;  %v1624_v19 = vunpack.c.l.bf16 %v1834_v3 }
  0x53   :  { %1956 = vmatprep.mubr.bf16.mxu0 %v2044_v36  ;;  %1988 = vmatprep.mubr.bf16.mxu1 %v2045_v37  ;;  %v775_v36 = vmul.f32 %v1544_v20, %v2213_v46  ;;  %v807_v37 = vmul.f32 %v1608_v21, %v2213_v46  ;;  %v2355_v20 = vadd.f32 %v2220_v51, %v776_v60  ;;  %v1557_v2 = vunpack.c.h.bf16 %v1817_v14 }
  0x54   :  { %v2358_v21 = vadd.f32 %v2220_v51, %v808_v61  ;;  %v783_v42 = vmul.f32 %v1560_v18, %v2213_v46  ;;  %v815_v43 = vmul.f32 %v1624_v19, %v2213_v46  ;;  %v1621_v3 = vunpack.c.h.bf16 %v1833_v15 }
  0x55   :  { %v2325_v56 = vadd.f32 %v2220_v51, %v775_v36  ;;  %v2328_v57 = vadd.f32 %v2220_v51, %v807_v37  ;;  %v778_v36 = vmul.f32 %v1549_v12, %v2213_v46  ;;  %v810_v37 = vmul.f32 %v1613_v13, %v2213_v46 }
  0x56   :  { %v2403_v12 = vadd.f32 %v2220_v51, %v783_v42  ;;  %v2406_v13 = vadd.f32 %v2220_v51, %v815_v43  ;;  %v784_v14 = vmul.f32 %v1561_v49, %v2213_v46  ;;  %v782_v28 = vmul.f32 %v1557_v2, %v2213_v46  ;;  %v2439_v2 = vld [vmem:[%s2734_s0 + $0x50] sm:$0xff]  }
  0x57   :  { %v814_v29 = vmul.f32 %v1621_v3, %v2213_v46  ;;  %v2444_v3 = vld [vmem:[%s2734_s0 + $0xd0] sm:$0xff]  }
  0x5a   :  { %1957 = vmatmul.mubr.bf16.gmra.mrb[28].mxu0 %v2046_v38  ;;  %1989 = vmatmul.mubr.bf16.gmra.mrb[28].mxu1 %v2047_v39  ;;  %v2293_v38 = vadd.f32 %v2220_v51, %v769_v24  ;;  %v2296_v39 = vadd.f32 %v2220_v51, %v801_v25  ;;  %v777_v24 = vmul.f32 %v1548_v0, %v2213_v46 }
  0x5b   :  { %v809_v25 = vmul.f32 %v1612_v1, %v2213_v46  ;;  %v2395_v0 = vadd.f32 %v2220_v51, %v778_v36  ;;  %v2398_v1 = vadd.f32 %v2220_v51, %v810_v37 }
  0x5c   :  { %v2381_v47 = vadd.f32 %v2220_v51, %v777_v24 }
  0x5d   :  { %v2384_v48 = vadd.f32 %v2220_v51, %v809_v25 }
  0xf5   :  { %v1930_v60 = vpop.f32.mrb[0].mxu0  ;;  %v1962_v61 = vpop.f32.mrb[0].mxu1 }
  0xf6   :  { %v902_v6 = vadd.f32 %v1930_v60, %v2237_v62  ;;  %v934_v7 = vadd.f32 %v1962_v61, %v2240_v63  ;;  %v375_v10 = vpop.f32.mrb[1].mxu0  ;;  %v503_v11 = vpop.f32.mrb[1].mxu1  ;;  %v816_v62 = vmul.f32 %v1625_v50, %v2213_v46 }
  0xf7   :  { %v900_v16 = vadd.f32 %v2251_v8, %v375_v10  ;;  %v932_v17 = vadd.f32 %v2254_v9, %v503_v11  ;;  %v1931_v18 = vpop.f32.mrb[2].mxu0  ;;  %v1963_v19 = vpop.f32.mrb[2].mxu1 }
  0xf8   :  { %v903_v63 = vadd.f32 %v1931_v18, %v2267_v22  ;;  %v935_v15 = vadd.f32 %v1963_v19, %v2270_v23  ;;  %v378_v24 = vpop.f32.mrb[3].mxu0  ;;  %v506_v25 = vpop.f32.mrb[3].mxu1  ;;  %v2427_v22 = vld [vmem:[%s2734_s0 + $0x58] sm:$0xff]   ;;  %v966_v36 = vmax.f32 %v902_v6, 0.0  ;;  %v998_v37 = vmax.f32 %v934_v7, 0.0 }
  0xf9   :  { %v901_v8 = vadd.f32 %v2277_v30, %v378_v24  ;;  %v933_v9 = vadd.f32 %v2280_v31, %v506_v25  ;;  %v2432_v23 = vld [vmem:[%s2734_s0 + $0xd8] sm:$0xff]   ;;  %v964_v43 = vmax.f32 %v900_v16, 0.0  ;;  %v996_v31 = vmax.f32 %v932_v17, 0.0 }
  0xfa   :  { %v967_v42 = vmax.f32 %v903_v63, 0.0  ;;  %v999_v30 = vmax.f32 %v935_v15, 0.0  ;;  %v1568_v60 = vunpack.c.l.bf16 %v2427_v22  ;;  %v1632_v61 = vunpack.c.l.bf16 %v2432_v23 }
  0xfb   :  { %v965_v49 = vmax.f32 %v901_v8, 0.0  ;;  %v997_v50 = vmax.f32 %v933_v9, 0.0  ;;  %v2447_v16 = vadd.f32 %v2220_v51, %v784_v14  ;;  %v2450_v17 = vadd.f32 %v2220_v51, %v816_v62 }
  0xfc   :  { %v1658_v58 = vpack.c.bf16 %v967_v42, %v966_v36  ;;  %v1738_v59 = vpack.c.bf16 %v999_v30, %v998_v37  ;;  %v2461_v14 = vadd.f32 %v2220_v51, %v782_v28  ;;  %v2464_v62 = vadd.f32 %v2220_v51, %v814_v29 }
  0xfd   :  { %v1653_v6 = vpack.c.bf16 %v965_v49, %v964_v43  ;;  %v1733_v7 = vpack.c.bf16 %v997_v50, %v996_v31  ;;  %v1934_v10 = vpop.f32.mrb[4].mxu0  ;;  %v1966_v11 = vpop.f32.mrb[4].mxu1  ;;  %v1564_v8 = vunpack.c.l.bf16 %v2439_v2  ;;  %v1628_v9 = vunpack.c.l.bf16 %v2444_v3 }
  0xfe   :  { %1841 = vst [vmem:[%s2737_s5 + $0x8] sm:$0xff] %v1658_v58   ;;  %1857 = vst [vmem:[%s2737_s5 + $0x88] sm:$0xff] %v1738_v59   ;;  %v906_v18 = vadd.f32 %v1934_v10, %v2285_v34  ;;  %v938_v19 = vadd.f32 %v1966_v11, %v2288_v35  ;;  %v391_v63 = vpop.f32.mrb[5].mxu0  ;;  %v519_v15 = vpop.f32.mrb[5].mxu1  ;;  %v787_v42 = vmul.f32 %v1568_v60, %v2213_v46  ;;  %v1569_v43 = vunpack.c.h.bf16 %v2427_v22 }
  0xff   :  { %1654 = vst [vmem:[%s2737_s5] sm:$0xff] %v1653_v6   ;;  %1856 = vst [vmem:[%s2737_s5 + $0x80] sm:$0xff] %v1733_v7   ;;  %v904_v34 = vadd.f32 %v2293_v38, %v391_v63  ;;  %v936_v35 = vadd.f32 %v2296_v39, %v519_v15  ;;  %v1935_v24 = vpop.f32.mrb[6].mxu0  ;;  %v1967_v25 = vpop.f32.mrb[6].mxu1  ;;  %v819_v30 = vmul.f32 %v1632_v61, %v2213_v46  ;;  %v1633_v31 = vunpack.c.h.bf16 %v2432_v23 }
 0x100   :  { %v907_v28 = vadd.f32 %v1935_v24, %v2305_v44  ;;  %v939_v29 = vadd.f32 %v1967_v25, %v2308_v45  ;;  %v394_v36 = vpop.f32.mrb[7].mxu0  ;;  %v522_v37 = vpop.f32.mrb[7].mxu1  ;;  %v970_v49 = vmax.f32 %v906_v18, 0.0  ;;  %v1002_v50 = vmax.f32 %v938_v19, 0.0 }
 0x101   :  { %v905_v38 = vadd.f32 %v2319_v52, %v394_v36  ;;  %v937_v39 = vadd.f32 %v2322_v53, %v522_v37  ;;  %v968_v59 = vmax.f32 %v904_v34, 0.0  ;;  %v1000_v45 = vmax.f32 %v936_v35, 0.0 }
 0x102   :  { %v971_v58 = vmax.f32 %v907_v28, 0.0  ;;  %v1003_v44 = vmax.f32 %v939_v29, 0.0  ;;  %v785_v61 = vmul.f32 %v1564_v8, %v2213_v46  ;;  %v817_v52 = vmul.f32 %v1628_v9, %v2213_v46 }
 0x103   :  { %v969_v6 = vmax.f32 %v905_v38, 0.0  ;;  %v1001_v7 = vmax.f32 %v937_v39, 0.0  ;;  %v1565_v23 = vunpack.c.h.bf16 %v2439_v2  ;;  %v1629_v18 = vunpack.c.h.bf16 %v2444_v3 }
 0x104   :  { %v1668_v10 = vpack.c.bf16 %v971_v58, %v970_v49  ;;  %v1748_v60 = vpack.c.bf16 %v1003_v44, %v1002_v50  ;;  %v2497_v24 = vadd.f32 %v2220_v51, %v787_v42  ;;  %v2500_v2 = vadd.f32 %v2220_v51, %v819_v30 }
 0x105   :  { %v1663_v11 = vpack.c.bf16 %v969_v6, %v968_v59  ;;  %v1743_v53 = vpack.c.bf16 %v1001_v7, %v1000_v45  ;;  %v1938_v63 = vpop.f32.mrb[8].mxu0  ;;  %v1970_v22 = vpop.f32.mrb[8].mxu1  ;;  %v788_v8 = vmul.f32 %v1569_v43, %v2213_v46  ;;  %v820_v9 = vmul.f32 %v1633_v31, %v2213_v46 }
 0x106   :  { %1843 = vst [vmem:[%s2737_s5 + $0x18] sm:$0xff] %v1668_v10   ;;  %1859 = vst [vmem:[%s2737_s5 + $0x98] sm:$0xff] %v1748_v60   ;;  %v910_v19 = vadd.f32 %v1938_v63, %v2325_v56  ;;  %v942_v15 = vadd.f32 %v1970_v22, %v2328_v57  ;;  %v407_v34 = vpop.f32.mrb[9].mxu0  ;;  %v535_v35 = vpop.f32.mrb[9].mxu1  ;;  %v2515_v42 = vadd.f32 %v2220_v51, %v785_v61  ;;  %v2539_v10 = vld [vmem:[%s2734_s0 + $0x60] sm:$0xff]  }
 0x107   :  { %1842 = vst [vmem:[%s2737_s5 + $0x10] sm:$0xff] %v1663_v11   ;;  %1858 = vst [vmem:[%s2737_s5 + $0x90] sm:$0xff] %v1743_v53   ;;  %v908_v56 = vadd.f32 %v2339_v4, %v407_v34  ;;  %v940_v57 = vadd.f32 %v2342_v5, %v535_v35  ;;  %v1939_v3 = vpop.f32.mrb[10].mxu0  ;;  %v1971_v25 = vpop.f32.mrb[10].mxu1  ;;  %v2518_v30 = vadd.f32 %v2220_v51, %v817_v52  ;;  %v2544_v60 = vld [vmem:[%s2734_s0 + $0xe0] sm:$0xff]  }
 0x108   :  { %v911_v28 = vadd.f32 %v1939_v3, %v2355_v20  ;;  %v943_v29 = vadd.f32 %v1971_v25, %v2358_v21  ;;  %v410_v36 = vpop.f32.mrb[11].mxu0  ;;  %v538_v37 = vpop.f32.mrb[11].mxu1  ;;  %v786_v38 = vmul.f32 %v1565_v23, %v2213_v46  ;;  %v818_v39 = vmul.f32 %v1629_v18, %v2213_v46  ;;  %v2527_v20 = vld [vmem:[%s2734_s0 + $0x68] sm:$0xff]  }
 0x109   :  { %v909_v4 = vadd.f32 %v2365_v32, %v410_v36  ;;  %v941_v5 = vadd.f32 %v2368_v33, %v538_v37  ;;  %v2532_v21 = vld [vmem:[%s2734_s0 + $0xe8] sm:$0xff]   ;;  %v974_v43 = vmax.f32 %v910_v19, 0.0  ;;  %v1006_v31 = vmax.f32 %v942_v15, 0.0 }
 0x10a   :  { %v975_v49 = vmax.f32 %v911_v28, 0.0  ;;  %v1007_v32 = vmax.f32 %v943_v29, 0.0  ;;  %v972_v50 = vmax.f32 %v908_v56, 0.0  ;;  %v1004_v33 = vmax.f32 %v940_v57, 0.0 }
 0x10b   :  { %v973_v58 = vmax.f32 %v909_v4, 0.0  ;;  %v1005_v44 = vmax.f32 %v941_v5, 0.0  ;;  %v1576_v6 = vunpack.c.l.bf16 %v2527_v20  ;;  %v1640_v7 = vunpack.c.l.bf16 %v2532_v21 }
 0x10c   :  { %v1678_v59 = vpack.c.bf16 %v975_v49, %v974_v43  ;;  %v1758_v45 = vpack.c.bf16 %v1007_v32, %v1006_v31  ;;  %v2547_v63 = vadd.f32 %v2220_v51, %v788_v8  ;;  %v2550_v22 = vadd.f32 %v2220_v51, %v820_v9 }
 0x10d   :  { %v1673_v61 = vpack.c.bf16 %v973_v58, %v972_v50  ;;  %v1753_v52 = vpack.c.bf16 %v1005_v44, %v1004_v33  ;;  %v1942_v11 = vpop.f32.mrb[12].mxu0  ;;  %v1974_v53 = vpop.f32.mrb[12].mxu1  ;;  %v2561_v34 = vadd.f32 %v2220_v51, %v786_v38  ;;  %v2564_v35 = vadd.f32 %v2220_v51, %v818_v39 }
 0x10e   :  { %1845 = vst [vmem:[%s2737_s5 + $0x28] sm:$0xff] %v1678_v59   ;;  %1861 = vst [vmem:[%s2737_s5 + $0xa8] sm:$0xff] %v1758_v45   ;;  %v914_v23 = vadd.f32 %v1942_v11, %v2373_v40  ;;  %v946_v18 = vadd.f32 %v1974_v53, %v2376_v41  ;;  %v423_v19 = vpop.f32.mrb[13].mxu0  ;;  %v551_v15 = vpop.f32.mrb[13].mxu1  ;;  %v1572_v3 = vunpack.c.l.bf16 %v2539_v10  ;;  %v1636_v25 = vunpack.c.l.bf16 %v2544_v60 }
 0x10f   :  { %1844 = vst [vmem:[%s2737_s5 + $0x20] sm:$0xff] %v1673_v61   ;;  %1860 = vst [vmem:[%s2737_s5 + $0xa0] sm:$0xff] %v1753_v52   ;;  %v912_v40 = vadd.f32 %v2381_v47, %v423_v19  ;;  %v944_v41 = vadd.f32 %v2384_v48, %v551_v15  ;;  %v1943_v56 = vpop.f32.mrb[14].mxu0  ;;  %v1975_v57 = vpop.f32.mrb[14].mxu1  ;;  %v791_v36 = vmul.f32 %v1576_v6, %v2213_v46  ;;  %v1577_v4 = vunpack.c.h.bf16 %v2527_v20 }
 0x110   :  { %v915_v8 = vadd.f32 %v1943_v56, %v2387_v54  ;;  %v947_v9 = vadd.f32 %v1975_v57, %v2390_v55  ;;  %v426_v28 = vpop.f32.mrb[15].mxu0  ;;  %v554_v29 = vpop.f32.mrb[15].mxu1  ;;  %v823_v37 = vmul.f32 %v1640_v7, %v2213_v46  ;;  %v1641_v5 = vunpack.c.h.bf16 %v2532_v21 }
 0x111   :  { %v913_v47 = vadd.f32 %v2395_v0, %v426_v28  ;;  %v945_v48 = vadd.f32 %v2398_v1, %v554_v29  ;;  %v978_v38 = vmax.f32 %v914_v23, 0.0  ;;  %v1010_v39 = vmax.f32 %v946_v18, 0.0 }
 0x112   :  { %v979_v43 = vmax.f32 %v915_v8, 0.0  ;;  %v1011_v54 = vmax.f32 %v947_v9, 0.0  ;;  %v976_v31 = vmax.f32 %v912_v40, 0.0  ;;  %v1008_v55 = vmax.f32 %v944_v41, 0.0 }
 0x113   :  { %v977_v49 = vmax.f32 %v913_v47, 0.0  ;;  %v1009_v32 = vmax.f32 %v945_v48, 0.0  ;;  %v789_v58 = vmul.f32 %v1572_v3, %v2213_v46  ;;  %v821_v0 = vmul.f32 %v1636_v25, %v2213_v46 }
 0x114   :  { %v1688_v50 = vpack.c.bf16 %v979_v43, %v978_v38  ;;  %v1768_v33 = vpack.c.bf16 %v1011_v54, %v1010_v39  ;;  %v1573_v21 = vunpack.c.h.bf16 %v2539_v10  ;;  %v1637_v45 = vunpack.c.h.bf16 %v2544_v60  ;;  %v2639_v38 = vld [vmem:[%s2734_s0 + $0x70] sm:$0xff]  }
 0x115   :  { %v1683_v44 = vpack.c.bf16 %v977_v49, %v976_v31  ;;  %v1763_v1 = vpack.c.bf16 %v1009_v32, %v1008_v55  ;;  %v1946_v59 = vpop.f32.mrb[16].mxu0  ;;  %v1978_v20 = vpop.f32.mrb[16].mxu1  ;;  %v2597_v11 = vadd.f32 %v2220_v51, %v791_v36  ;;  %v2600_v10 = vadd.f32 %v2220_v51, %v823_v37  ;;  %v2644_v39 = vld [vmem:[%s2734_s0 + $0xf0] sm:$0xff]  }
 0x116   :  { %1847 = vst [vmem:[%s2737_s5 + $0x38] sm:$0xff] %v1688_v50   ;;  %1863 = vst [vmem:[%s2737_s5 + $0xb8] sm:$0xff] %v1768_v33   ;;  %v918_v6 = vadd.f32 %v1946_v59, %v2403_v12  ;;  %v950_v7 = vadd.f32 %v1978_v20, %v2406_v13  ;;  %v439_v61 = vpop.f32.mrb[17].mxu0  ;;  %v567_v52 = vpop.f32.mrb[17].mxu1  ;;  %v792_v23 = vmul.f32 %v1577_v4, %v2213_v46 }
 0x117   :  { %1846 = vst [vmem:[%s2737_s5 + $0x30] sm:$0xff] %v1683_v44   ;;  %1862 = vst [vmem:[%s2737_s5 + $0xb0] sm:$0xff] %v1763_v1   ;;  %v916_v12 = vadd.f32 %v2415_v26, %v439_v61  ;;  %v948_v13 = vadd.f32 %v2418_v27, %v567_v52  ;;  %v1947_v60 = vpop.f32.mrb[18].mxu0  ;;  %v1979_v53 = vpop.f32.mrb[18].mxu1  ;;  %v824_v18 = vmul.f32 %v1641_v5, %v2213_v46 }
 0x118   :  { %v919_v19 = vadd.f32 %v1947_v60, %v2447_v16  ;;  %v951_v15 = vadd.f32 %v1979_v53, %v2450_v17  ;;  %v442_v40 = vpop.f32.mrb[19].mxu0  ;;  %v570_v41 = vpop.f32.mrb[19].mxu1  ;;  %v2615_v56 = vadd.f32 %v2220_v51, %v789_v58  ;;  %v2618_v57 = vadd.f32 %v2220_v51, %v821_v0  ;;  %v2627_v16 = vld [vmem:[%s2734_s0 + $0x78] sm:$0xff]  }
 0x119   :  { %v917_v26 = vadd.f32 %v2461_v14, %v442_v40  ;;  %v949_v27 = vadd.f32 %v2464_v62, %v570_v41  ;;  %v790_v3 = vmul.f32 %v1573_v21, %v2213_v46  ;;  %v822_v25 = vmul.f32 %v1637_v45, %v2213_v46  ;;  %v2632_v17 = vld [vmem:[%s2734_s0 + $0xf8] sm:$0xff]  }
 0x11a   :  { %v982_v8 = vmax.f32 %v918_v6, 0.0  ;;  %v1014_v9 = vmax.f32 %v950_v7, 0.0  ;;  %v983_v28 = vmax.f32 %v919_v19, 0.0  ;;  %v1015_v14 = vmax.f32 %v951_v15, 0.0 }
 0x11b   :  { %v980_v29 = vmax.f32 %v916_v12, 0.0  ;;  %v1012_v62 = vmax.f32 %v948_v13, 0.0  ;;  %v981_v36 = vmax.f32 %v917_v26, 0.0  ;;  %v1013_v37 = vmax.f32 %v949_v27, 0.0 }
 0x11c   :  { %v1698_v47 = vpack.c.bf16 %v983_v28, %v982_v8  ;;  %v1778_v48 = vpack.c.bf16 %v1015_v14, %v1014_v9  ;;  %v1584_v4 = vunpack.c.l.bf16 %v2627_v16  ;;  %v1648_v5 = vunpack.c.l.bf16 %v2632_v17 }
 0x11d   :  { %v1693_v43 = vpack.c.bf16 %v981_v36, %v980_v29  ;;  %v1773_v54 = vpack.c.bf16 %v1013_v37, %v1012_v62  ;;  %v1950_v31 = vpop.f32.mrb[20].mxu0  ;;  %v1982_v55 = vpop.f32.mrb[20].mxu1  ;;  %v863_v49 = vadd.f32 %v2220_v51, %v792_v23  ;;  %v895_v32 = vadd.f32 %v2220_v51, %v824_v18 }
 0x11e   :  { %1849 = vst [vmem:[%s2737_s5 + $0x48] sm:$0xff] %v1698_v47   ;;  %1865 = vst [vmem:[%s2737_s5 + $0xc8] sm:$0xff] %v1778_v48   ;;  %v922_v50 = vadd.f32 %v1950_v31, %v2497_v24  ;;  %v954_v33 = vadd.f32 %v1982_v55, %v2500_v2  ;;  %v455_v58 = vpop.f32.mrb[21].mxu0  ;;  %v583_v0 = vpop.f32.mrb[21].mxu1  ;;  %v861_v44 = vadd.f32 %v2220_v51, %v790_v3  ;;  %v1580_v21 = vunpack.c.l.bf16 %v2639_v38 }
 0x11f   :  { %v893_v1 = vadd.f32 %v2220_v51, %v822_v25  ;;  %1848 = vst [vmem:[%s2737_s5 + $0x40] sm:$0xff] %v1693_v43   ;;  %1864 = vst [vmem:[%s2737_s5 + $0xc0] sm:$0xff] %v1773_v54   ;;  %v920_v59 = vadd.f32 %v2515_v42, %v455_v58  ;;  %v952_v24 = vadd.f32 %v2518_v30, %v583_v0  ;;  %v1951_v20 = vpop.f32.mrb[22].mxu0  ;;  %v1983_v2 = vpop.f32.mrb[22].mxu1  ;;  %v1644_v45 = vunpack.c.l.bf16 %v2644_v39 }
 0x120   :  { %v923_v6 = vadd.f32 %v1951_v20, %v2547_v63  ;;  %v955_v7 = vadd.f32 %v1983_v2, %v2550_v22  ;;  %v458_v61 = vpop.f32.mrb[23].mxu0  ;;  %v586_v52 = vpop.f32.mrb[23].mxu1  ;;  %v795_v12 = vmul.f32 %v1584_v4, %v2213_v46  ;;  %v827_v13 = vmul.f32 %v1648_v5, %v2213_v46 }
 0x121   :  { %v921_v42 = vadd.f32 %v2561_v34, %v458_v61  ;;  %v953_v30 = vadd.f32 %v2564_v35, %v586_v52  ;;  %v1585_v60 = vunpack.c.h.bf16 %v2627_v16  ;;  %v1649_v53 = vunpack.c.h.bf16 %v2632_v17 }
 0x122   :  { %v986_v23 = vmax.f32 %v922_v50, 0.0  ;;  %v1018_v18 = vmax.f32 %v954_v33, 0.0  ;;  %v987_v19 = vmax.f32 %v923_v6, 0.0  ;;  %v1019_v63 = vmax.f32 %v955_v7, 0.0 }
 0x123   :  { %v984_v15 = vmax.f32 %v920_v59, 0.0  ;;  %v1016_v22 = vmax.f32 %v952_v24, 0.0  ;;  %v985_v40 = vmax.f32 %v921_v42, 0.0  ;;  %v1017_v41 = vmax.f32 %v953_v30, 0.0 }
 0x124   :  { %v1708_v26 = vpack.c.bf16 %v987_v19, %v986_v23  ;;  %v1788_v27 = vpack.c.bf16 %v1019_v63, %v1018_v18  ;;  %v793_v3 = vmul.f32 %v1580_v21, %v2213_v46  ;;  %v825_v34 = vmul.f32 %v1644_v45, %v2213_v46 }
 0x125   :  { %v1703_v25 = vpack.c.bf16 %v985_v40, %v984_v15  ;;  %v1783_v35 = vpack.c.bf16 %v1017_v41, %v1016_v22  ;;  %v1954_v8 = vpop.f32.mrb[24].mxu0  ;;  %v1986_v16 = vpop.f32.mrb[24].mxu1  ;;  %v1581_v17 = vunpack.c.h.bf16 %v2639_v38  ;;  %v1645_v9 = vunpack.c.h.bf16 %v2644_v39 }
 0x126   :  { %1851 = vst [vmem:[%s2737_s5 + $0x58] sm:$0xff] %v1708_v26   ;;  %1867 = vst [vmem:[%s2737_s5 + $0xd8] sm:$0xff] %v1788_v27   ;;  %v926_v28 = vadd.f32 %v1954_v8, %v2597_v11  ;;  %v958_v14 = vadd.f32 %v1986_v16, %v2600_v10  ;;  %v471_v29 = vpop.f32.mrb[25].mxu0  ;;  %v599_v62 = vpop.f32.mrb[25].mxu1  ;;  %v866_v36 = vadd.f32 %v2220_v51, %v795_v12 }
 0x127   :  { %v898_v37 = vadd.f32 %v2220_v51, %v827_v13  ;;  %1850 = vst [vmem:[%s2737_s5 + $0x50] sm:$0xff] %v1703_v25   ;;  %1866 = vst [vmem:[%s2737_s5 + $0xd0] sm:$0xff] %v1783_v35   ;;  %v924_v47 = vadd.f32 %v2615_v56, %v471_v29  ;;  %v956_v11 = vadd.f32 %v2618_v57, %v599_v62  ;;  %v1955_v48 = vpop.f32.mrb[26].mxu0  ;;  %v1987_v10 = vpop.f32.mrb[26].mxu1 }
 0x128   :  { %v796_v4 = vmul.f32 %v1585_v60, %v2213_v46  ;;  %v828_v5 = vmul.f32 %v1649_v53, %v2213_v46  ;;  %v927_v38 = vadd.f32 %v1955_v48, %v863_v49  ;;  %v959_v39 = vadd.f32 %v1987_v10, %v895_v32  ;;  %v474_v43 = vpop.f32.mrb[27].mxu0  ;;  %v602_v54 = vpop.f32.mrb[27].mxu1 }
 0x129   :  { %v864_v31 = vadd.f32 %v2220_v51, %v793_v3  ;;  %v896_v55 = vadd.f32 %v2220_v51, %v825_v34  ;;  %v925_v50 = vadd.f32 %v861_v44, %v474_v43  ;;  %v957_v33 = vadd.f32 %v893_v1, %v602_v54 }
 0x12a   :  { %v794_v56 = vmul.f32 %v1581_v17, %v2213_v46  ;;  %v826_v57 = vmul.f32 %v1645_v9, %v2213_v46  ;;  %v990_v58 = vmax.f32 %v926_v28, 0.0  ;;  %v1022_v0 = vmax.f32 %v958_v14, 0.0 }
 0x12b   :  { %v991_v59 = vmax.f32 %v927_v38, 0.0  ;;  %v1023_v24 = vmax.f32 %v959_v39, 0.0  ;;  %v988_v20 = vmax.f32 %v924_v47, 0.0  ;;  %v1020_v2 = vmax.f32 %v956_v11, 0.0 }
 0x12c   :  { %v989_v49 = vmax.f32 %v925_v50, 0.0  ;;  %v1021_v32 = vmax.f32 %v957_v33, 0.0  ;;  %v867_v6 = vadd.f32 %v2220_v51, %v796_v4  ;;  %v899_v7 = vadd.f32 %v2220_v51, %v828_v5 }
 0x12d   :  { %v1718_v21 = vpack.c.bf16 %v991_v59, %v990_v58  ;;  %v1798_v45 = vpack.c.bf16 %v1023_v24, %v1022_v0  ;;  %v1958_v61 = vpop.f32.mrb[28].mxu0  ;;  %v1990_v52 = vpop.f32.mrb[28].mxu1  ;;  %v865_v46 = vadd.f32 %v2220_v51, %v794_v56  ;;  %v897_v12 = vadd.f32 %v2220_v51, %v826_v57 }
 0x12e   :  { %v1713_v44 = vpack.c.bf16 %v989_v49, %v988_v20  ;;  %v1793_v1 = vpack.c.bf16 %v1021_v32, %v1020_v2  ;;  %v930_v13 = vadd.f32 %v1958_v61, %v866_v36  ;;  %v962_v42 = vadd.f32 %v1990_v52, %v898_v37  ;;  %v487_v30 = vpop.f32.mrb[29].mxu0  ;;  %v615_v60 = vpop.f32.mrb[29].mxu1 }
 0x12f   :  { %1853 = vst [vmem:[%s2737_s5 + $0x68] sm:$0xff] %v1718_v21   ;;  %1869 = vst [vmem:[%s2737_s5 + $0xe8] sm:$0xff] %v1798_v45   ;;  %v928_v51 = vadd.f32 %v864_v31, %v487_v30  ;;  %v960_v53 = vadd.f32 %v896_v55, %v615_v60  ;;  %v1959_v23 = vpop.f32.mrb[30].mxu0  ;;  %v1991_v18 = vpop.f32.mrb[30].mxu1 }
 0x130   :  { %1852 = vst [vmem:[%s2737_s5 + $0x60] sm:$0xff] %v1713_v44   ;;  %1868 = vst [vmem:[%s2737_s5 + $0xe0] sm:$0xff] %v1793_v1   ;;  %v931_v19 = vadd.f32 %v1959_v23, %v867_v6  ;;  %v963_v63 = vadd.f32 %v1991_v18, %v899_v7  ;;  %v490_v15 = vpop.f32.mrb[31].mxu0  ;;  %v618_v22 = vpop.f32.mrb[31].mxu1  ;;  %v994_v26 = vmax.f32 %v930_v13, 0.0  ;;  %v1026_v27 = vmax.f32 %v962_v42, 0.0 }
 0x131   :  { %v929_v40 = vadd.f32 %v865_v46, %v490_v15  ;;  %v961_v41 = vadd.f32 %v897_v12, %v618_v22  ;;  %v992_v25 = vmax.f32 %v928_v51, 0.0  ;;  %v1024_v35 = vmax.f32 %v960_v53, 0.0 }
 0x132   :  { %v995_v3 = vmax.f32 %v931_v19, 0.0  ;;  %v1027_v34 = vmax.f32 %v963_v63, 0.0 }
 0x133   :  { %v993_v8 = vmax.f32 %v929_v40, 0.0  ;;  %v1025_v16 = vmax.f32 %v961_v41, 0.0 }
 0x134   :  { %v1728_v17 = vpack.c.bf16 %v995_v3, %v994_v26  ;;  %v1808_v9 = vpack.c.bf16 %v1027_v34, %v1026_v27 }
 0x135   :  { %v1723_v28 = vpack.c.bf16 %v993_v8, %v992_v25  ;;  %v1803_v14 = vpack.c.bf16 %v1025_v16, %v1024_v35 }
 0x136   :  { %1855 = vst [vmem:[%s2737_s5 + $0x78] sm:$0xff] %v1728_v17   ;;  %1871 = vst [vmem:[%s2737_s5 + $0xf8] sm:$0xff] %v1808_v9  }
 0x137   :  { %1854 = vst [vmem:[%s2737_s5 + $0x70] sm:$0xff] %v1723_v28   ;;  %1870 = vst [vmem:[%s2737_s5 + $0xf0] sm:$0xff] %v1803_v14  }

// kernel: residual_block_forward.4
= control target key start
LH: loop header
LB: loop body
LE: loop exit
PB: predicated region body
PF: predicated region fallthrough
CT: control target
= control target key end

     0   :  { %s6968_s21 = smov 0   ;;  %s9689_s0 = inlined_call_operand.vmem [shape: bf16[2,288,128], index: 0, kind: input, shape index: {}]   ;;  %s9690_s1 = inlined_call_operand.vmem [shape: bf16[3,384,128], index: 1, kind: input, shape index: {}]   ;;  %s9691_s2 = inlined_call_operand.vmem [shape: bf16[256,1], index: 2, kind: input, shape index: {}]   ;;  %s9692_s3 = inlined_call_operand.vmem [shape: bf16[256,1], index: 3, kind: input, shape index: {}]   ;;  %s9693_s4 = inlined_call_operand.vmem [shape: f32[256,1], index: 4, kind: input, shape index: {}]   ;;  %s9694_s5 = inlined_call_operand.vmem [shape: bf16[2,256,128], index: 5, kind: output, shape index: {0}]   ;;  %s9695_s6 = inlined_call_operand.vmem [shape: f32[2,2,128], index: 6, kind: output, shape index: {1}]  }
   0x1 LB: > { %s5481_s22 = sadd.s32 4294967295, %s6929_s21   ;;  %p5485_p0 = scmp.ge.s32.totalorder %s6929_s21, 1  ;;  %s6929_s21 = sphi %s6968_s21, %s17_s21  }
   0x2   : > { %p215_p1 = scmp.lt.s32.totalorder %s6929_s21, 3 }
   0x4   : > { %p216_p2 = pnand %p5485_p0, %p215_p1 }
   0x6   : > { %219 = sbr.rel (%p216_p2) target bundleno = 764 (0x2fc), region = 40 }
   0xd   : > { %v324_v0 = vld [vmem:[%s9692_s3 + $0x40] sm:$0xf]  ;;  %v6931_v2 = vmov 0   ;;  %v325_v3 = vld [vmem:[%s9692_s3 + $0x44] sm:$0xf]  ;;  %p249_p3 = scmp.lt.s32.totalorder %s5481_s22, 1 }
   0xe   : > { %v276_v1 = vld [vmem:[%s9691_s2] sm:$0xf]  ;;  %6704 = vset.pattern.permute.xlu1 %v6931_v2  ;;  %6703 = vset.pattern.permute.xlu0 %v6931_v2  ;;  %v277_v4 = vld [vmem:[%s9691_s2 + $0x4] sm:$0xf]  ;;  %v327_v5 = vld [vmem:[%s9692_s3 + $0x4c] sm:$0xf] }
   0xf   : > { %1338 = vperm.xlu1 %6704, %v324_v0   ;;  %486 = vperm.xlu0 %6703, %v276_v1   ;;  %v326_v6 = vld [vmem:[%s9692_s3 + $0x48] sm:$0xf]  ;;  %v329_v7 = vld [vmem:[%s9692_s3 + $0x54] sm:$0xf]  ;;  %v328_v8 = vld [vmem:[%s9692_s3 + $0x50] sm:$0xf] }
  0x10   : > { %v279_v9 = vld [vmem:[%s9691_s2 + $0xc] sm:$0xf]  ;;  %v278_v10 = vld [vmem:[%s9691_s2 + $0x8] sm:$0xf]  ;;  %v331_v11 = vld [vmem:[%s9692_s3 + $0x5c] sm:$0xf] }
  0x11   : > { %v330_v12 = vld [vmem:[%s9692_s3 + $0x58] sm:$0xf]  ;;  %v333_v13 = vld [vmem:[%s9692_s3 + $0x64] sm:$0xf]  ;;  %v332_v14 = vld [vmem:[%s9692_s3 + $0x60] sm:$0xf] }
  0x12   : > { %s10004_s22 = smov (!%p249_p3, %s5481_s22), 1  ;;  %v6705_v15 = vld [vmem:[%s9690_s1 + $0x100] sm:$0xff]   ;;  %v6708_v17 = vld [vmem:[%s9690_s1 + $0x108] sm:$0xff]   ;;  %v281_v18 = vld [vmem:[%s9691_s2 + $0x14] sm:$0xf]  ;;  %vm264_vm0 = vcmask 1040384  }
  0x13   : > { %1350 = vperm.xlu1 %6704, %v325_v3   ;;  %498 = vperm.xlu0 %6703, %v277_v4   ;;  %s6692_s7 = smul.u32 144, %s10004_s22  ;;  %v6706_v16 = vld [vmem:[%s9690_s1 + $0xc0] sm:$0xff]   ;;  %v280_v19 = vld [vmem:[%s9691_s2 + $0x10] sm:$0xf]  ;;  %v335_v20 = vld [vmem:[%s9692_s3 + $0x6c] sm:$0xf] }
  0x14   : > { %5964 = vmatprep.subr.bf16.mxu0 %v6705_v15  ;;  %v334_v21 = vld [vmem:[%s9692_s3 + $0x68] sm:$0xf]  ;;  %v7063_v25 = vld [vmem:[%s9690_s1 + $0x140] sm:$0xff]   ;;  %v337_v27 = vld [vmem:[%s9692_s3 + $0x74] sm:$0xf]  ;;  %vm270_vm3 = vcmask 1047559  }
  0x15   : > { %s7043_s18 = scalar_lea.vmem %s9689_s0, %s6692_s7  ;;  %5965 = vmatpush3.bf16.msra.mxu0 %v6706_v16  ;;  %v6709_v24 = vld [vmem:[%s9690_s1 + $0xc8] sm:$0xff]   ;;  %v336_v28 = vld [vmem:[%s9692_s3 + $0x70] sm:$0xf]  ;;  %6516 = vmatprep.subr.bf16.mxu1 %v7063_v25  ;;  %v339_v32 = vld [vmem:[%s9692_s3 + $0x7c] sm:$0xf]  ;;  %vm1123_vm6 = vcmask 1047552  }
  0x16   : > { %5966 = vmatprep.subr.bf16.mxu0 %v6708_v17  ;;  %v7052_v22 = vld [vmem:[%s7043_s18 + $0x8] sm:$0xf]  ;;  %v7055_v23 = vld [vmem:[%s7043_s18 + $0xc] sm:$0xf]  ;;  %v6712_v29 = vld [vmem:[%s9690_s1 + $0x110] sm:$0xff]   ;;  %6524 = vmatpush3.bf16.msra.mxu1 %v7063_v25  ;;  %s5836_s15 = sshll.u32 %s10004_s22, 7 }
  0x17   : > { %1374 = vperm.xlu1 %6704, %v327_v5   ;;  %1362 = vperm.xlu0 %6703, %v326_v6   ;;  %v5538_v26 = vcombine.low %v7052_v22, %v7055_v23  ;;  %v6713_v30 = vld [vmem:[%s9690_s1 + $0xd0] sm:$0xff]   ;;  %v6714_v31 = vld [vmem:[%s9690_s1 + $0x148] sm:$0xff]   ;;  %v338_v33 = vld [vmem:[%s9692_s3 + $0x78] sm:$0xf]  ;;  %vm265_vm1 = vsmask.f32 256  ;;  %s9620_s19 = scalar_lea.vmem %s9694_s5, %s5836_s15 }
  0x18   : > { %6517 = vmatprep.subr.bf16.mxu1 %v6714_v31  ;;  %v283_v34 = vld [vmem:[%s9691_s2 + $0x1c] sm:$0xf]  ;;  %v282_v37 = vld [vmem:[%s9691_s2 + $0x18] sm:$0xf]  ;;  %v6718_v38 = vld [vmem:[%s9690_s1 + $0x150] sm:$0xff]   ;;  %s5489_s20 = sshll.u32 %s10004_s22, 1 }
  0x19   : > { %5967 = vmatpush3.bf16.msra.mxu0 %v6709_v24  ;;  %2862 = vmatprep.mubr.bf16.mxu0 %v5538_v26  ;;  %v6716_v35 = vld [vmem:[%s9690_s1 + $0x118] sm:$0xff]   ;;  %v285_v39 = vld [vmem:[%s9691_s2 + $0x24] sm:$0xf]  ;;  %v284_v40 = vld [vmem:[%s9691_s2 + $0x20] sm:$0xf]  ;;  %s262_s25 = scalar_lea.vmem %s9695_s6, %s5489_s20 }
  0x1a   : > { %5968 = vmatprep.subr.bf16.mxu0 %v6712_v29  ;;  %6525 = vmatpush3.bf16.msra.mxu1 %v6714_v31  ;;  %v6717_v36 = vld [vmem:[%s9690_s1 + $0xd8] sm:$0xff]   ;;  %v6720_v41 = vld [vmem:[%s9690_s1 + $0x120] sm:$0xff]   ;;  %v287_v44 = vld [vmem:[%s9691_s2 + $0x2c] sm:$0xf]  ;;  %vm271_vm4 = vsmask.f32 7966 }
  0x1b   : > { %1398 = vperm.xlu1 %6704, %v329_v7   ;;  %1386 = vperm.xlu0 %6703, %v328_v8   ;;  %v6721_v42 = vld [vmem:[%s9690_s1 + $0xe0] sm:$0xff]   ;;  %v6722_v43 = vld [vmem:[%s9690_s1 + $0x158] sm:$0xff]   ;;  %v286_v45 = vld [vmem:[%s9691_s2 + $0x28] sm:$0xf]  ;;  %vm1124_vm7 = vsmask.f32 7938 }
  0x1c   : > { %6518 = vmatprep.subr.bf16.mxu1 %v6718_v38  ;;  %v6724_v46 = vld [vmem:[%s9690_s1 + $0x128] sm:$0xff]   ;;  %v6726_v48 = vld [vmem:[%s9690_s1 + $0x160] sm:$0xff]   ;;  %v289_v49 = vld [vmem:[%s9691_s2 + $0x34] sm:$0xf]  ;;  %vm1640_vm8 = vsmask.f32 7424 }
  0x1d   : > { %5969 = vmatpush3.bf16.msra.mxu0 %v6713_v30  ;;  %v6725_v47 = vld [vmem:[%s9690_s1 + $0xe8] sm:$0xff]   ;;  %v288_v50 = vld [vmem:[%s9691_s2 + $0x30] sm:$0xf]  ;;  %v291_v51 = vld [vmem:[%s9691_s2 + $0x3c] sm:$0xf] }
  0x1e   : > { %5970 = vmatprep.subr.bf16.mxu0 %v6716_v35  ;;  %6526 = vmatpush3.bf16.msra.mxu1 %v6718_v38  ;;  %v290_v52 = vld [vmem:[%s9691_s2 + $0x38] sm:$0xf]  ;;  %v7148_v53 = vld [vmem:[%s7043_s18 + $0x10] sm:$0xf]  ;;  %v7151_v54 = vld [vmem:[%s7043_s18 + $0x14] sm:$0xf] }
  0x1f   : > { %522 = vperm.xlu1 %6704, %v279_v9   ;;  %510 = vperm.xlu0 %6703, %v278_v10   ;;  %v6728_v55 = vld [vmem:[%s9690_s1 + $0x130] sm:$0xff]   ;;  %v5682_v56 = vcombine.low %v7148_v53, %v7151_v54  ;;  %v6730_v58 = vld [vmem:[%s9690_s1 + $0x168] sm:$0xff]   ;;  %v293_v59 = vld [vmem:[%s9691_s2 + $0x44] sm:$0xf] }
  0x20   : > { %6519 = vmatprep.subr.bf16.mxu1 %v6722_v43  ;;  %v6729_v57 = vld [vmem:[%s9690_s1 + $0xf0] sm:$0xff]   ;;  %v292_v60 = vld [vmem:[%s9691_s2 + $0x40] sm:$0xf]  ;;  %v6732_v61 = vld [vmem:[%s9690_s1 + $0x138] sm:$0xff]  }
  0x21   : > { %5971 = vmatpush3.bf16.msra.mxu0 %v6717_v36  ;;  %3746 = vst [vmem:[#allocation2 + $0x8] sm:$0xff] %v5682_v56  ;;  %v6733_v62 = vld [vmem:[%s9690_s1 + $0xf8] sm:$0xff]   ;;  %v6734_v63 = vld [vmem:[%s9690_s1 + $0x170] sm:$0xff]   ;;  %v295_v0 = vld [vmem:[%s9691_s2 + $0x4c] sm:$0xf] }
  0x22   : > { %5972 = vmatprep.subr.bf16.mxu0 %v6720_v41  ;;  %6527 = vmatpush3.bf16.msra.mxu1 %v6722_v43  ;;  %v294_v1 = vld [vmem:[%s9691_s2 + $0x48] sm:$0xf]  ;;  %vm266_vm2 = vmand %vm264_vm0, %vm265_vm1  ;;  %v267_v2 = vld [vmem:[#allocation2] sm:$0x1] }
  0x23   : > { %1422 = vperm.xlu1 %6704, %v331_v11   ;;  %1410 = vperm.xlu0 %6703, %v330_v12   ;;  %v268_v3 = vsel %vm266_vm2, 0, %v267_v2  ;;  %v6739_v4 = vld [vmem:[%s9690_s1 + $0x178] sm:$0xff]   ;;  %v297_v5 = vld [vmem:[%s9691_s2 + $0x54] sm:$0xf]  ;;  %v296_v6 = vld [vmem:[%s9691_s2 + $0x50] sm:$0xf] }
  0x24   : > { %6520 = vmatprep.subr.bf16.mxu1 %v6726_v48  ;;  %269 = vst [vmem:[#allocation2] sm:$0x1] %v268_v3  ;;  %v299_v7 = vld [vmem:[%s9691_s2 + $0x5c] sm:$0xf]  ;;  %v298_v8 = vld [vmem:[%s9691_s2 + $0x58] sm:$0xf]  ;;  %vm272_vm5 = vmand %vm270_vm3, %vm271_vm4 }
  0x25   : > { %5973 = vmatpush3.bf16.msra.mxu0 %v6721_v42  ;;  %v7203_v9 = vld [vmem:[%s7043_s18 + $0x1c] sm:$0xf]  ;;  %v7206_v10 = vld [vmem:[%s7043_s18 + $0x18] sm:$0xf]  ;;  %v301_v11 = vld [vmem:[%s9691_s2 + $0x64] sm:$0xf] }
  0x26   : > { %5974 = vmatprep.subr.bf16.mxu0 %v6724_v46  ;;  %6528 = vmatpush3.bf16.msra.mxu1 %v6726_v48  ;;  %v300_v12 = vld [vmem:[%s9691_s2 + $0x60] sm:$0xf]  ;;  %v303_v15 = vld [vmem:[%s9691_s2 + $0x6c] sm:$0xf]  ;;  %v302_v16 = vld [vmem:[%s9691_s2 + $0x68] sm:$0xf] }
  0x27   : > { %1446 = vperm.xlu1 %6704, %v333_v13   ;;  %1434 = vperm.xlu0 %6703, %v332_v14   ;;  %v5683_v13 = vcombine.low %v7206_v10, %v7203_v9  ;;  %v6745_v14 = vld [vmem:[%s9690_s1 + $0x40] sm:$0xff]   ;;  %v305_v17 = vld [vmem:[%s9691_s2 + $0x74] sm:$0xf]  ;;  %v310_v29 = vld [vmem:[%s9692_s3 + $0x8] sm:$0xf] }
  0x28   : > { %6521 = vmatprep.subr.bf16.mxu1 %v6730_v58  ;;  %v308_v24 = vld [vmem:[%s9692_s3] sm:$0xf]  ;;  %v313_v30 = vld [vmem:[%s9692_s3 + $0x14] sm:$0xf]  ;;  %v312_v31 = vld [vmem:[%s9692_s3 + $0x10] sm:$0xf] }
  0x29   : > { %5975 = vmatpush3.bf16.msra.mxu0 %v6725_v47  ;;  %3747 = vst [vmem:[#allocation2 + $0x20] sm:$0xff] %v5683_v13  ;;  %v7247_v26 = vld [vmem:[%s7043_s18 + $0x20] sm:$0xf]  ;;  %v317_v35 = vld [vmem:[%s9692_s3 + $0x24] sm:$0xf]  ;;  %v5068_v3 = vld [vmem:[%s9693_s4 + $0x28] sm:$0xff] }
  0x2a   : > { %5976 = vmatprep.subr.bf16.mxu0 %v6728_v55  ;;  %6529 = vmatpush3.bf16.msra.mxu1 %v6730_v58  ;;  %v316_v36 = vld [vmem:[%s9692_s3 + $0x20] sm:$0xf]  ;;  %v319_v38 = vld [vmem:[%s9692_s3 + $0x2c] sm:$0xf]  ;;  %v320_v41 = vld [vmem:[%s9692_s3 + $0x30] sm:$0xf] }
  0x2b   : > { %546 = vperm.xlu1 %6704, %v281_v18   ;;  %534 = vperm.xlu0 %6703, %v280_v19   ;;  %v304_v18 = vld [vmem:[%s9691_s2 + $0x70] sm:$0xf]  ;;  %v307_v19 = vld [vmem:[%s9691_s2 + $0x7c] sm:$0xf]  ;;  %v6932_v42 = vmov 839922192   ;;  %vm7567_vm9 = vmand %vm1123_vm6, %vm1124_vm7 }
  0x2c   : > { %6522 = vmatprep.subr.bf16.mxu1 %v6734_v63  ;;  %v490_v43 = vunpack.c.l.s4 %v6932_v42  ;;  %v3624_v46 = vld [vmem:[%s7043_s18 + $0x28] sm:$0xf]  ;;  %v323_v47 = vld [vmem:[%s9692_s3 + $0x3c] sm:$0xf]  ;;  %v322_v48 = vld [vmem:[%s9692_s3 + $0x38] sm:$0xf] }
  0x2d   : > { %5977 = vmatpush3.bf16.msra.mxu0 %v6729_v57  ;;  %v5063_v55 = vld [vmem:[%s9693_s4] sm:$0xff]  ;;  %vm8049_vm10 = vmand %vm1123_vm6, %vm1640_vm8 }
  0x2e   : > { %5978 = vmatprep.subr.bf16.mxu0 %v6732_v61  ;;  %6530 = vmatpush3.bf16.msra.mxu1 %v6734_v63 }
  0x2f   : > { %1470 = vperm.xlu1 %6704, %v335_v20   ;;  %1458 = vperm.xlu0 %6703, %v334_v21   ;;  %v306_v20 = vld [vmem:[%s9691_s2 + $0x78] sm:$0xf]  ;;  %v309_v21 = vld [vmem:[%s9692_s3 + $0x4] sm:$0xf] }
  0x30   : > { %6523 = vmatprep.subr.bf16.mxu1 %v6739_v4 }
  0x31   : > { %5979 = vmatpush3.bf16.msra.mxu0 %v6733_v62  ;;  %v356_v62 = vld [vmem:[%s7043_s18 + $0x40] sm:$0xf] }
  0x32   : > { %6372 = vmatprep.subr.bf16.mxu0 %v7063_v25  ;;  %6531 = vmatpush3.bf16.msra.mxu1 %v6739_v4  ;;  %v7244_v25 = vld [vmem:[%s7043_s18 + $0x24] sm:$0xf] }
  0x33   : > { %1494 = vperm.xlu1 %6704, %v337_v27   ;;  %1482 = vperm.xlu0 %6703, %v336_v28   ;;  %v5684_v27 = vcombine.low %v7247_v26, %v7244_v25  ;;  %v311_v28 = vld [vmem:[%s9692_s3 + $0xc] sm:$0xf] }
  0x34   : > { %6100 = vmatprep.subr.bf16.mxu1 %v6745_v14 }
  0x35   : > { %3748 = vst [vmem:[#allocation2 + $0x38] sm:$0xff] %v5684_v27  ;;  %v5072_v27 = vld [vmem:[%s9693_s4 + $0x48] sm:$0xff] }
  0x37   : > { %1518 = vperm.xlu1 %6704, %v339_v32   ;;  %1506 = vperm.xlu0 %6703, %v338_v33   ;;  %v315_v32 = vld [vmem:[%s9692_s3 + $0x1c] sm:$0xf]  ;;  %v314_v33 = vld [vmem:[%s9692_s3 + $0x18] sm:$0xf] }
  0x3b   : > { %570 = vperm.xlu1 %6704, %v283_v34   ;;  %558 = vperm.xlu0 %6703, %v282_v37   ;;  %v273_v34 = vld [vmem:[#allocation2 + $0x178] sm:$0x80] }
  0x3c   : > { %v274_v37 = vsel %vm272_vm5, 0, %v273_v34 }
  0x3d   : > { %275 = vst [vmem:[#allocation2 + $0x178] sm:$0x80] %v274_v37  ;;  %v5074_v37 = vld [vmem:[%s9693_s4 + $0x58] sm:$0xff] }
  0x3f   : > { %594 = vperm.xlu1 %6704, %v285_v39   ;;  %582 = vperm.xlu0 %6703, %v284_v40   ;;  %v318_v39 = vld [vmem:[%s9692_s3 + $0x28] sm:$0xf]  ;;  %v321_v40 = vld [vmem:[%s9692_s3 + $0x34] sm:$0xf] }
  0x43   : > { %618 = vperm.xlu1 %6704, %v287_v44   ;;  %606 = vperm.xlu0 %6703, %v286_v45   ;;  %v492_v44 = vlaneseq  ;;  %v3625_v45 = vld [vmem:[%s7043_s18 + $0x2c] sm:$0xf] }
  0x47   : > { %642 = vperm.xlu1 %6704, %v289_v49   ;;  %630 = vperm.xlu0 %6703, %v288_v50   ;;  %v5685_v49 = vcombine.low %v3624_v46, %v3625_v45  ;;  %v491_v50 = vunpack.c.0.s8 %v490_v43  ;;  %v5076_v43 = vld [vmem:[%s9693_s4 + $0x68] sm:$0xff]  ;;  %v5075_v45 = vld [vmem:[%s9693_s4 + $0x60] sm:$0xff] }
  0x49   : > { %3749 = vst [vmem:[#allocation2 + $0x50] sm:$0xff] %v5685_v49  ;;  %v5078_v49 = vld [vmem:[%s9693_s4 + $0x78] sm:$0xff] }
  0x4b   : > { %666 = vperm.xlu1 %6704, %v291_v51   ;;  %654 = vperm.xlu0 %6703, %v290_v52   ;;  %v493_v51 = vshrl.u32 %v492_v44, 7  ;;  %v5064_v52 = vld [vmem:[%s9693_s4 + $0x8] sm:$0xff] }
  0x4d   : > { %v7301_v56 = vsub.s32 %v491_v50, %v493_v51  ;;  %v7391_v50 = vld [vmem:[%s7043_s18 + $0x4] sm:$0xf]  ;;  %v363_v51 = vld [vmem:[%s7043_s18 + $0x5c] sm:$0xf] }
  0x4f   : > { %690 = vperm.xlu1 %6704, %v293_v59   ;;  %678 = vperm.xlu0 %6703, %v292_v60   ;;  %v5066_v59 = vld [vmem:[%s9693_s4 + $0x18] sm:$0xff]  ;;  %v5065_v60 = vld [vmem:[%s9693_s4 + $0x10] sm:$0xff] }
  0x53   : > { %714 = vperm.xlu1 %6704, %v295_v0   ;;  %702 = vperm.xlu0 %6703, %v294_v1   ;;  %v357_v0 = vld [vmem:[%s7043_s18 + $0x44] sm:$0xf] }
  0x57   : > { %738 = vperm.xlu1 %6704, %v297_v5   ;;  %726 = vperm.xlu0 %6703, %v296_v6   ;;  %v5067_v6 = vld [vmem:[%s9693_s4 + $0x20] sm:$0xff] }
  0x5b   : > { %762 = vperm.xlu1 %6704, %v299_v7   ;;  %750 = vperm.xlu0 %6703, %v298_v8   ;;  %v3627_v7 = vld [vmem:[%s7043_s18 + $0x34] sm:$0xf]  ;;  %v3626_v8 = vld [vmem:[%s7043_s18 + $0x30] sm:$0xf] }
  0x5c   : > { %v5686_v13 = vcombine.low %v3626_v8, %v3627_v7 }
  0x5e   : > { %3750 = vst [vmem:[#allocation2 + $0x68] sm:$0xff] %v5686_v13 }
  0x5f   : > { %786 = vperm.xlu1 %6704, %v301_v11   ;;  %774 = vperm.xlu0 %6703, %v300_v12  }
  0x63   : > { %810 = vperm.xlu1 %6704, %v303_v15   ;;  %798 = vperm.xlu0 %6703, %v302_v16   ;;  %v5070_v15 = vld [vmem:[%s9693_s4 + $0x38] sm:$0xff] }
  0x67   : > { %834 = vperm.xlu1 %6704, %v305_v17   ;;  %822 = vperm.xlu0 %6703, %v304_v18   ;;  %v5069_v17 = vld [vmem:[%s9693_s4 + $0x30] sm:$0xff]  ;;  %v359_v18 = vld [vmem:[%s7043_s18 + $0x4c] sm:$0xf] }
  0x6b   : > { %858 = vperm.xlu1 %6704, %v307_v19   ;;  %846 = vperm.xlu0 %6703, %v306_v20  }
  0x6f   : > { %1158 = vperm.xlu1 %6704, %v309_v21   ;;  %1146 = vperm.xlu0 %6703, %v308_v24   ;;  %v358_v24 = vld [vmem:[%s7043_s18 + $0x48] sm:$0xf] }
  0x73   : > { %1182 = vperm.xlu1 %6704, %v311_v28   ;;  %1170 = vperm.xlu0 %6703, %v310_v29   ;;  %v5071_v29 = vld [vmem:[%s9693_s4 + $0x40] sm:$0xff] }
  0x77   : > { %1206 = vperm.xlu1 %6704, %v313_v30   ;;  %1194 = vperm.xlu0 %6703, %v312_v31   ;;  %v361_v31 = vld [vmem:[%s7043_s18 + $0x54] sm:$0xf] }
  0x7b   : > { %1230 = vperm.xlu1 %6704, %v315_v32   ;;  %1218 = vperm.xlu0 %6703, %v314_v33   ;;  %v360_v32 = vld [vmem:[%s7043_s18 + $0x50] sm:$0xf] }
  0x7f   : > { %1254 = vperm.xlu1 %6704, %v317_v35   ;;  %1242 = vperm.xlu0 %6703, %v316_v36  }
  0x83   : > { %1278 = vperm.xlu1 %6704, %v319_v38   ;;  %1266 = vperm.xlu0 %6703, %v318_v39   ;;  %v5073_v39 = vld [vmem:[%s9693_s4 + $0x50] sm:$0xff] }
  0x87   : > { %1302 = vperm.xlu1 %6704, %v321_v40   ;;  %1290 = vperm.xlu0 %6703, %v320_v41  }
  0x8b   : > { %1326 = vperm.xlu1 %6704, %v323_v47   ;;  %1314 = vperm.xlu0 %6703, %v322_v48   ;;  %v7384_v47 = vld [vmem:[%s7043_s18 + $0x4c] sm:$0xf] }
  0x8c   : > { %9783 = vst [vmem:[#allocation3_spill] sm:$0xff] %v7384_v47 }
  0x8e   : > { %v1339_v57 = vpop.permute.xlu1 %1338  ;;  %v7303_v58 = vpop.permute.xlu0 %486 }
  0x8f   : > { %5102 = vperm.xlu1 %6704, %v5064_v52   ;;  %5097 = vperm.xlu0 %6703, %v5063_v55   ;;  %v7312_v61 = vrot.slane %v1339_v57, %v7301_v56  ;;  %v5077_v52 = vld [vmem:[%s9693_s4 + $0x70] sm:$0xff]  ;;  %v7398_v55 = vld [vmem:[%s7043_s18 + $0x48] sm:$0xf]  ;;  %v495_v57 = vrot.slane %v7303_v58, %v7301_v56 }
  0x90   : > { %9784 = vst [vmem:[#allocation4_spill] sm:$0xff] %v7398_v55 }
  0x91   : > { %v1544_v4 = vmul.bf16 %v7312_v61, %v356_v62  ;;  %v2332_v7 = vmul.bf16 %v7398_v55, %v7312_v61 }
  0x92   : > { %v1351_v63 = vpop.permute.xlu1 %1350  ;;  %v499_v1 = vpop.permute.xlu0 %498 }
  0x93   : > { %v7317_v2 = vrot.slane %v1351_v63, %v7301_v56  ;;  %5112 = vperm.xlu1 %6704, %v5066_v59   ;;  %5107 = vperm.xlu0 %6703, %v5065_v60   ;;  %v507_v48 = vrot.slane %v499_v1, %v7301_v56  ;;  %v7406_v60 = vld [vmem:[%s7043_s18] sm:$0xf]  ;;  %v362_v63 = vld [vmem:[%s7043_s18 + $0x58] sm:$0xf] }
  0x94   : > { %v868_v13 = vmul.bf16 %v495_v57, %v7406_v60 }
  0x95   : > { %v1545_v5 = vmul.bf16 %v7317_v2, %v357_v0  ;;  %v2333_v62 = vmul.bf16 %v7384_v47, %v7317_v2  ;;  %v2044_v8 = vmul.bf16 %v7055_v23, %v507_v48 }
  0x96   : > { %v1375_v11 = vpop.permute.xlu1 %1374  ;;  %v1363_v12 = vpop.permute.xlu0 %1362 }
  0x97   : > { %v7329_v14 = vcombine.low %v1544_v4, %v1545_v5  ;;  %5122 = vperm.xlu1 %6704, %v5068_v3   ;;  %5117 = vperm.xlu0 %6703, %v5067_v6   ;;  %v7335_v16 = vrot.slane %v1375_v11, %v7301_v56  ;;  %v7342_v21 = vrot.slane %v1363_v12, %v7301_v56  ;;  %v3635_v3 = vld [vmem:[%s7043_s18 + $0x54] sm:$0xf]  ;;  %v5080_v6 = vld [vmem:[%s9693_s4 + $0x88] sm:$0xff]  ;;  %v5079_v11 = vld [vmem:[%s9693_s4 + $0x80] sm:$0xff] }
  0x98   : > { %v869_v4 = vmul.bf16 %v507_v48, %v7391_v50  ;;  %v3634_v12 = vld [vmem:[%s7043_s18 + $0x50] sm:$0xf] }
  0x99   : > { %v1547_v28 = vmul.bf16 %v7335_v16, %v359_v18  ;;  %v1546_v30 = vmul.bf16 %v7342_v21, %v358_v24  ;;  %v7430_v18 = vcombine.low %v2332_v7, %v2333_v62  ;;  %v365_v24 = vld [vmem:[%s7043_s18 + $0x64] sm:$0xf]  ;;  %v1709_v7 = vshrl.u32 %v7329_v14, 16 }
  0x9a   : > { %v1399_v19 = vpop.permute.xlu1 %1398  ;;  %v1387_v20 = vpop.permute.xlu0 %1386  ;;  %v7435_v23 = vcombine.low %v868_v13, %v869_v4  ;;  %v5083_v62 = vld [vmem:[%s9693_s4 + $0xa0] sm:$0xff]  ;;  %v7494_v4 = vld [vmem:[%s7043_s18 + $0x5c] sm:$0xf]  ;;  %v3636_v13 = vld [vmem:[%s7043_s18 + $0x58] sm:$0xf] }
  0x9b   : > { %5132 = vperm.xlu1 %6704, %v5070_v15   ;;  %5127 = vperm.xlu0 %6703, %v5069_v17   ;;  %v7358_v34 = vrot.slane %v1399_v19, %v7301_v56  ;;  %v7361_v35 = vrot.slane %v1387_v20, %v7301_v56  ;;  %v7368_v38 = vcombine.low %v1546_v30, %v1547_v28 }
  0x9c   : > { %v2043_v17 = vmul.bf16 %v7052_v22, %v495_v57  ;;  %v4052_v19 = vmul.bf16 %v3635_v3, %v7317_v2  ;;  %v3763_v20 = vmul.bf16 %v7151_v54, %v507_v48  ;;  %v5082_v22 = vld [vmem:[%s9693_s4 + $0x98] sm:$0xff]  ;;  %v4051_v54 = vmul.bf16 %v3634_v12, %v7312_v61  ;;  %9787 = vst [vmem:[#allocation7_spill] sm:$0xff] %v7494_v4 }
  0x9d   : > { %v1549_v40 = vmul.bf16 %v7358_v34, %v361_v31  ;;  %v1548_v41 = vmul.bf16 %v7361_v35, %v360_v32  ;;  %v3762_v2 = vmul.bf16 %v7148_v53, %v495_v57  ;;  %v364_v31 = vld [vmem:[%s7043_s18 + $0x60] sm:$0xf]  ;;  %v7466_v53 = vld [vmem:[%s7043_s18 + $0x54] sm:$0xf]  ;;  %v7483_v57 = vld [vmem:[%s7043_s18 + $0x10] sm:$0xf] }
  0x9e   : > { %v7355_v33 = vpop.permute.xlu1 %522  ;;  %v7363_v36 = vpop.permute.xlu0 %510  ;;  %v7450_v30 = vcombine.low %v2043_v17, %v2044_v8  ;;  %9785 = vst [vmem:[#allocation5_spill] sm:$0xff] %v7466_v53  ;;  %v2496_v8 = vshrl.u32 %v7430_v18, 16  ;;  %v984_v12 = vshll.u32 %v7435_v23, 16 }
  0x9f   : > { %5142 = vperm.xlu1 %6704, %v5072_v27   ;;  %5137 = vperm.xlu0 %6703, %v5071_v29   ;;  %v7375_v42 = vcombine.low %v1548_v41, %v1549_v40  ;;  %v7461_v41 = vcombine.low %v4051_v54, %v4052_v19  ;;  %v7463_v61 = vcombine.low %v3762_v2, %v3763_v20 }
  0xa0   : > { %v2337_v54 = vmul.bf16 %v7494_v4, %v7358_v34 }
  0xa2   : > { %v1423_v44 = vpop.permute.xlu1 %1422  ;;  %v1411_v46 = vpop.permute.xlu0 %1410 }
  0xa3   : > { %5152 = vperm.xlu1 %6704, %v5074_v37   ;;  %5147 = vperm.xlu0 %6703, %v5073_v39   ;;  %v7403_v59 = vrot.slane %v1423_v44, %v7301_v56  ;;  %v7412_v0 = vrot.slane %v1411_v46, %v7301_v56  ;;  %v5081_v37 = vld [vmem:[%s9693_s4 + $0x90] sm:$0xff]  ;;  %v1705_v44 = vshll.u32 %v7329_v14, 16  ;;  %v981_v46 = vshrl.u32 %v7435_v23, 16 }
  0xa5   : > { %v1551_v58 = vmul.bf16 %v7403_v59, %v363_v51  ;;  %v1550_v15 = vmul.bf16 %v7412_v0, %v362_v63  ;;  %v2156_v51 = vshrl.u32 %v7450_v30, 16  ;;  %v2335_v63 = vmul.bf16 %v7466_v53, %v7335_v16  ;;  %v8302_v53 = vld [vmem:[%s7043_s18 + $0x3c] sm:$0xf] }
  0xa6   : > { %v1447_v1 = vpop.permute.xlu1 %1446  ;;  %v1435_v5 = vpop.permute.xlu0 %1434  ;;  %v7508_v17 = vrot.slane %v1705_v44, 1  ;;  %v7512_v20 = vrot.slane %v981_v46, 7  ;;  %v4053_v44 = vmul.bf16 %v3636_v13, %v7342_v21 }
  0xa7   : > { %5162 = vperm.xlu1 %6704, %v5076_v43   ;;  %5157 = vperm.xlu0 %6703, %v5075_v45   ;;  %v7437_v27 = vcombine.low %v1550_v15, %v1551_v58  ;;  %v7440_v28 = vrot.slane %v1447_v1, %v7301_v56  ;;  %v7443_v29 = vrot.slane %v1435_v5, %v7301_v56  ;;  %v7469_v43 = vld [vmem:[%s7043_s18 + $0x50] sm:$0xf]  ;;  %v2492_v45 = vshll.u32 %v7430_v18, 16  ;;  %v3637_v1 = vld [vmem:[%s7043_s18 + $0x5c] sm:$0xf] }
  0xa8   : > { %9786 = vst [vmem:[#allocation6_spill] sm:$0xff] %v7469_v43  ;;  %v2334_v3 = vmul.bf16 %v7469_v43, %v7342_v21  ;;  %v7497_v58 = vld [vmem:[%s7043_s18 + $0x58] sm:$0xf]  ;;  %9789 = vst [vmem:[#allocation9_spill] sm:$0xff] %v7508_v17  ;;  %v7518_v23 = vrot.slane %v2156_v51, 7  ;;  %v7542_v51 = vrot.slane %v7355_v33, %v7301_v56  ;;  %v986_v21 = vor.u32 %v984_v12, %v7512_v20  ;;  %v5088_v33 = vld [vmem:[%s9693_s4 + $0xc8] sm:$0xff] }
  0xa9   : > { %v1553_v39 = vmul.bf16 %v7440_v28, %v365_v24  ;;  %v1552_v48 = vmul.bf16 %v7443_v29, %v364_v31  ;;  %9788 = vst [vmem:[#allocation8_spill] sm:$0xff] %v7497_v58  ;;  %v7510_v19 = vrot.slane %v2492_v45, 1  ;;  %9791 = vst [vmem:[#allocation11_spill] sm:$0xff] %v7512_v20  ;;  %v3875_v24 = vshrl.u32 %v7463_v61, 16  ;;  %v5086_v18 = vld [vmem:[%s9693_s4 + $0xb8] sm:$0xff]  ;;  %v5085_v31 = vld [vmem:[%s9693_s4 + $0xb0] sm:$0xff] }
  0xaa   : > { %v7453_v32 = vpop.permute.xlu1 %546  ;;  %v7459_v40 = vpop.permute.xlu0 %534  ;;  %v2336_v2 = vmul.bf16 %v7497_v58, %v7361_v35  ;;  %v367_v45 = vld [vmem:[%s7043_s18 + $0x6c] sm:$0xf] }
  0xab   : > { %5172 = vperm.xlu1 %6704, %v5078_v49   ;;  %5167 = vperm.xlu0 %6703, %v5077_v52   ;;  %v5084_v49 = vld [vmem:[%s9693_s4 + $0xa8] sm:$0xff]  ;;  %v7480_v52 = vld [vmem:[%s7043_s18 + $0x14] sm:$0xf]  ;;  %9790 = vst [vmem:[#allocation10_spill] sm:$0xff] %v7510_v19 }
  0xae   : > { %v1471_v15 = vpop.permute.xlu1 %1470  ;;  %v1459_v14 = vpop.permute.xlu0 %1458 }
  0xaf   : > { %5182 = vperm.xlu1 %6704, %v5080_v6   ;;  %5177 = vperm.xlu0 %6703, %v5079_v11   ;;  %v7501_v6 = vcombine.low %v1552_v48, %v1553_v39  ;;  %v4211_v11 = vshll.u32 %v7461_v41, 16  ;;  %v7529_v39 = vcombine.low %v2334_v3, %v2335_v63  ;;  %v3639_v48 = vld [vmem:[%s7043_s18 + $0x64] sm:$0xf]  ;;  %v7552_v63 = vrot.slane %v3875_v24, 7 }
  0xb0   : > { %v1713_v3 = vshll.u32 %v7368_v38, 16  ;;  %v1126_v24 = vld [vmem:[#allocation2] sm:$0xff] }
  0xb1   : > { %v7536_v46 = vrot.slane %v4211_v11, 1  ;;  %v366_v11 = vld [vmem:[%s7043_s18 + $0x68] sm:$0xf] }
  0xb3   : > { %5192 = vperm.xlu1 %6704, %v5082_v22   ;;  %5187 = vperm.xlu0 %6703, %v5081_v37   ;;  %v2159_v22 = vshll.u32 %v7450_v30, 16  ;;  %v4054_v37 = vmul.bf16 %v3637_v1, %v7335_v16  ;;  %v7534_v30 = vrot.slane %v1471_v15, %v7301_v56  ;;  %9792 = vst [vmem:[#allocation12_spill] sm:$0xff] %v7536_v46  ;;  %v3878_v1 = vshll.u32 %v7463_v61, 16 }
  0xb4   : > { %v7546_v16 = vrot.slane %v7363_v36, %v7301_v56  ;;  %v1711_v36 = vor.u32 %v1709_v7, %v7508_v17  ;;  %v7562_v15 = vcombine.low %v2336_v2, %v2337_v54  ;;  %v1495_v2 = vpop.permute.xlu1 %1494 }
  0xb5   : > { %v2161_v13 = vor.u32 %v2159_v22, %v7518_v23  ;;  %v1555_v12 = vmul.bf16 %v7534_v30, %v367_v45  ;;  %v7575_v7 = vcombine.low %v4053_v44, %v4054_v37  ;;  %v4056_v22 = vmul.bf16 %v3639_v48, %v7358_v34 }
  0xb6   : > { %v2046_v45 = vmul.bf16 %v7480_v52, %v7542_v51  ;;  %v2045_v5 = vmul.bf16 %v7483_v57, %v7546_v16  ;;  %v3880_v37 = vor.u32 %v3878_v1, %v7552_v63  ;;  %v1715_v44 = vrot.slane %v1713_v3, 1 }
  0xb7   : > { %5202 = vperm.xlu1 %6704, %v5084_v49   ;;  %5197 = vperm.xlu0 %6703, %v5083_v62   ;;  %v3638_v49 = vld [vmem:[%s7043_s18 + $0x60] sm:$0xf]  ;;  %v7549_v62 = vrot.slane %v1459_v14, %v7301_v56  ;;  %v1721_v34 = vshll.u32 %v7375_v42, 16  ;;  %v1717_v48 = vshrl.u32 %v7368_v38, 16  ;;  %v7599_v1 = vrot.slane %v1495_v2, %v7301_v56  ;;  %v5089_v38 = vld [vmem:[%s9693_s4 + $0xd0] sm:$0xff] }
  0xb8   : > { %v5087_v14 = vld [vmem:[%s9693_s4 + $0xc0] sm:$0xff]  ;;  %v4055_v54 = vmul.bf16 %v3638_v49, %v7361_v35  ;;  %v7589_v35 = vsel %vm7567_vm9, %v986_v21, %v1126_v24  ;;  %v2508_v49 = vshll.u32 %v7562_v15, 16 }
  0xb9   : > { %v1554_v17 = vmul.bf16 %v7549_v62, %v366_v11  ;;  %9795 = vst [vmem:[#allocation13_spill] sm:$0xff] %v7589_v35  ;;  %v2299_v24 = vsel %vm7567_vm9, %v2161_v13, %v7589_v35  ;;  %v2504_v13 = vshrl.u32 %v7529_v39, 16  ;;  %v7619_v2 = vrot.slane %v1721_v34, 1  ;;  %v5091_v34 = vld [vmem:[%s9693_s4 + $0xe0] sm:$0xff]  ;;  %v1928_v35 = vld [vmem:[%s7043_s18 + $0x7c] sm:$0xf] }
  0xba   : > { %v7602_v21 = vcombine.low %v4055_v54, %v4056_v22  ;;  %v3764_v22 = vmul.bf16 %v7206_v10, %v7546_v16  ;;  %2863 = vmatmul.mubr.bf16.vlgmr.msra.gmra.mrb[0].mxu0 %v2299_v24  ;;  %v1719_v54 = vor.u32 %v1717_v48, %v1715_v44  ;;  %v4018_v20 = vsel %vm7567_vm9, %v3880_v37, %v2299_v24  ;;  %v6825_v10 = vld [vmem:[%s9690_s1 + $0x140] sm:$0xff]  }
  0xbb   : > { %5212 = vperm.xlu1 %6704, %v5086_v18   ;;  %5207 = vperm.xlu0 %6703, %v5085_v31   ;;  %v2500_v18 = vshll.u32 %v7529_v39, 16  ;;  %v2498_v31 = vor.u32 %v2496_v8, %v7510_v19  ;;  %v5090_v8 = vld [vmem:[%s9693_s4 + $0xd8] sm:$0xff]  ;;  %v7596_v11 = vcombine.low %v1554_v17, %v1555_v12  ;;  %v1483_v19 = vpop.permute.xlu0 %1482  ;;  %v4215_v17 = vshrl.u32 %v7461_v41, 16  ;;  %v368_v41 = vld [vmem:[%s7043_s18 + $0x70] sm:$0xf]  ;;  %4019 = vst [vmem:[#allocation2] sm:$0xff] %v4018_v20 }
  0xbc   : > { %v3765_v12 = vmul.bf16 %v7203_v9, %v7542_v51  ;;  %v9796_v9 = vcombine.low %v7483_v57, %v7480_v52  ;;  %6373 = vmatpush3.bf16.msra.mxu0 %v6825_v10  ;;  %v7634_v61 = vrot.slane %v1483_v19, %v7301_v56  ;;  %v5092_v52 = vld [vmem:[%s9693_s4 + $0xe8] sm:$0xff]  ;;  %v7646_v37 = vld [vmem:[%s7043_s18 + $0x64] sm:$0xf]  ;;  %v7658_v24 = vld [vmem:[%s7043_s18 + $0x60] sm:$0xf] }
  0xbd   : > { %v2502_v3 = vrot.slane %v2500_v18, 1  ;;  %v7614_v18 = vcombine.low %v2045_v5, %v2046_v45  ;;  %v7630_v5 = vrot.slane %v2508_v49, 1  ;;  %v7637_v45 = vsel %vm1640_vm8, %v1711_v36, %v1715_v44  ;;  %v6826_v57 = vld [vmem:[%s9690_s1 + $0x148] sm:$0xff]   ;;  %9798 = vst [vmem:[#allocation15_spill] sm:$0xff] %v7646_v37  ;;  %9799 = vst [vmem:[#allocation16_spill] sm:$0xff] %v7658_v24 }
  0xbe   : > { %2870 = vmatprep.mubr.bf16.mxu0 %v9796_v9  ;;  %9797 = vst [vmem:[#allocation14_spill] sm:$0xff] %v7637_v45  ;;  %6374 = vmatprep.subr.bf16.mxu0 %v6826_v57  ;;  %v4217_v36 = vor.u32 %v4215_v17, %v7536_v46  ;;  %v7655_v49 = vcombine.low %v3764_v22, %v3765_v12  ;;  %v3640_v17 = vld [vmem:[%s7043_s18 + $0x68] sm:$0xf] }
  0xbf   : > { %5222 = vperm.xlu1 %6704, %v5088_v33   ;;  %5217 = vperm.xlu0 %6703, %v5087_v14   ;;  %v4219_v33 = vshll.u32 %v7575_v7, 16  ;;  %v369_v14 = vld [vmem:[%s7043_s18 + $0x74] sm:$0xf]  ;;  %v2506_v20 = vor.u32 %v2504_v13, %v2502_v3  ;;  %v2503_v19 = vsel %vm1640_vm8, %v2498_v31, %v2502_v3  ;;  %v2163_v48 = vshrl.u32 %v7614_v18, 16  ;;  %v6747_v31 = vld [vmem:[%s9690_s1] sm:$0xff]  }
  0xc0   : > { %v1557_v39 = vmul.bf16 %v7599_v1, %v369_v14  ;;  %v1556_v14 = vmul.bf16 %v7634_v61, %v368_v41  ;;  %6404 = vmatprep.mubr.bf16.mxu1 %v2503_v19  ;;  %v7674_v22 = vsel %vm1640_vm8, %v1719_v54, %v7619_v2  ;;  %v5094_v41 = vld [vmem:[%s9693_s4 + $0xf8] sm:$0xff]  ;;  %v2339_v9 = vmul.bf16 %v7646_v37, %v7403_v59  ;;  %v5093_v54 = vld [vmem:[%s9693_s4 + $0xf0] sm:$0xff] }
  0xc1   : > { %v4221_v44 = vrot.slane %v4219_v33, 1  ;;  %v6749_v33 = vld [vmem:[%s9690_s1 + $0x48] sm:$0xff]   ;;  %9800 = vst [vmem:[#allocation17_spill] sm:$0xff] %v7674_v22  ;;  %v2511_v13 = vsel %vm1640_vm8, %v2506_v20, %v7630_v5  ;;  %v2338_v10 = vmul.bf16 %v7658_v24, %v7412_v0  ;;  %v7691_v20 = vrot.slane %v2163_v48, 7  ;;  %6375 = vmatpush3.bf16.msra.mxu0 %v6826_v57 }
  0xc2   : > { %v7670_v12 = vcombine.low %v1556_v14, %v1557_v39  ;;  %6405 = vmatmul.mubr.bf16.vlgmr.msra.gmra.mrb[0].mxu1 %v2511_v13  ;;  %v4223_v39 = vshrl.u32 %v7575_v7, 16  ;;  %v3882_v19 = vshrl.u32 %v7655_v49, 16  ;;  %v4057_v14 = vmul.bf16 %v3640_v17, %v7412_v0  ;;  %v6752_v7 = vld [vmem:[%s9690_s1 + $0x50] sm:$0xff]   ;;  %v7704_v48 = vld [vmem:[%s7043_s18 + $0x6c] sm:$0xf] }
  0xc3   : > { %5232 = vperm.xlu1 %6704, %v5090_v8   ;;  %5227 = vperm.xlu0 %6703, %v5089_v38   ;;  %v4227_v8 = vshll.u32 %v7602_v21, 16  ;;  %v4222_v3 = vsel %vm1640_vm8, %v4217_v36, %v4221_v44  ;;  %v3641_v38 = vld [vmem:[%s7043_s18 + $0x6c] sm:$0xf]  ;;  %9801 = vst [vmem:[#allocation18_spill] sm:$0xff] %v7704_v48  ;;  %v7715_v0 = vrot.slane %v7459_v40, %v7301_v56  ;;  %v1903_v17 = vld [vmem:[%s7043_s18 + $0x18] sm:$0xf] }
  0xc4   : > { %4298 = vst [vmem:[#allocation2 + $0xd0] sm:$0xff] %v4222_v3  ;;  %6101 = vmatpush3.bf16.msra.mxu1 %v6747_v31  ;;  %v6750_v36 = vld [vmem:[%s9690_s1 + $0x8] sm:$0xff]   ;;  %v4225_v57 = vor.u32 %v4223_v39, %v4221_v44  ;;  %v6827_v3 = vld [vmem:[%s9690_s1 + $0x150] sm:$0xff]   ;;  %v7726_v13 = vrot.slane %v3882_v19, 7  ;;  %v1725_v39 = vshrl.u32 %v7375_v42, 16  ;;  %v6828_v42 = vld [vmem:[%s9690_s1 + $0x158] sm:$0xff]  }
  0xc5   : > { %6102 = vmatprep.subr.bf16.mxu1 %v6749_v33  ;;  %v7707_v31 = vld [vmem:[%s7043_s18 + $0x68] sm:$0xf]  ;;  %6376 = vmatprep.subr.bf16.mxu0 %v6827_v3  ;;  %v7721_v33 = vcombine.low %v2338_v10, %v2339_v9  ;;  %v3642_v40 = vld [vmem:[%s7043_s18 + $0x70] sm:$0xf]  ;;  %v2341_v9 = vmul.bf16 %v7704_v48, %v7440_v28  ;;  %v2047_v22 = vmul.bf16 %v1903_v17, %v7715_v0  ;;  %v8198_v24 = vld [vmem:[%s7043_s18 + $0x2c] sm:$0xf] }
  0xc6   : > { %9802 = vst [vmem:[#allocation19_spill] sm:$0xff] %v7707_v31  ;;  %v2340_v10 = vmul.bf16 %v7707_v31, %v7443_v29  ;;  %6377 = vmatpush3.bf16.msra.mxu0 %v6827_v3  ;;  %v7751_v3 = vpop.permute.xlu1 %1518 }
  0xc7   : > { %5242 = vperm.xlu1 %6704, %v5092_v52   ;;  %5237 = vperm.xlu0 %6703, %v5091_v34   ;;  %v7689_v52 = vrot.slane %v4227_v8, 1  ;;  %v4058_v34 = vmul.bf16 %v3641_v38, %v7403_v59  ;;  %v2166_v8 = vshll.u32 %v7614_v18, 16  ;;  %v7711_v59 = vrot.slane %v7453_v32, %v7301_v56  ;;  %v1904_v38 = vld [vmem:[%s7043_s18 + $0x1c] sm:$0xf] }
  0xc8   : > { %v1729_v18 = vshll.u32 %v7437_v27, 16  ;;  %6103 = vmatpush3.bf16.msra.mxu1 %v6750_v36  ;;  %v5540_v19 = vcombine.low %v1903_v17, %v1904_v38  ;;  %6378 = vmatprep.subr.bf16.mxu0 %v6828_v42  ;;  %v2516_v46 = vshll.u32 %v7721_v33, 16  ;;  %v6759_v17 = vld [vmem:[%s9690_s1 + $0x60] sm:$0xff]  }
  0xc9   : > { %v2168_v32 = vor.u32 %v2166_v8, %v7691_v20  ;;  %v4230_v44 = vsel %vm1640_vm8, %v4225_v57, %v7689_v52  ;;  %6104 = vmatprep.subr.bf16.mxu1 %v6752_v7  ;;  %v3885_v8 = vshll.u32 %v7655_v49, 16  ;;  %v7741_v57 = vcombine.low %v4057_v14, %v4058_v34  ;;  %v7753_v49 = vpop.permute.xlu0 %1506  ;;  %v6757_v34 = vld [vmem:[%s9690_s1 + $0x58] sm:$0xff]  }
  0xca   : > { %4299 = vst [vmem:[#allocation2 + $0xe8] sm:$0xff] %v4230_v44  ;;  %v2048_v36 = vmul.bf16 %v1904_v38, %v7711_v59  ;;  %v1731_v45 = vrot.slane %v1729_v18, 1  ;;  %v4059_v7 = vmul.bf16 %v3642_v40, %v7443_v29  ;;  %v1727_v29 = vor.u32 %v1725_v39, %v7619_v2  ;;  %6379 = vmatpush3.bf16.msra.mxu0 %v6828_v42 }
  0xcb   : > { %5252 = vperm.xlu1 %6704, %v5094_v41   ;;  %5247 = vperm.xlu0 %6703, %v5093_v54   ;;  %v3643_v41 = vld [vmem:[%s7043_s18 + $0x74] sm:$0xf]  ;;  %v2169_v14 = vsel %vm265_vm1, %v7518_v23, %v2168_v32  ;;  %v3887_v38 = vor.u32 %v3885_v8, %v7726_v13  ;;  %v7765_v18 = vcombine.low %v2340_v10, %v2341_v9  ;;  %v2518_v40 = vrot.slane %v2516_v46, 1  ;;  %v6760_v46 = vld [vmem:[%s9690_s1 + $0x20] sm:$0xff]   ;;  %v7795_v8 = vld [vmem:[%s7043_s18 + $0x70] sm:$0xf] }
  0xcc   : > { %v6755_v54 = vld [vmem:[%s9690_s1 + $0x10] sm:$0xff]   ;;  %v4060_v44 = vmul.bf16 %v3643_v41, %v7440_v28  ;;  %v6758_v28 = vld [vmem:[%s9690_s1 + $0x18] sm:$0xff]   ;;  %2871 = vmatmul.mubr.bf16.gmra.mrb[4].mxu0 %v2169_v14  ;;  %v2512_v41 = vshrl.u32 %v7562_v15, 16  ;;  %v7771_v23 = vcombine.low %v2047_v22, %v2048_v36  ;;  %v4235_v2 = vshll.u32 %v7741_v57, 16  ;;  %9805 = vst [vmem:[#allocation22_spill] sm:$0xff] %v7795_v8 }
  0xcd   : > { %6105 = vmatpush3.bf16.msra.mxu1 %v6755_v54  ;;  %v3888_v32 = vsel %vm265_vm1, %v7552_v63, %v3887_v38  ;;  %2878 = vmatprep.mubr.bf16.mxu0 %v5540_v19  ;;  %v7779_v39 = vsel %vm1640_vm8, %v1727_v29, %v1731_v45  ;;  %v3767_v15 = vmul.bf16 %v7244_v25, %v7711_v59  ;;  %v7786_v9 = vld [vmem:[%s7043_s18 + $0x74] sm:$0xf]  ;;  %v1737_v10 = vshll.u32 %v7501_v6, 16  ;;  %v7797_v25 = vpop.permute.xlu1 %570  ;;  %v7799_v36 = vpop.permute.xlu0 %558 }
  0xce   : > { %v7776_v54 = vcombine.low %v4059_v7, %v4060_v44  ;;  %4020 = vst [vmem:[#allocation2 + $0x18] sm:$0xff] %v3888_v32  ;;  %9803 = vst [vmem:[#allocation20_spill] sm:$0xff] %v7779_v39  ;;  %6106 = vmatprep.subr.bf16.mxu1 %v6757_v34  ;;  %v3766_v22 = vmul.bf16 %v7247_v26, %v7715_v0  ;;  %v2514_v63 = vor.u32 %v2512_v41, %v7630_v5  ;;  %v6761_v26 = vld [vmem:[%s9690_s1 + $0x68] sm:$0xff]   ;;  %v6829_v5 = vld [vmem:[%s9690_s1 + $0x160] sm:$0xff]  }
  0xcf   : > { %9804 = vst [vmem:[#allocation21_spill] sm:$0xff] %v7786_v9  ;;  %v2524_v19 = vshll.u32 %v7765_v18, 16  ;;  %v2171_v44 = vshrl.u32 %v7771_v23, 16  ;;  %6380 = vmatprep.subr.bf16.mxu0 %v6829_v5  ;;  %v4231_v7 = vshrl.u32 %v7602_v21, 16  ;;  %v4237_v34 = vrot.slane %v4235_v2, 1  ;;  %v6762_v21 = vld [vmem:[%s9690_s1 + $0x28] sm:$0xff]  }
  0xd0   : > { %v4243_v14 = vshll.u32 %v7776_v54, 16  ;;  %v2519_v38 = vsel %vm1640_vm8, %v2514_v63, %v2518_v40  ;;  %v7812_v29 = vcombine.low %v3766_v22, %v3767_v15  ;;  %v2343_v42 = vmul.bf16 %v7786_v9, %v7534_v30  ;;  %v3644_v15 = vld [vmem:[%s7043_s18 + $0x78] sm:$0xf]  ;;  %v6763_v63 = vld [vmem:[%s9690_s1 + $0x70] sm:$0xff]   ;;  %6381 = vmatpush3.bf16.msra.mxu0 %v6829_v5 }
  0xd1   : > { %6107 = vmatpush3.bf16.msra.mxu1 %v6758_v28  ;;  %v1733_v28 = vshrl.u32 %v7437_v27, 16  ;;  %v2342_v41 = vmul.bf16 %v7795_v8, %v7549_v62  ;;  %6408 = vmatprep.mubr.bf16.mxu1 %v2519_v38  ;;  %v2520_v32 = vshrl.u32 %v7721_v33, 16  ;;  %v7823_v27 = vrot.slane %v1737_v10, 1  ;;  %v1927_v8 = vld [vmem:[%s7043_s18 + $0x78] sm:$0xf]  ;;  %v7840_v9 = vpop.permute.xlu1 %594  ;;  %v6766_v5 = vld [vmem:[%s9690_s1 + $0x30] sm:$0xff]  }
  0xd2   : > { %6108 = vmatprep.subr.bf16.mxu1 %v6759_v17  ;;  %v3645_v17 = vld [vmem:[%s7043_s18 + $0x7c] sm:$0xf]  ;;  %v7825_v2 = vrot.slane %v2524_v19, 1  ;;  %v4233_v22 = vor.u32 %v4231_v7, %v7689_v52  ;;  %v7833_v39 = vrot.slane %v2171_v44, 7  ;;  %v7837_v10 = vrot.slane %v4243_v14, 1  ;;  %v7842_v52 = vpop.permute.xlu0 %582 }
  0xd3   : > { %v1735_v38 = vor.u32 %v1733_v28, %v1731_v45  ;;  %v2522_v33 = vor.u32 %v2520_v32, %v2518_v40  ;;  %v2174_v19 = vshll.u32 %v7771_v23, 16  ;;  %v6830_v45 = vld [vmem:[%s9690_s1 + $0x168] sm:$0xff]   ;;  %v4062_v40 = vmul.bf16 %v3645_v17, %v7534_v30  ;;  %v7878_v32 = vld [vmem:[%s7043_s18 + $0x84] sm:$0xf] }
  0xd4   : > { %6382 = vmatprep.subr.bf16.mxu0 %v6830_v45  ;;  %v7850_v44 = vcombine.low %v2342_v41, %v2343_v42  ;;  %v4061_v23 = vmul.bf16 %v3644_v15, %v7549_v62  ;;  %v2345_v7 = vmul.bf16 %v1928_v35, %v7599_v1  ;;  %v2344_v14 = vmul.bf16 %v1927_v8, %v7634_v61  ;;  %v6767_v62 = vld [vmem:[%s9690_s1 + $0x78] sm:$0xff]   ;;  %v7869_v35 = vld [vmem:[%s7043_s18 + $0x24] sm:$0xf]  ;;  %v7872_v8 = vld [vmem:[%s7043_s18 + $0x20] sm:$0xf] }
  0xd5   : > { %6109 = vmatpush3.bf16.msra.mxu1 %v6760_v46  ;;  %v4239_v46 = vshrl.u32 %v7741_v57, 16  ;;  %v3890_v57 = vshrl.u32 %v7812_v29, 16  ;;  %v7860_v28 = vsel %vm1640_vm8, %v1735_v38, %v7823_v27  ;;  %v2527_v30 = vsel %vm1640_vm8, %v2522_v33, %v7825_v2  ;;  %6383 = vmatpush3.bf16.msra.mxu0 %v6830_v45  ;;  %9807 = vst [vmem:[#allocation24_spill] sm:$0xff] %v7878_v32  ;;  %v7893_v33 = vld [vmem:[%s7043_s18 + $0x80] sm:$0xf] }
  0xd6   : > { %6110 = vmatprep.subr.bf16.mxu1 %v6761_v26  ;;  %v4238_v26 = vsel %vm1640_vm8, %v4233_v22, %v4237_v34  ;;  %9806 = vst [vmem:[#allocation23_spill] sm:$0xff] %v7860_v28  ;;  %v2176_v42 = vor.u32 %v2174_v19, %v7833_v39  ;;  %6409 = vmatmul.mubr.bf16.gmra.mrb[4].mxu1 %v2527_v30  ;;  %v1745_v41 = vshll.u32 %v7596_v11, 16  ;;  %v2532_v38 = vshll.u32 %v7850_v44, 16  ;;  %v7895_v19 = vpop.permute.xlu1 %618  ;;  %v7902_v45 = vld [vmem:[%s9690_s1 + $0x80] sm:$0xff]   ;;  %v371_v30 = vld [vmem:[%s7043_s18 + $0x7c] sm:$0xf] }
  0xd7   : > { %4300 = vst [vmem:[#allocation2 + $0x100] sm:$0xff] %v4238_v26  ;;  %v4241_v17 = vor.u32 %v4239_v46, %v4237_v34  ;;  %v5541_v15 = vcombine.low %v7872_v8, %v7869_v35  ;;  %v6768_v34 = vld [vmem:[%s9690_s1 + $0x38] sm:$0xff]   ;;  %v7890_v46 = vcombine.low %v2344_v14, %v2345_v7  ;;  %9808 = vst [vmem:[#allocation25_spill] sm:$0xff] %v7893_v33  ;;  %v7897_v26 = vpop.permute.xlu0 %606  ;;  %v4247_v7 = vshrl.u32 %v7776_v54, 16 }
  0xd8   : > { %9809 = vst [vmem:[#allocation26_spill] sm:$0xff] %v7902_v45  ;;  %v3893_v14 = vshll.u32 %v7812_v29, 16  ;;  %v4063_v54 = vmul.bf16 %v7893_v33, %v7634_v61  ;;  %v370_v29 = vld [vmem:[%s7043_s18 + $0x78] sm:$0xf]  ;;  %v1753_v28 = vshll.u32 %v7670_v12, 16 }
  0xd9   : > { %6111 = vmatpush3.bf16.msra.mxu1 %v6762_v21  ;;  %v7875_v21 = vcombine.low %v4061_v23, %v4062_v40  ;;  %v4246_v22 = vsel %vm1640_vm8, %v4241_v17, %v7837_v10  ;;  %v2528_v40 = vshrl.u32 %v7765_v18, 16  ;;  %v2177_v23 = vsel %vm265_vm1, %v7691_v20, %v2176_v42 }
  0xda   : > { %6112 = vmatprep.subr.bf16.mxu1 %v6763_v63  ;;  %v7887_v63 = vrot.slane %v3890_v57, 7  ;;  %4301 = vst [vmem:[#allocation2 + $0x118] sm:$0xff] %v4246_v22  ;;  %v1741_v57 = vshrl.u32 %v7501_v6, 16  ;;  %v7916_v6 = vrot.slane %v7751_v3, %v7301_v56  ;;  %v1515_v18 = vrot.slane %v7753_v49, %v7301_v56  ;;  %2879 = vmatmul.mubr.bf16.gmra.mrb[8].mxu0 %v2177_v23  ;;  %v1929_v22 = vld [vmem:[%s7043_s18 + $0x80] sm:$0xf]  ;;  %v7941_v33 = vpop.permute.xlu1 %642 }
  0xdb   : > { %v1747_v20 = vrot.slane %v1745_v41, 1  ;;  %v4251_v42 = vshll.u32 %v7875_v21, 16  ;;  %v4064_v17 = vmul.bf16 %v7878_v32, %v7599_v1  ;;  %2886 = vmatprep.mubr.bf16.mxu0 %v5541_v15  ;;  %v2534_v3 = vrot.slane %v2532_v38, 1 }
  0xdc   : > { %v2540_v31 = vshll.u32 %v7890_v46, 16  ;;  %v3895_v49 = vor.u32 %v3893_v14, %v7887_v63  ;;  %v1743_v1 = vor.u32 %v1741_v57, %v7823_v27  ;;  %v2530_v61 = vor.u32 %v2528_v40, %v7825_v2  ;;  %v7943_v27 = vpop.permute.xlu0 %630  ;;  %v7951_v40 = vld [vmem:[%s7043_s18 + $0x88] sm:$0xf] }
  0xdd   : > { %6113 = vmatpush3.bf16.msra.mxu1 %v6766_v5  ;;  %v6831_v5 = vld [vmem:[%s9690_s1 + $0x170] sm:$0xff]   ;;  %v1749_v41 = vshrl.u32 %v7596_v11, 16  ;;  %v2536_v15 = vshrl.u32 %v7850_v44, 16  ;;  %v1559_v38 = vmul.bf16 %v7916_v6, %v371_v30  ;;  %v2346_v14 = vmul.bf16 %v1929_v22, %v1515_v18  ;;  %v7948_v44 = vld [vmem:[%s7043_s18 + $0x8c] sm:$0xf]  ;;  %9811 = vst [vmem:[#allocation28_spill] sm:$0xff] %v7951_v40 }
  0xde   : > { %6114 = vmatprep.subr.bf16.mxu1 %v6767_v62  ;;  %6384 = vmatprep.subr.bf16.mxu0 %v6831_v5  ;;  %v1930_v62 = vld [vmem:[%s7043_s18 + $0x84] sm:$0xf]  ;;  %v4253_v57 = vrot.slane %v4251_v42, 1  ;;  %v7945_v11 = vcombine.low %v4063_v54, %v4064_v17  ;;  %9810 = vst [vmem:[#allocation27_spill] sm:$0xff] %v7948_v44  ;;  %v3896_v32 = vsel %vm265_vm1, %v7726_v13, %v3895_v49  ;;  %v7975_v22 = vpop.permute.xlu1 %666 }
  0xdf   : > { %6385 = vmatpush3.bf16.msra.mxu0 %v6831_v5  ;;  %v2347_v23 = vmul.bf16 %v1930_v62, %v7916_v6  ;;  %v1558_v5 = vmul.bf16 %v1515_v18, %v370_v29  ;;  %v1751_v2 = vor.u32 %v1749_v41, %v1747_v20  ;;  %v2538_v30 = vor.u32 %v2536_v15, %v2534_v3 }
  0xe0   : > { %v2542_v62 = vrot.slane %v2540_v31, 1  ;;  %4021 = vst [vmem:[#allocation2 + $0x30] sm:$0xff] %v3896_v32  ;;  %v7956_v29 = vsel %vm1640_vm8, %v1743_v1, %v1747_v20  ;;  %v7960_v42 = vrot.slane %v7797_v25, %v7301_v56  ;;  %v7964_v17 = vrot.slane %v7799_v36, %v7301_v56 }
  0xe1   : > { %6115 = vmatpush3.bf16.msra.mxu1 %v6768_v34  ;;  %v6832_v34 = vld [vmem:[%s9690_s1 + $0x178] sm:$0xff]   ;;  %9812 = vst [vmem:[#allocation29_spill] sm:$0xff] %v7956_v29  ;;  %v2535_v54 = vsel %vm1640_vm8, %v2530_v61, %v2534_v3  ;;  %v4249_v13 = vor.u32 %v4247_v7, %v7837_v10  ;;  %v4066_v31 = vmul.bf16 %v7948_v44, %v7916_v6  ;;  %v4259_v25 = vshll.u32 %v7945_v11, 16  ;;  %v7977_v3 = vpop.permute.xlu0 %654 }
  0xe2   : > { %6420 = vmatprep.subr.bf16.mxu1 %v7902_v45  ;;  %6386 = vmatprep.subr.bf16.mxu0 %v6832_v34  ;;  %v1755_v45 = vrot.slane %v1753_v28, 1  ;;  %v5537_v28 = vcombine.low %v1558_v5, %v1559_v38  ;;  %v7970_v32 = vcombine.low %v2346_v14, %v2347_v23  ;;  %v4065_v20 = vmul.bf16 %v7951_v40, %v1515_v18  ;;  %v7993_v38 = vld [vmem:[%s7043_s18 + $0x2c] sm:$0xf]  ;;  %v7998_v23 = vld [vmem:[%s7043_s18 + $0x28] sm:$0xf] }
  0xe3   : > { %6387 = vmatpush3.bf16.msra.mxu0 %v6832_v34  ;;  %6412 = vmatprep.mubr.bf16.mxu1 %v2535_v54  ;;  %v4254_v36 = vsel %vm1640_vm8, %v4249_v13, %v4253_v57  ;;  %v2543_v7 = vsel %vm1640_vm8, %v2538_v30, %v2542_v62  ;;  %v2050_v6 = vmul.bf16 %v7869_v35, %v7960_v42  ;;  %v4255_v41 = vshrl.u32 %v7875_v21, 16  ;;  %v7990_v34 = vld [vmem:[%s7043_s18 + $0xc] sm:$0xf]  ;;  %v8016_v13 = vld [vmem:[%s7043_s18 + $0x28] sm:$0xf] }
  0xe4   : > { %4302 = vst [vmem:[#allocation2 + $0x130] sm:$0xff] %v4254_v36  ;;  %v7980_v10 = vsel %vm1640_vm8, %v1751_v2, %v1755_v45  ;;  %v2049_v18 = vmul.bf16 %v7872_v8, %v7964_v17  ;;  %6413 = vmatmul.mubr.bf16.gmra.mrb[8].mxu1 %v2543_v7  ;;  %v1761_v49 = vshll.u32 %v5537_v28, 16  ;;  %v2548_v1 = vshll.u32 %v7970_v32, 16  ;;  %9814 = vst [vmem:[#allocation31_spill] sm:$0xff] %v7993_v38  ;;  %v8013_v54 = vld [vmem:[%s7043_s18 + $0x2c] sm:$0xf]  ;;  %v8021_v7 = vpop.permute.xlu1 %690 }
  0xe5   : > { %9813 = vst [vmem:[#allocation30_spill] sm:$0xff] %v7980_v10  ;;  %v5729_v61 = vcombine.low %v4065_v20, %v4066_v31  ;;  %v4261_v15 = vrot.slane %v4259_v25, 1  ;;  %v3769_v35 = vmul.bf16 %v7993_v38, %v7960_v42  ;;  %9815 = vst [vmem:[#allocation32_spill] sm:$0xff] %v7998_v23  ;;  %v3768_v8 = vmul.bf16 %v7998_v23, %v7964_v17  ;;  %v8019_v20 = vld [vmem:[%s7043_s18 + $0x8] sm:$0xf] }
  0xe6   : > { %v8004_v5 = vrot.slane %v7840_v9, %v7301_v56  ;;  %v8008_v21 = vrot.slane %v7842_v52, %v7301_v56  ;;  %v1757_v14 = vshrl.u32 %v7670_v12, 16  ;;  %v2544_v2 = vshrl.u32 %v7890_v46, 16  ;;  %v8023_v52 = vpop.permute.xlu0 %678 }
  0xe7   : > { %v5557_v30 = vcombine.low %v2049_v18, %v2050_v6  ;;  %v4257_v31 = vor.u32 %v4255_v41, %v4253_v57  ;;  %v1763_v25 = vrot.slane %v1761_v49, 1  ;;  %v2550_v36 = vrot.slane %v2548_v1, 1 }
  0xe8   : > { %v4267_v9 = vshll.u32 %v5729_v61, 16  ;;  %v1759_v10 = vor.u32 %v1757_v14, %v1755_v45  ;;  %v2546_v12 = vor.u32 %v2544_v2, %v2542_v62  ;;  %v1765_v6 = vshrl.u32 %v5537_v28, 16  ;;  %v8038_v14 = vld [vmem:[%s7043_s18 + $0x14] sm:$0xf] }
  0xe9   : > { %v4262_v46 = vsel %vm1640_vm8, %v4257_v31, %v4261_v15  ;;  %v8026_v18 = vcombine.low %v3768_v8, %v3769_v35  ;;  %v2052_v57 = vmul.bf16 %v8013_v54, %v8004_v5  ;;  %v2051_v49 = vmul.bf16 %v8016_v13, %v8008_v21  ;;  %v8045_v31 = vld [vmem:[%s7043_s18 + $0x10] sm:$0xf] }
  0xea   : > { %4303 = vst [vmem:[#allocation2 + $0x148] sm:$0xff] %v4262_v46  ;;  %v871_v1 = vmul.bf16 %v7542_v51, %v7990_v34  ;;  %v870_v45 = vmul.bf16 %v7546_v16, %v8019_v20  ;;  %v4263_v62 = vshrl.u32 %v7945_v11, 16  ;;  %v2179_v41 = vshrl.u32 %v5557_v30, 16  ;;  %v1800_v11 = vld [vmem:[#allocation2 + $0x178] sm:$0xff] }
  0xeb   : > { %v1767_v28 = vor.u32 %v1765_v6, %v1763_v25  ;;  %v4269_v35 = vrot.slane %v4267_v9, 1  ;;  %v8041_v8 = vsel %vm1640_vm8, %v1759_v10, %v1763_v25  ;;  %v2551_v2 = vsel %vm1640_vm8, %v2546_v12, %v2550_v36  ;;  %v8057_v10 = vpop.permute.xlu1 %714  ;;  %v8059_v25 = vpop.permute.xlu0 %702  ;;  %v8132_v51 = vld [vmem:[%s7043_s18 + $0x18] sm:$0xf] }
  0xec   : > { %9816 = vst [vmem:[#allocation33_spill] sm:$0xff] %v8041_v8  ;;  %v2552_v16 = vshrl.u32 %v7970_v32, 16  ;;  %6416 = vmatprep.mubr.bf16.mxu1 %v2551_v2  ;;  %v3898_v46 = vshrl.u32 %v8026_v18, 16  ;;  %v8055_v9 = vcombine.low %v2051_v49, %v2052_v57  ;;  %v4265_v12 = vor.u32 %v4263_v62, %v4261_v15  ;;  %v6800_v15 = vld [vmem:[%s9690_s1 + $0x1c0] sm:$0xff]  }
  0xed   : > { %v8061_v6 = vcombine.low %v870_v45, %v871_v1  ;;  %v4271_v29 = vshrl.u32 %v5729_v61, 16  ;;  %v8063_v23 = vrot.slane %v2179_v41, 7  ;;  %v873_v32 = vmul.bf16 %v7711_v59, %v8038_v14  ;;  %v8088_v41 = vld [vmem:[%s7043_s18 + $0x30] sm:$0xf]  ;;  %6236 = vmatprep.subr.bf16.mxu0 %v6800_v15 }
  0xee   : > { %v2554_v8 = vor.u32 %v2552_v16, %v2550_v36  ;;  %v872_v57 = vmul.bf16 %v7715_v0, %v8045_v31  ;;  %v4270_v49 = vsel %vm1640_vm8, %v4265_v12, %v4269_v35  ;;  %v8072_v2 = vsel %vm8049_vm10, %v1767_v28, %v1800_v11  ;;  %v8082_v0 = vld [vmem:[%s7043_s18 + $0x34] sm:$0xf]  ;;  %9821 = vst [vmem:[#allocation36_spill] sm:$0xff] %v8088_v41 }
  0xef   : > { %9819 = vst [vmem:[#allocation34_spill] sm:$0xff] %v8072_v2  ;;  %v5490_v61 = vcombine.low %v7406_v60, %v7391_v50  ;;  %v4273_v36 = vor.u32 %v4271_v29, %v4269_v35  ;;  %v2182_v1 = vshll.u32 %v5557_v30, 16  ;;  %4304 = vst [vmem:[#allocation2 + $0x160] sm:$0xff] %v4270_v49  ;;  %v8079_v59 = vrot.slane %v3898_v46, 7  ;;  %v8108_v11 = vld [vmem:[%s7043_s18 + $0x34] sm:$0xf]  ;;  %v8115_v12 = vpop.permute.xlu0 %726 }
  0xf0   : > { %9820 = vst [vmem:[#allocation35_spill] sm:$0xff] %v8082_v0  ;;  %v3771_v45 = vmul.bf16 %v8082_v0, %v8004_v5  ;;  %v2187_v62 = vshrl.u32 %v8055_v9, 16  ;;  %v3770_v28 = vmul.bf16 %v8088_v41, %v8008_v21  ;;  %v8095_v60 = vrot.slane %v7895_v19, %v7301_v56  ;;  %v8111_v46 = vld [vmem:[%s7043_s18 + $0x30] sm:$0xf]  ;;  %v8113_v19 = vpop.permute.xlu1 %738  ;;  %v9828_v0 = vld [vmem:[#allocation26_spill] sm:$0xff] }
  0xf1   : > { %v2184_v50 = vor.u32 %v2182_v1, %v8063_v23  ;;  %v8099_v29 = vrot.slane %v7897_v26, %v7301_v56  ;;  %v2587_v30 = vsel %vm8049_vm10, %v2554_v8, %v8072_v2  ;;  %v988_v35 = vshrl.u32 %v8061_v6, 16  ;;  %v8129_v1 = vld [vmem:[%s7043_s18 + $0x1c] sm:$0xf] }
  0xf2   : > { %v8105_v16 = vcombine.low %v872_v57, %v873_v32  ;;  %6417 = vmatmul.mubr.bf16.gmra.mrb[12].mxu1 %v2587_v30  ;;  %v4306_v26 = vsel %vm8049_vm10, %v4273_v36, %v2587_v30  ;;  %v3901_v32 = vshll.u32 %v8026_v18, 16  ;;  %v5542_v57 = vcombine.low %v8016_v13, %v8013_v54  ;;  %v8141_v13 = vld [vmem:[%s7043_s18 + $0x3c] sm:$0xf]  ;;  %v8146_v30 = vld [vmem:[%s7043_s18 + $0x38] sm:$0xf] }
  0xf3   : > { %4307 = vst [vmem:[#allocation2 + $0x178] sm:$0xff] %v4306_v26  ;;  %3328 = vmatprep.mubr.bf16.mxu1 %v5490_v61  ;;  %v8134_v36 = vrot.slane %v2187_v62, 7  ;;  %v8136_v18 = vcombine.low %v3770_v28, %v3771_v45  ;;  %v2054_v54 = vmul.bf16 %v8108_v11, %v8095_v60  ;;  %9822 = vst [vmem:[#allocation37_spill] sm:$0xff] %v8141_v13  ;;  %v8151_v62 = vrot.slane %v988_v35, 7  ;;  %v6776_v28 = vld [vmem:[%s9690_s1 + $0x88] sm:$0xff]  }
  0xf4   : > { %v2053_v61 = vmul.bf16 %v8111_v46, %v8099_v29  ;;  %9823 = vst [vmem:[#allocation38_spill] sm:$0xff] %v8146_v30  ;;  %v2185_v26 = vsel %vm265_vm1, %v7833_v39, %v2184_v50  ;;  %v3903_v15 = vor.u32 %v3901_v32, %v8079_v59  ;;  %v996_v8 = vshrl.u32 %v8105_v16, 16  ;;  %v8163_v39 = vld [vmem:[%s7043_s18 + $0x24] sm:$0xf]  ;;  %v8166_v50 = vld [vmem:[%s7043_s18 + $0x20] sm:$0xf]  ;;  %v8178_v45 = vpop.permute.xlu1 %762 }
  0xf5   : > { %2887 = vmatmul.mubr.bf16.gmra.mrb[12].mxu0 %v2185_v26  ;;  %v875_v2 = vmul.bf16 %v7960_v42, %v8129_v1  ;;  %v874_v41 = vmul.bf16 %v7964_v17, %v8132_v51  ;;  %v2190_v35 = vshll.u32 %v8055_v9, 16  ;;  %v5491_v26 = vcombine.low %v8019_v20, %v7990_v34  ;;  %v8180_v9 = vpop.permute.xlu0 %750  ;;  %v8201_v34 = vld [vmem:[%s7043_s18 + $0x28] sm:$0xf] }
  0xf6   : > { %v3904_v32 = vsel %vm265_vm1, %v7887_v63, %v3903_v15  ;;  %2894 = vmatprep.mubr.bf16.mxu0 %v5542_v57  ;;  %v3906_v42 = vshrl.u32 %v8136_v18, 16  ;;  %v3773_v17 = vmul.bf16 %v8141_v13, %v8095_v60  ;;  %v3772_v49 = vmul.bf16 %v8146_v30, %v8099_v29  ;;  %v8214_v57 = vld [vmem:[%s7043_s18 + $0x38] sm:$0xf] }
  0xf7   : > { %4022 = vst [vmem:[#allocation2 + $0x48] sm:$0xff] %v3904_v32  ;;  %v991_v63 = vshll.u32 %v8061_v6, 16  ;;  %v2192_v20 = vor.u32 %v2190_v35, %v8134_v36  ;;  %v8186_v48 = vcombine.low %v2053_v61, %v2054_v54  ;;  %v8191_v32 = vrot.slane %v996_v8, 7  ;;  %v9827_v61 = vld [vmem:[#allocation13_spill] sm:$0xff] }
  0xf8   : > { %v877_v37 = vmul.bf16 %v8004_v5, %v8163_v39  ;;  %v876_v6 = vmul.bf16 %v8008_v21, %v8166_v50  ;;  %v5543_v54 = vcombine.low %v8111_v46, %v8108_v11  ;;  %v999_v35 = vshll.u32 %v8105_v16, 16  ;;  %v8211_v21 = vld [vmem:[%s7043_s18 + $0x3c] sm:$0xf]  ;;  %v8235_v16 = vld [vmem:[%s7043_s18 + $0x40] sm:$0xf]  ;;  %v8259_v4 = vpop.permute.xlu1 %786 }
  0xf9   : > { %v993_v8 = vor.u32 %v991_v63, %v8151_v62  ;;  %v8208_v5 = vcombine.low %v874_v41, %v875_v2  ;;  %v5492_v15 = vcombine.low %v8045_v31, %v8038_v14  ;;  %v8219_v11 = vrot.slane %v3906_v42, 7  ;;  %v8232_v41 = vld [vmem:[%s7043_s18 + $0x44] sm:$0xf]  ;;  %v6781_v14 = vld [vmem:[%s9690_s1 + $0x90] sm:$0xff]  }
  0xfa   : > { %3329 = vmatmul.mubr.bf16.vlgmr.msra.gmra.mrb[16].mxu1 %v9827_v61  ;;  %v8221_v46 = vcombine.low %v3772_v49, %v3773_v17  ;;  %v8225_v63 = vrot.slane %v7941_v33, %v7301_v56  ;;  %v8229_v2 = vrot.slane %v7943_v27, %v7301_v56  ;;  %v2195_v31 = vshrl.u32 %v8186_v48, 16  ;;  %v8245_v49 = vld [vmem:[%s7043_s18 + $0x30] sm:$0xf]  ;;  %v8261_v33 = vpop.permute.xlu0 %774 }
  0xfb   : > { %6421 = vmatpush3.bf16.msra.mxu1 %v9828_v0  ;;  %3336 = vmatprep.mubr.bf16.mxu1 %v5491_v26  ;;  %v8242_v0 = vld [vmem:[%s7043_s18 + $0x34] sm:$0xf]  ;;  %v2193_v42 = vsel %vm265_vm1, %v8063_v23, %v2192_v20  ;;  %v1001_v26 = vor.u32 %v999_v35, %v8191_v32  ;;  %v8254_v17 = vcombine.low %v876_v6, %v877_v37  ;;  %v3909_v61 = vshll.u32 %v8136_v18, 16  ;;  %v9829_v23 = vld [vmem:[#allocation11_spill] sm:$0xff] }
  0xfc   : > { %6422 = vmatprep.subr.bf16.mxu1 %v6776_v28  ;;  %v1004_v27 = vshrl.u32 %v8208_v5, 16  ;;  %v994_v20 = vsel %vm265_vm1, %v9829_v23, %v993_v8  ;;  %v879_v37 = vmul.bf16 %v8095_v60, %v8198_v24  ;;  %v878_v6 = vmul.bf16 %v8099_v29, %v8201_v34  ;;  %v8279_v23 = vld [vmem:[%s7043_s18 + $0x40] sm:$0xf]  ;;  %v6786_v29 = vld [vmem:[%s9690_s1 + $0x98] sm:$0xff]  }
  0xfd   : > { %2895 = vmatmul.mubr.bf16.gmra.mrb[16].mxu0 %v2193_v42  ;;  %v3914_v18 = vshrl.u32 %v8221_v46, 16  ;;  %v881_v35 = vmul.bf16 %v8225_v63, %v8242_v0  ;;  %v8274_v42 = vld [vmem:[%s7043_s18 + $0x44] sm:$0xf]  ;;  %v880_v8 = vmul.bf16 %v8229_v2, %v8245_v49  ;;  %9831 = vst [vmem:[#allocation26_spill] sm:$0xff] %v8279_v23  ;;  %v3911_v60 = vor.u32 %v3909_v61, %v8219_v11 }
  0xfe   : > { %2902 = vmatprep.mubr.bf16.mxu0 %v5543_v54  ;;  %9830 = vst [vmem:[#allocation13_spill] sm:$0xff] %v8274_v42  ;;  %v8286_v54 = vrot.slane %v2195_v31, 7  ;;  %v8290_v38 = vrot.slane %v7975_v22, %v7301_v56  ;;  %v8294_v58 = vrot.slane %v7977_v3, %v7301_v56  ;;  %v1012_v40 = vshrl.u32 %v8254_v17, 16 }
  0xff   : > { %6423 = vmatpush3.bf16.msra.mxu1 %v6776_v28  ;;  %v1007_v28 = vshll.u32 %v8208_v5, 16  ;;  %v2056_v61 = vmul.bf16 %v8211_v21, %v8225_v63  ;;  %v2055_v44 = vmul.bf16 %v8214_v57, %v8229_v2  ;;  %v8305_v5 = vld [vmem:[%s7043_s18 + $0x38] sm:$0xf]  ;;  %v3912_v22 = vsel %vm265_vm1, %v8079_v59, %v3911_v60 }
 0x100   : > { %6424 = vmatprep.subr.bf16.mxu1 %v6781_v14  ;;  %v8309_v31 = vcombine.low %v878_v6, %v879_v37  ;;  %v2198_v3 = vshll.u32 %v8186_v48, 16  ;;  %v3775_v43 = vmul.bf16 %v8274_v42, %v8225_v63  ;;  %v3774_v47 = vmul.bf16 %v8279_v23, %v8229_v2  ;;  %4023 = vst [vmem:[#allocation2 + $0x60] sm:$0xff] %v3912_v22  ;;  %v8323_v48 = vpop.permute.xlu1 %810  ;;  %v8325_v6 = vpop.permute.xlu0 %798  ;;  %v6791_v63 = vld [vmem:[%s9690_s1 + $0xa0] sm:$0xff]  }
 0x101   : > { %v8316_v55 = vrot.slane %v1004_v27, 7  ;;  %v1015_v59 = vshll.u32 %v8254_v17, 16  ;;  %v8321_v37 = vcombine.low %v880_v8, %v881_v35  ;;  %9832 = vst [vmem:[#allocation11_spill] sm:$0xff] %v8323_v48  ;;  %9833 = vst [vmem:[#allocation39_spill] sm:$0xff] %v8325_v6  ;;  %v883_v2 = vmul.bf16 %v8290_v38, %v8302_v53  ;;  %v8339_v17 = vld [vmem:[%s7043_s18 + $0x48] sm:$0xf] }
 0x102   : > { %3337 = vmatmul.mubr.bf16.gmra.mrb[20].mxu1 %v994_v20  ;;  %v8319_v20 = vrot.slane %v3914_v18, 7  ;;  %v882_v27 = vmul.bf16 %v8294_v58, %v8305_v5  ;;  %9835 = vst [vmem:[#allocation41_spill] sm:$0xff] %v8339_v17  ;;  %v5687_v18 = vcombine.low %v8146_v30, %v8141_v13  ;;  %v8343_v35 = vrot.slane %v1012_v40, 7 }
 0x103   : > { %3344 = vmatprep.mubr.bf16.mxu1 %v5492_v15  ;;  %6425 = vmatpush3.bf16.msra.mxu1 %v6781_v14  ;;  %v2200_v15 = vor.u32 %v2198_v3, %v8286_v54  ;;  %v8334_v14 = vld [vmem:[%s7043_s18 + $0x4c] sm:$0xf]  ;;  %v8345_v8 = vcombine.low %v2055_v44, %v2056_v61  ;;  %v8349_v60 = vrot.slane %v8021_v7, %v7301_v56  ;;  %v1020_v3 = vshrl.u32 %v8309_v31, 16  ;;  %v8380_v61 = vld [vmem:[%s7043_s18 + $0x44] sm:$0xf] }
 0x104   : > { %6426 = vmatprep.subr.bf16.mxu1 %v6786_v29  ;;  %9834 = vst [vmem:[#allocation40_spill] sm:$0xff] %v8334_v14  ;;  %v8353_v22 = vrot.slane %v8023_v52, %v7301_v56  ;;  %v3917_v6 = vshll.u32 %v8221_v46, 16  ;;  %v8357_v48 = vcombine.low %v3774_v47, %v3775_v43  ;;  %v1002_v40 = vsel %vm265_vm1, %v8151_v62, %v1001_v26 }
 0x105   : > { %3751 = vst [vmem:[#allocation2 + $0x80] sm:$0xff] %v5687_v18  ;;  %v2058_v44 = vmul.bf16 %v8232_v41, %v8290_v38  ;;  %v3777_v7 = vmul.bf16 %v8334_v14, %v8290_v38  ;;  %v2057_v52 = vmul.bf16 %v8235_v16, %v8294_v58  ;;  %v3776_v46 = vmul.bf16 %v8339_v17, %v8294_v58  ;;  %v6796_v38 = vld [vmem:[%s9690_s1 + $0xa8] sm:$0xff]   ;;  %v8385_v18 = vld [vmem:[%s7043_s18 + $0x40] sm:$0xf] }
 0x106   : > { %v1028_v47 = vshrl.u32 %v8321_v37, 16  ;;  %v8370_v43 = vcombine.low %v882_v27, %v883_v2  ;;  %v2201_v62 = vsel %vm265_vm1, %v8134_v36, %v2200_v15  ;;  %v3919_v26 = vor.u32 %v3917_v6, %v8319_v20  ;;  %9836 = vst [vmem:[#allocation42_spill] sm:$0xff] %v8380_v61  ;;  %9837 = vst [vmem:[#allocation43_spill] sm:$0xff] %v8385_v18  ;;  %v8391_v6 = vpop.permute.xlu1 %834  ;;  %v8393_v15 = vpop.permute.xlu0 %822 }
 0x107   : > { %6427 = vmatpush3.bf16.msra.mxu1 %v6786_v29  ;;  %v2203_v29 = vshrl.u32 %v8345_v8, 16  ;;  %v885_v58 = vmul.bf16 %v8380_v61, %v8349_v60  ;;  %v884_v2 = vmul.bf16 %v8385_v18, %v8353_v22  ;;  %v5494_v36 = vcombine.low %v8166_v50, %v8163_v39  ;;  %2903 = vmatmul.mubr.bf16.gmra.mrb[20].mxu0 %v2201_v62 }
 0x108   : > { %6428 = vmatprep.subr.bf16.mxu1 %v6791_v63  ;;  %v1009_v27 = vor.u32 %v1007_v28, %v8316_v55  ;;  %v8397_v30 = vor.u32 %v1015_v59, %v8343_v35  ;;  %v8399_v13 = vrot.slane %v1020_v3, 7  ;;  %v3922_v61 = vshrl.u32 %v8357_v48, 16  ;;  %v6839_v28 = vld [vmem:[%s7043_s18 + $0x4c] sm:$0xf]  ;;  %v6840_v3 = vld [vmem:[%s7043_s18 + $0x48] sm:$0xf] }
 0x109   : > { %v9838_v18 = vcombine.low %v8214_v57, %v8211_v21  ;;  %v9839_v39 = vcombine.low %v8132_v51, %v8129_v1  ;;  %v8408_v50 = vcombine.low %v2057_v52, %v2058_v44  ;;  %v2060_v59 = vmul.bf16 %v6839_v28, %v8349_v60  ;;  %v6799_v44 = vld [vmem:[%s9690_s1 + $0xb0] sm:$0xff]  }
 0x10a   : > { %3345 = vmatmul.mubr.bf16.gmra.mrb[24].mxu1 %v1002_v40  ;;  %v8410_v40 = vcombine.low %v3776_v46, %v3777_v7  ;;  %v2059_v62 = vmul.bf16 %v6840_v3, %v8353_v22  ;;  %v1023_v57 = vshll.u32 %v8309_v31, 16  ;;  %v8417_v21 = vrot.slane %v1028_v47, 7  ;;  %v8428_v52 = vld [vmem:[%s7043_s18 + $0x54] sm:$0xf]  ;;  %v8435_v46 = vld [vmem:[%s7043_s18 + $0x50] sm:$0xf]  ;;  %v8451_v28 = vpop.permute.xlu1 %858 }
 0x10b   : > { %2910 = vmatprep.mubr.bf16.mxu0 %v9838_v18  ;;  %3352 = vmatprep.mubr.bf16.mxu1 %v9839_v39  ;;  %v1036_v1 = vshrl.u32 %v8370_v43, 16  ;;  %v3920_v51 = vsel %vm265_vm1, %v8219_v11, %v3919_v26  ;;  %v8425_v7 = vrot.slane %v2203_v29, 7  ;;  %v8432_v31 = vcombine.low %v884_v2, %v885_v58  ;;  %v6847_v18 = vld [vmem:[%s7043_s18 + $0x50] sm:$0xf] }
 0x10c   : > { %6429 = vmatpush3.bf16.msra.mxu1 %v6791_v63  ;;  %v3779_v63 = vmul.bf16 %v8428_v52, %v8349_v60  ;;  %v3778_v47 = vmul.bf16 %v8435_v46, %v8353_v22  ;;  %4024 = vst [vmem:[#allocation2 + $0x78] sm:$0xff] %v3920_v51  ;;  %v8440_v11 = vor.u32 %v1023_v57, %v8399_v13  ;;  %v1031_v26 = vshll.u32 %v8321_v37, 16  ;;  %v8453_v22 = vpop.permute.xlu0 %846 }
 0x10d   : > { %6430 = vmatprep.subr.bf16.mxu1 %v6796_v38  ;;  %v2206_v29 = vshll.u32 %v8345_v8, 16  ;;  %v8445_v39 = vrot.slane %v3922_v61, 7  ;;  %v2211_v60 = vshrl.u32 %v8408_v50, 16  ;;  %v3930_v58 = vshrl.u32 %v8410_v40, 16 }
 0x10e   : > { %v8449_v2 = vcombine.low %v2059_v62, %v2060_v59  ;;  %v8456_v3 = vor.u32 %v1031_v26, %v8417_v21  ;;  %v8458_v37 = vrot.slane %v1036_v1, 7  ;;  %v8462_v8 = vrot.slane %v8057_v10, %v7301_v56  ;;  %v6808_v59 = vld [vmem:[%s9690_s1 + $0xb8] sm:$0xff]  }
 0x10f   : > { %v1010_v61 = vsel %vm265_vm1, %v8191_v32, %v1009_v27  ;;  %v2208_v62 = vor.u32 %v2206_v29, %v8425_v7  ;;  %v8471_v57 = vcombine.low %v3778_v47, %v3779_v63  ;;  %v5688_v1 = vcombine.low %v8279_v23, %v8274_v42  ;;  %v8522_v27 = vld [vmem:[%s7043_s18 + $0x48] sm:$0xf] }
 0x110   : > { %6431 = vmatpush3.bf16.msra.mxu1 %v6796_v38  ;;  %9840 = vst [vmem:[#allocation44_spill] sm:$0xff] %v8458_v37  ;;  %v1044_v38 = vshrl.u32 %v8432_v31, 16  ;;  %v1039_v10 = vshll.u32 %v8370_v43, 16  ;;  %v2214_v32 = vshll.u32 %v8408_v50, 16  ;;  %v711_v51 = vrot.slane %v8059_v25, %v7301_v56  ;;  %9846 = vst [vmem:[#allocation50_spill] sm:$0xff] %v8522_v27 }
 0x111   : > { %6432 = vmatprep.subr.bf16.mxu1 %v6799_v44  ;;  %v8480_v26 = vrot.slane %v2211_v60, 7  ;;  %v8482_v63 = vrot.slane %v3930_v58, 7  ;;  %v2219_v47 = vshrl.u32 %v8449_v2, 16  ;;  %v8487_v29 = vrot.slane %v8113_v19, %v7301_v56  ;;  %3752 = vst [vmem:[#allocation2 + $0x98] sm:$0xff] %v5688_v1  ;;  %v6844_v58 = vld [vmem:[%s7043_s18 + $0x54] sm:$0xf] }
 0x112   : > { %3353 = vmatmul.mubr.bf16.gmra.mrb[28].mxu1 %v1010_v61  ;;  %v8490_v43 = vor.u32 %v1039_v10, %v8458_v37  ;;  %v1047_v25 = vshll.u32 %v8432_v31, 16  ;;  %v8500_v60 = vrot.slane %v8115_v12, %v7301_v56  ;;  %v8502_v19 = vrot.slane %v1044_v38, 7  ;;  %v8508_v61 = vld [vmem:[%s7043_s18 + $0x5c] sm:$0xf]  ;;  %v8512_v10 = vpop.permute.xlu1 %1158  ;;  %v8514_v12 = vpop.permute.xlu0 %1146  ;;  %v8519_v38 = vld [vmem:[%s9690_s1 + $0x200] sm:$0xff]  }
 0x113   : > { %3360 = vmatprep.mubr.bf16.mxu1 %v5494_v36  ;;  %v8494_v36 = vld [vmem:[%s7043_s18 + $0x4c] sm:$0xf]  ;;  %v2062_v31 = vmul.bf16 %v6844_v58, %v8462_v8  ;;  %9842 = vst [vmem:[#allocation46_spill] sm:$0xff] %v8508_v61  ;;  %v3781_v1 = vmul.bf16 %v8508_v61, %v8462_v8  ;;  %9843 = vst [vmem:[#allocation47_spill] sm:$0xff] %v8512_v10  ;;  %v886_v58 = vmul.bf16 %v8522_v27, %v711_v51  ;;  %v6850_v10 = vld [vmem:[%s7043_s18 + $0x5c] sm:$0xf] }
 0x114   : > { %6433 = vmatpush3.bf16.msra.mxu1 %v6799_v44  ;;  %9841 = vst [vmem:[#allocation45_spill] sm:$0xff] %v8494_v36  ;;  %v887_v50 = vmul.bf16 %v8494_v36, %v8462_v8  ;;  %v3938_v44 = vshrl.u32 %v8471_v57, 16  ;;  %9844 = vst [vmem:[#allocation48_spill] sm:$0xff] %v8514_v12  ;;  %v2061_v23 = vmul.bf16 %v6847_v18, %v711_v51  ;;  %v8530_v37 = vrot.slane %v2219_v47, 7  ;;  %v8533_v36 = vld [vmem:[%s7043_s18 + $0x58] sm:$0xf] }
 0x115   : > { %6434 = vmatprep.subr.bf16.mxu1 %v6808_v59  ;;  %9845 = vst [vmem:[#allocation49_spill] sm:$0xff] %v8519_v38  ;;  %v5495_v8 = vcombine.low %v8201_v34, %v8198_v24  ;;  %v2209_v42 = vsel %vm265_vm1, %v8286_v54, %v2208_v62  ;;  %9847 = vst [vmem:[#allocation51_spill] sm:$0xff] %v8533_v36  ;;  %v3780_v61 = vmul.bf16 %v8533_v36, %v711_v51  ;;  %v8537_v12 = vld [vmem:[%s7043_s18 + $0x54] sm:$0xf]  ;;  %v8544_v24 = vld [vmem:[%s7043_s18 + $0x50] sm:$0xf] }
 0x116   : > { %9848 = vst [vmem:[#allocation52_spill] sm:$0xff] %v8537_v12  ;;  %v889_v27 = vmul.bf16 %v8537_v12, %v8487_v29  ;;  %v2064_v18 = vmul.bf16 %v6850_v10, %v8487_v29  ;;  %2911 = vmatmul.mubr.bf16.gmra.mrb[24].mxu0 %v2209_v42  ;;  %9849 = vst [vmem:[#allocation53_spill] sm:$0xff] %v8544_v24  ;;  %v888_v34 = vmul.bf16 %v8544_v24, %v8500_v60  ;;  %v6852_v54 = vld [vmem:[%s7043_s18 + $0x58] sm:$0xf]  ;;  %v8650_v24 = vld [vmem:[%s7043_s18 + $0x68] sm:$0xf] }
 0x117   : > { %v2063_v62 = vmul.bf16 %v6852_v54, %v8500_v60  ;;  %v1018_v51 = vsel %vm265_vm1, %v8316_v55, %v8397_v30  ;;  %v9850_v47 = vshll.u32 %v8357_v48, 16  ;;  %v9851_v42 = vcombine.low %v8235_v16, %v8232_v41  ;;  %9857 = vst [vmem:[#allocation59_spill] sm:$0xff] %v8650_v24  ;;  %v6878_v36 = vld [vmem:[%s7043_s18 + $0x18] sm:$0xf] }
 0x118   : > { %6435 = vmatpush3.bf16.msra.mxu1 %v6808_v59  ;;  %v8560_v59 = vor.u32 %v2214_v32, %v8480_v26  ;;  %v2222_v10 = vshll.u32 %v8449_v2, 16  ;;  %v8566_v54 = vrot.slane %v8178_v45, %v7301_v56  ;;  %v8570_v55 = vor.u32 %v1047_v25, %v8502_v19  ;;  %v8589_v25 = vpop.permute.xlu1 %1182 }
 0x119   : > { %v3927_v12 = vor.u32 %v9850_v47, %v8445_v39  ;;  %2918 = vmatprep.mubr.bf16.mxu0 %v9851_v42  ;;  %6468 = vmatprep.subr.bf16.mxu1 %v8519_v38  ;;  %v8572_v30 = vrot.slane %v3938_v44, 7  ;;  %v8576_v41 = vrot.slane %v8180_v9, %v7301_v56  ;;  %v8583_v48 = vcombine.low %v886_v58, %v887_v50  ;;  %v8591_v9 = vpop.permute.xlu0 %1170  ;;  %v8594_v44 = vld [vmem:[%s7043_s18 + $0x64] sm:$0xf] }
 0x11a   : > { %3361 = vmatmul.mubr.bf16.gmra.mrb[32].mxu1 %v1018_v51  ;;  %v8581_v45 = vor.u32 %v2222_v10, %v8530_v37  ;;  %v8585_v2 = vcombine.low %v2061_v23, %v2062_v31  ;;  %v8587_v32 = vcombine.low %v3780_v61, %v3781_v1  ;;  %9852 = vst [vmem:[#allocation54_spill] sm:$0xff] %v8594_v44  ;;  %v8603_v23 = vld [vmem:[%s7043_s18 + $0x60] sm:$0xf]  ;;  %v8608_v61 = vld [vmem:[%s7043_s18 + $0x5c] sm:$0xf] }
 0x11b   : > { %v3928_v16 = vsel %vm265_vm1, %v8319_v20, %v3927_v12  ;;  %3368 = vmatprep.mubr.bf16.mxu1 %v5495_v8  ;;  %v3783_v20 = vmul.bf16 %v8594_v44, %v8487_v29  ;;  %v8598_v12 = vcombine.low %v888_v34, %v889_v27  ;;  %v8600_v50 = vcombine.low %v2063_v62, %v2064_v18  ;;  %v6856_v58 = vld [vmem:[%s7043_s18 + $0x64] sm:$0xf]  ;;  %v8623_v18 = vld [vmem:[%s7043_s18 + $0x58] sm:$0xf]  ;;  %v6858_v34 = vld [vmem:[%s7043_s18 + $0x60] sm:$0xf] }
 0x11c   : > { %4025 = vst [vmem:[#allocation2 + $0x90] sm:$0xff] %v3928_v16  ;;  %9853 = vst [vmem:[#allocation55_spill] sm:$0xff] %v8603_v23  ;;  %v3782_v31 = vmul.bf16 %v8603_v23, %v8500_v60  ;;  %v891_v1 = vmul.bf16 %v8608_v61, %v8566_v54  ;;  %v2066_v8 = vmul.bf16 %v6856_v58, %v8566_v54  ;;  %v1055_v47 = vshll.u32 %v8583_v48, 16  ;;  %v8655_v38 = vld [vmem:[%s7043_s18 + $0x64] sm:$0xf]  ;;  %v9919_v23 = vld [vmem:[#allocation13_spill] sm:$0xff] }
 0x11d   : > { %9854 = vst [vmem:[#allocation56_spill] sm:$0xff] %v8608_v61  ;;  %v8616_v29 = vrot.slane %v8259_v4, %v7301_v56  ;;  %v8620_v27 = vrot.slane %v8261_v33, %v7301_v56  ;;  %9855 = vst [vmem:[#allocation57_spill] sm:$0xff] %v8623_v18  ;;  %v890_v60 = vmul.bf16 %v8623_v18, %v8576_v41  ;;  %v1052_v33 = vshrl.u32 %v8583_v48, 16 }
 0x11e   : > { %v2065_v62 = vmul.bf16 %v6858_v34, %v8576_v41  ;;  %v5496_v51 = vcombine.low %v8245_v49, %v8242_v0  ;;  %v5689_v4 = vcombine.low %v8339_v17, %v8334_v14  ;;  %v2227_v42 = vshrl.u32 %v8585_v2, 16  ;;  %v8645_v49 = vld [vmem:[%s7043_s18 + $0x6c] sm:$0xf]  ;;  %9858 = vst [vmem:[#allocation60_spill] sm:$0xff] %v8655_v38 }
 0x11f   : > { %v2230_v10 = vshll.u32 %v8585_v2, 16  ;;  %v1060_v16 = vshrl.u32 %v8598_v12, 16  ;;  %v2235_v58 = vshrl.u32 %v8600_v50, 16  ;;  %v8639_v34 = vcombine.low %v3782_v31, %v3783_v20  ;;  %9856 = vst [vmem:[#allocation58_spill] sm:$0xff] %v8645_v49  ;;  %v8660_v31 = vld [vmem:[%s7043_s18 + $0x60] sm:$0xf] }
 0x120   : > { %v1026_v0 = vsel %vm265_vm1, %v8343_v35, %v8440_v11  ;;  %3753 = vst [vmem:[#allocation2 + $0xb0] sm:$0xff] %v5689_v4  ;;  %v3785_v48 = vmul.bf16 %v8645_v49, %v8566_v54  ;;  %v3784_v2 = vmul.bf16 %v8650_v24, %v8576_v41  ;;  %v893_v20 = vmul.bf16 %v8655_v38, %v8616_v29  ;;  %v8664_v11 = vpop.permute.xlu1 %1206  ;;  %v8666_v4 = vpop.permute.xlu0 %1194  ;;  %v9927_v49 = vld [vmem:[#allocation41_spill] sm:$0xff] }
 0x121   : > { %9859 = vst [vmem:[#allocation61_spill] sm:$0xff] %v8660_v31  ;;  %v892_v35 = vmul.bf16 %v8660_v31, %v8620_v27  ;;  %v3946_v54 = vshrl.u32 %v8587_v32, 16  ;;  %v5517_v18 = vcombine.low %v890_v60, %v891_v1  ;;  %v5565_v61 = vcombine.low %v2065_v62, %v2066_v8  ;;  %v6863_v62 = vld [vmem:[%s7043_s18 + $0x6c] sm:$0xf] }
 0x122   : > { %3369 = vmatmul.mubr.bf16.gmra.mrb[36].mxu1 %v1026_v0  ;;  %v8670_v38 = vrot.slane %v1052_v33, 7  ;;  %v8672_v17 = vrot.slane %v2227_v42, 7  ;;  %v1063_v31 = vshll.u32 %v8598_v12, 16  ;;  %v2217_v14 = vsel %vm265_vm1, %v8425_v7, %v8560_v59  ;;  %v6864_v33 = vld [vmem:[%s7043_s18 + $0x68] sm:$0xf]  ;;  %v9864_v42 = vld [vmem:[#allocation3_spill] sm:$0xff] }
 0x123   : > { %3376 = vmatprep.mubr.bf16.mxu1 %v5496_v51  ;;  %v8678_v0 = vrot.slane %v1060_v16, 7  ;;  %v8680_v24 = vrot.slane %v2235_v58, 7  ;;  %v3954_v41 = vshrl.u32 %v8639_v34, 16  ;;  %2919 = vmatmul.mubr.bf16.gmra.mrb[28].mxu0 %v2217_v14  ;;  %v9862_v1 = vshll.u32 %v8410_v40, 16  ;;  %v9863_v59 = vld [vmem:[#allocation4_spill] sm:$0xff] }
 0x124   : > { %v8686_v60 = vcombine.low %v3784_v2, %v3785_v48  ;;  %v2068_v12 = vmul.bf16 %v6863_v62, %v8616_v29  ;;  %v8690_v51 = vcombine.low %v892_v35, %v893_v20  ;;  %v2067_v7 = vmul.bf16 %v6864_v33, %v8620_v27  ;;  %v8710_v62 = vpop.permute.xlu1 %1230  ;;  %v8712_v33 = vpop.permute.xlu0 %1218 }
 0x125   : > { %9860 = vst [vmem:[#allocation62_spill] sm:$0xff] %v8678_v0  ;;  %9861 = vst [vmem:[#allocation63_spill] sm:$0xff] %v8680_v24  ;;  %v3935_v8 = vor.u32 %v9862_v1, %v8482_v63  ;;  %v9865_v16 = vcombine.low %v9863_v59, %v9864_v42  ;;  %v1068_v58 = vshrl.u32 %v5517_v18, 16  ;;  %v2243_v14 = vshrl.u32 %v5565_v61, 16  ;;  %v8731_v59 = vld [vmem:[%s7043_s18 + $0x70] sm:$0xf] }
 0x126   : > { %v5497_v40 = vcombine.low %v8305_v5, %v8302_v53  ;;  %v8702_v2 = vor.u32 %v1055_v47, %v8670_v38  ;;  %v8705_v20 = vor.u32 %v2230_v10, %v8672_v17  ;;  %v8707_v35 = vrot.slane %v3946_v54, 7  ;;  %v8725_v54 = vld [vmem:[%s7043_s18 + $0x74] sm:$0xf] }
 0x127   : > { %2926 = vmatprep.mubr.bf16.mxu0 %v9865_v16  ;;  %v3936_v48 = vsel %vm265_vm1, %v8445_v39, %v3935_v8  ;;  %v2238_v1 = vshll.u32 %v8600_v50, 16  ;;  %v8715_v53 = vor.u32 %v1063_v31, %v8678_v0  ;;  %v8717_v5 = vrot.slane %v3954_v41, 7  ;;  %v9869_v0 = vld [vmem:[#allocation39_spill] sm:$0xff] }
 0x128   : > { %4026 = vst [vmem:[#allocation2 + $0xa8] sm:$0xff] %v3936_v48  ;;  %v1034_v47 = vsel %vm265_vm1, %v8399_v13, %v8456_v3  ;;  %v3962_v10 = vshrl.u32 %v8686_v60, 16  ;;  %v3787_v50 = vmul.bf16 %v8725_v54, %v8616_v29  ;;  %v1076_v8 = vshrl.u32 %v8690_v51, 16  ;;  %v9868_v48 = vld [vmem:[#allocation11_spill] sm:$0xff] }
 0x129   : > { %v3786_v31 = vmul.bf16 %v8731_v59, %v8620_v27  ;;  %v8736_v41 = vor.u32 %v2238_v1, %v8680_v24  ;;  %v8738_v42 = vrot.slane %v1068_v58, 7  ;;  %v8740_v13 = vrot.slane %v2243_v14, 7  ;;  %v8768_v14 = vpop.permute.xlu1 %1254  ;;  %v8787_v24 = vld [vmem:[%s7043_s18 + $0x7c] sm:$0xf] }
 0x12a   : > { %3377 = vmatmul.mubr.bf16.gmra.mrb[40].mxu1 %v1034_v47  ;;  %v8742_v3 = vcombine.low %v2067_v7, %v2068_v12  ;;  %v1071_v16 = vshll.u32 %v5517_v18, 16  ;;  %v2246_v29 = vshll.u32 %v5565_v61, 16  ;;  %v8746_v39 = vrot.slane %v9868_v48, %v7301_v56  ;;  %v6867_v48 = vld [vmem:[%s7043_s18 + $0x74] sm:$0xf] }
 0x12b   : > { %9866 = vst [vmem:[#allocation4_spill] sm:$0xff] %v8738_v42  ;;  %9867 = vst [vmem:[#allocation3_spill] sm:$0xff] %v8740_v13  ;;  %3384 = vmatprep.mubr.bf16.mxu1 %v5497_v40  ;;  %v8750_v27 = vrot.slane %v9869_v0, %v7301_v56  ;;  %v1079_v58 = vshll.u32 %v8690_v51, 16  ;;  %v8756_v12 = vrot.slane %v8391_v6, %v7301_v56  ;;  %v8762_v18 = vrot.slane %v3962_v10, 7  ;;  %v8770_v51 = vpop.permute.xlu0 %1242  ;;  %v9873_v10 = vld [vmem:[#allocation42_spill] sm:$0xff] }
 0x12c   : > { %v8760_v61 = vrot.slane %v8393_v15, %v7301_v56  ;;  %v8764_v7 = vrot.slane %v1076_v8, 7  ;;  %v8766_v0 = vcombine.low %v3786_v31, %v3787_v50  ;;  %v5690_v6 = vcombine.low %v8435_v46, %v8428_v52  ;;  %v9874_v8 = vld [vmem:[#allocation43_spill] sm:$0xff]  ;;  %v6869_v46 = vld [vmem:[%s7043_s18 + $0x70] sm:$0xf] }
 0x12d   : > { %v8775_v40 = vor.u32 %v1071_v16, %v8738_v42  ;;  %v8778_v15 = vor.u32 %v2246_v29, %v8740_v13  ;;  %v2251_v47 = vshrl.u32 %v8742_v3, 16  ;;  %v5498_v50 = vcombine.low %v9874_v8, %v9873_v10  ;;  %v8794_v29 = vld [vmem:[%s7043_s18 + $0x78] sm:$0xf]  ;;  %v9876_v10 = vld [vmem:[#allocation24_spill] sm:$0xff]  ;;  %v9877_v8 = vld [vmem:[#allocation25_spill] sm:$0xff] }
 0x12e   : > { %9870 = vst [vmem:[#allocation11_spill] sm:$0xff] %v8764_v7  ;;  %v2254_v31 = vshll.u32 %v8742_v3, 16  ;;  %v2070_v1 = vmul.bf16 %v6867_v48, %v8746_v39  ;;  %v3789_v52 = vmul.bf16 %v8787_v24, %v8746_v39  ;;  %v2069_v16 = vmul.bf16 %v6869_v46, %v8750_v27  ;;  %3754 = vst [vmem:[#allocation2 + $0xc8] sm:$0xff] %v5690_v6 }
 0x12f   : > { %9871 = vst [vmem:[#allocation39_spill] sm:$0xff] %v8775_v40  ;;  %9872 = vst [vmem:[#allocation64_spill] sm:$0xff] %v8778_v15  ;;  %v3788_v42 = vmul.bf16 %v8794_v29, %v8750_v27  ;;  %v3791_v3 = vmul.bf16 %v9876_v10, %v8756_v12  ;;  %v3790_v48 = vmul.bf16 %v9877_v8, %v8760_v61  ;;  %v9880_v10 = vshll.u32 %v8471_v57, 16 }
 0x130   : > { %9875 = vst [vmem:[#allocation42_spill] sm:$0xff] %v8794_v29  ;;  %v1042_v13 = vsel %vm265_vm1, %v8417_v21, %v8490_v43  ;;  %v8807_v40 = vrot.slane %v8451_v28, %v7301_v56  ;;  %v8811_v6 = vrot.slane %v8453_v22, %v7301_v56  ;;  %v2225_v46 = vsel %vm265_vm1, %v8480_v26, %v8581_v45  ;;  %v9882_v43 = vld [vmem:[#allocation47_spill] sm:$0xff]  ;;  %v9884_v22 = vld [vmem:[#allocation48_spill] sm:$0xff] }
 0x131   : > { %v3943_v8 = vor.u32 %v9880_v10, %v8572_v30  ;;  %v8820_v21 = vor.u32 %v1079_v58, %v8764_v7  ;;  %v3970_v28 = vshrl.u32 %v8766_v0, 16  ;;  %v8825_v15 = vrot.slane %v9882_v43, %v7301_v56  ;;  %2927 = vmatmul.mubr.bf16.gmra.mrb[32].mxu0 %v2225_v46  ;;  %v8842_v58 = vpop.permute.xlu1 %1278  ;;  %v8844_v10 = vpop.permute.xlu0 %1266  ;;  %v9889_v46 = vld [vmem:[#allocation5_spill] sm:$0xff]  ;;  %v6877_v7 = vld [vmem:[%s7043_s18 + $0x1c] sm:$0xf] }
 0x132   : > { %9878 = vst [vmem:[#allocation43_spill] sm:$0xff] %v8807_v40  ;;  %9879 = vst [vmem:[#allocation24_spill] sm:$0xff] %v8811_v6  ;;  %3385 = vmatmul.mubr.bf16.gmra.mrb[44].mxu1 %v1042_v13  ;;  %v8829_v29 = vrot.slane %v9884_v22, %v7301_v56  ;;  %v8834_v26 = vrot.slane %v8589_v25, %v7301_v56  ;;  %v8838_v45 = vrot.slane %v8591_v9, %v7301_v56  ;;  %v8852_v22 = vld [vmem:[%s7043_s18 + $0x6c] sm:$0xf] }
 0x133   : > { %9881 = vst [vmem:[#allocation25_spill] sm:$0xff] %v8820_v21  ;;  %9883 = vst [vmem:[#allocation47_spill] sm:$0xff] %v8825_v15  ;;  %3392 = vmatprep.mubr.bf16.mxu1 %v5498_v50  ;;  %v3944_v13 = vsel %vm265_vm1, %v8482_v63, %v3943_v8  ;;  %v9888_v50 = vld [vmem:[#allocation6_spill] sm:$0xff]  ;;  %v8849_v25 = vrot.slane %v2251_v47, 7  ;;  %v895_v9 = vmul.bf16 %v8852_v22, %v8746_v39  ;;  %v9892_v47 = vld [vmem:[#allocation28_spill] sm:$0xff] }
 0x134   : > { %9885 = vst [vmem:[#allocation48_spill] sm:$0xff] %v8829_v29  ;;  %9886 = vst [vmem:[#allocation65_spill] sm:$0xff] %v8834_v26  ;;  %v9890_v43 = vcombine.low %v9888_v50, %v9889_v46  ;;  %v8856_v57 = vcombine.low %v2069_v16, %v2070_v1  ;;  %v8858_v63 = vcombine.low %v3788_v42, %v3789_v52  ;;  %v9891_v50 = vld [vmem:[#allocation27_spill] sm:$0xff]  ;;  %v8869_v39 = vld [vmem:[%s7043_s18 + $0x68] sm:$0xf] }
 0x135   : > { %9887 = vst [vmem:[#allocation66_spill] sm:$0xff] %v8838_v45  ;;  %4027 = vst [vmem:[#allocation2 + $0xc0] sm:$0xff] %v3944_v13  ;;  %v8860_v8 = vcombine.low %v3790_v48, %v3791_v3  ;;  %v3793_v46 = vmul.bf16 %v9891_v50, %v8807_v40  ;;  %v894_v42 = vmul.bf16 %v8869_v39, %v8750_v27  ;;  %v6873_v1 = vld [vmem:[%s7043_s18 + $0x14] sm:$0xf]  ;;  %v6874_v16 = vld [vmem:[%s7043_s18 + $0x10] sm:$0xf] }
 0x136   : > { %2934 = vmatprep.mubr.bf16.mxu0 %v9890_v43  ;;  %v3792_v43 = vmul.bf16 %v9892_v47, %v8811_v6  ;;  %9894 = vst [vmem:[#allocation6_spill] sm:$0xff] %v8869_v39  ;;  %v4036_v52 = vmul.bf16 %v6873_v1, %v8825_v15  ;;  %v4035_v3 = vmul.bf16 %v6874_v16, %v8829_v29  ;;  %v9895_v48 = vld [vmem:[#allocation45_spill] sm:$0xff]  ;;  %v9896_v13 = vld [vmem:[#allocation50_spill] sm:$0xff]  ;;  %v8893_v29 = vrot.slane %v3970_v28, 7  ;;  %v9899_v15 = vld [vmem:[#allocation44_spill] sm:$0xff] }
 0x137   : > { %v5499_v50 = vcombine.low %v9896_v13, %v9895_v48  ;;  %v8880_v40 = vld [vmem:[%s7043_s18 + $0x7c] sm:$0xf]  ;;  %v8885_v21 = vld [vmem:[%s7043_s18 + $0x78] sm:$0xf]  ;;  %v4038_v1 = vmul.bf16 %v6877_v7, %v8834_v26  ;;  %v4037_v16 = vmul.bf16 %v6878_v36, %v8838_v45  ;;  %v2259_v48 = vshrl.u32 %v8856_v57, 16  ;;  %v1303_v45 = vpop.permute.xlu1 %1302  ;;  %v1291_v26 = vpop.permute.xlu0 %1290 }
 0x138   : > { %9897 = vst [vmem:[#allocation5_spill] sm:$0xff] %v8880_v40  ;;  %v2072_v47 = vmul.bf16 %v8880_v40, %v8756_v12  ;;  %9898 = vst [vmem:[#allocation27_spill] sm:$0xff] %v8885_v21  ;;  %v2071_v27 = vmul.bf16 %v8885_v21, %v8760_v61  ;;  %v3978_v13 = vshrl.u32 %v8858_v63, 16  ;;  %v1050_v40 = vsel %vm265_vm1, %v9899_v15, %v8570_v55  ;;  %v8904_v21 = vld [vmem:[%s7043_s18 + $0x74] sm:$0xf] }
 0x139   : > { %v8901_v6 = vor.u32 %v2254_v31, %v8849_v25  ;;  %v3986_v36 = vshrl.u32 %v8860_v8, 16  ;;  %v8909_v28 = vcombine.low %v3792_v43, %v3793_v46  ;;  %v8912_v39 = vld [vmem:[%s7043_s18 + $0x70] sm:$0xf]  ;;  %v8916_v15 = vcombine.low %v4035_v3, %v4036_v52 }
 0x13a   : > { %3393 = vmatmul.mubr.bf16.gmra.mrb[48].mxu1 %v1050_v40  ;;  %v8920_v31 = vrot.slane %v8664_v11, %v7301_v56  ;;  %v2233_v7 = vsel %vm265_vm1, %v8530_v37, %v8705_v20  ;;  %v8925_v46 = vcombine.low %v894_v42, %v895_v9  ;;  %v8927_v40 = vcombine.low %v2071_v27, %v2072_v47  ;;  %v9902_v9 = vld [vmem:[#allocation8_spill] sm:$0xff]  ;;  %v9903_v42 = vld [vmem:[#allocation7_spill] sm:$0xff] }
 0x13b   : > { %3400 = vmatprep.mubr.bf16.mxu1 %v5499_v50  ;;  %v8929_v43 = vcombine.low %v4037_v16, %v4038_v1  ;;  %v8933_v52 = vrot.slane %v8666_v4, %v7301_v56  ;;  %2935 = vmatmul.mubr.bf16.gmra.mrb[36].mxu0 %v2233_v7  ;;  %v8935_v11 = vrot.slane %v2259_v48, 7  ;;  %v8937_v3 = vrot.slane %v3978_v13, 7  ;;  %v6881_v13 = vld [vmem:[%s7043_s18 + $0x24] sm:$0xf]  ;;  %v1327_v16 = vpop.permute.xlu1 %1326  ;;  %v1315_v20 = vpop.permute.xlu0 %1314  ;;  %v9909_v37 = vld [vmem:[#allocation32_spill] sm:$0xff] }
 0x13c   : > { %9900 = vst [vmem:[#allocation28_spill] sm:$0xff] %v8920_v31  ;;  %v9904_v50 = vcombine.low %v9902_v9, %v9903_v42  ;;  %v8944_v47 = vrot.slane %v3986_v36, 7  ;;  %v3994_v27 = vshrl.u32 %v8909_v28, 16  ;;  %v8949_v4 = vrot.slane %v8710_v62, %v7301_v56 }
 0x13d   : > { %9901 = vst [vmem:[#allocation45_spill] sm:$0xff] %v8933_v52  ;;  %v8953_v1 = vrot.slane %v8712_v33, %v7301_v56  ;;  %v4150_v48 = vshll.u32 %v8916_v15, 16  ;;  %v4040_v7 = vmul.bf16 %v6881_v13, %v8920_v31  ;;  %v9905_v36 = vshll.u32 %v8587_v32, 16 }
 0x13e   : > { %2942 = vmatprep.mubr.bf16.mxu0 %v9904_v50  ;;  %v4155_v42 = vshll.u32 %v8929_v43, 16  ;;  %v6882_v50 = vld [vmem:[%s7043_s18 + $0x20] sm:$0xf]  ;;  %v8967_v33 = vrot.slane %v8768_v14, %v7301_v56  ;;  %v8971_v55 = vrot.slane %v8770_v51, %v7301_v56  ;;  %v8975_v13 = vrot.slane %v8842_v58, %v7301_v56 }
 0x13f   : > { %v3951_v9 = vor.u32 %v9905_v36, %v8707_v35  ;;  %v4039_v62 = vmul.bf16 %v6882_v50, %v8933_v52  ;;  %v8979_v32 = vrot.slane %v8844_v10, %v7301_v56  ;;  %v1058_v36 = vsel %vm265_vm1, %v8502_v19, %v8702_v2  ;;  %v9908_v51 = vld [vmem:[#allocation31_spill] sm:$0xff]  ;;  %v9912_v2 = vld [vmem:[#allocation53_spill] sm:$0xff] }
 0x140   : > { %9906 = vst [vmem:[#allocation50_spill] sm:$0xff] %v8971_v55  ;;  %v4042_v50 = vmul.bf16 %v9908_v51, %v8949_v4  ;;  %v4041_v52 = vmul.bf16 %v9909_v37, %v8953_v1  ;;  %v8993_v58 = vrot.slane %v1303_v45, %v7301_v56  ;;  %v8996_v10 = vrot.slane %v1291_v26, %v7301_v56  ;;  %v9913_v37 = vld [vmem:[#allocation35_spill] sm:$0xff]  ;;  %v9917_v51 = vld [vmem:[#allocation38_spill] sm:$0xff] }
 0x141   : > { %v8986_v14 = vsel %vm265_vm1, %v8572_v30, %v3951_v9  ;;  %v8999_v31 = vrot.slane %v1327_v16, %v7301_v56  ;;  %v9002_v19 = vrot.slane %v1315_v20, %v7301_v56  ;;  %v9911_v30 = vld [vmem:[#allocation52_spill] sm:$0xff]  ;;  %v4044_v45 = vmul.bf16 %v9913_v37, %v8967_v33 }
 0x142   : > { %9907 = vst [vmem:[#allocation44_spill] sm:$0xff] %v8986_v14  ;;  %9910 = vst [vmem:[#allocation8_spill] sm:$0xff] %v8996_v10  ;;  %3401 = vmatmul.mubr.bf16.gmra.mrb[52].mxu1 %v1058_v36  ;;  %v5500_v9 = vcombine.low %v9912_v2, %v9911_v30  ;;  %v9914_v14 = vld [vmem:[#allocation36_spill] sm:$0xff]  ;;  %v2241_v16 = vsel %vm265_vm1, %v8672_v17, %v8736_v41  ;;  %v9915_v56 = vshll.u32 %v8639_v34, 16  ;;  %v9916_v30 = vld [vmem:[#allocation37_spill] sm:$0xff] }
 0x143   : > { %v4043_v26 = vmul.bf16 %v9914_v14, %v8971_v55  ;;  %v9018_v36 = vcombine.low %v4039_v62, %v4040_v7  ;;  %v4046_v2 = vmul.bf16 %v9916_v30, %v8975_v13  ;;  %v4045_v44 = vmul.bf16 %v9917_v51, %v8979_v32  ;;  %2943 = vmatmul.mubr.bf16.gmra.mrb[40].mxu0 %v2241_v16  ;;  %v9920_v17 = vld [vmem:[#allocation26_spill] sm:$0xff]  ;;  %v9922_v7 = vld [vmem:[#allocation16_spill] sm:$0xff]  ;;  %v9923_v62 = vld [vmem:[#allocation15_spill] sm:$0xff] }
 0x144   : > { %v3959_v20 = vor.u32 %v9915_v56, %v8717_v5  ;;  %v4048_v55 = vmul.bf16 %v9919_v23, %v8993_v58  ;;  %v4047_v41 = vmul.bf16 %v9920_v17, %v8996_v10  ;;  %v9924_v56 = vcombine.low %v9922_v7, %v9923_v62  ;;  %v9926_v14 = vld [vmem:[#allocation40_spill] sm:$0xff]  ;;  %v9929_v10 = vld [vmem:[#allocation57_spill] sm:$0xff]  ;;  %3408 = vmatprep.mubr.bf16.mxu1 %v5500_v9 }
 0x145   : > { %v9925_v51 = vshll.u32 %v8686_v60, 16  ;;  %v9040_v30 = vcombine.low %v4041_v52, %v4042_v50  ;;  %v4050_v23 = vmul.bf16 %v9926_v14, %v8999_v31  ;;  %v4049_v17 = vmul.bf16 %v9927_v49, %v9002_v19  ;;  %v9928_v37 = vld [vmem:[#allocation56_spill] sm:$0xff] }
 0x146   : > { %v9032_v34 = vsel %vm265_vm1, %v8707_v35, %v3959_v20  ;;  %2950 = vmatprep.mubr.bf16.mxu0 %v9924_v56  ;;  %v5501_v35 = vcombine.low %v9929_v10, %v9928_v37  ;;  %v3996_v20 = vrot.slane %v3994_v27, 7  ;;  %v4157_v52 = vrot.slane %v4155_v42, 1 }
 0x147   : > { %9921 = vst [vmem:[#allocation7_spill] sm:$0xff] %v9032_v34  ;;  %v3967_v16 = vor.u32 %v9925_v51, %v8762_v18  ;;  %v5718_v34 = vcombine.low %v4043_v26, %v4044_v45  ;;  %v4163_v50 = vshll.u32 %v9018_v36, 16  ;;  %v5719_v14 = vcombine.low %v4045_v44, %v4046_v2  ;;  %v9931_v2 = vld [vmem:[#allocation42_spill] sm:$0xff]  ;;  %v9077_v51 = vld [vmem:[%s7043_s18 + $0x84] sm:$0xf] }
 0x148   : > { %v1066_v49 = vsel %vm265_vm1, %v8670_v38, %v8715_v53  ;;  %v4148_v10 = vshrl.u32 %v8916_v15, 16  ;;  %v4152_v9 = vrot.slane %v4150_v48, 1  ;;  %v5720_v27 = vcombine.low %v4047_v41, %v4048_v55  ;;  %v9932_v53 = vld [vmem:[#allocation64_spill] sm:$0xff]  ;;  %v9933_v15 = vld [vmem:[#allocation63_spill] sm:$0xff] }
 0x149   : > { %v9050_v7 = vsel %vm265_vm1, %v8717_v5, %v3967_v16  ;;  %v9930_v45 = vshll.u32 %v8766_v0, 16  ;;  %v4159_v42 = vshrl.u32 %v8929_v43, 16  ;;  %v4171_v26 = vshll.u32 %v9040_v30, 16  ;;  %v9080_v16 = vld [vmem:[%s7043_s18 + $0x80] sm:$0xf] }
 0x14a   : > { %3409 = vmatmul.mubr.bf16.gmra.mrb[56].mxu1 %v1066_v49  ;;  %v5721_v44 = vcombine.low %v4049_v17, %v4050_v23  ;;  %v4179_v38 = vshll.u32 %v5718_v34, 16  ;;  %v2249_v55 = vsel %vm265_vm1, %v9933_v15, %v9932_v53  ;;  %v9934_v48 = vshll.u32 %v8858_v63, 16  ;;  %v9936_v49 = vld [vmem:[#allocation18_spill] sm:$0xff]  ;;  %v9939_v15 = vld [vmem:[#allocation60_spill] sm:$0xff] }
 0x14b   : > { %v3975_v5 = vor.u32 %v9930_v45, %v8893_v29  ;;  %3416 = vmatprep.mubr.bf16.mxu1 %v5501_v35  ;;  %v4161_v41 = vor.u32 %v4159_v42, %v4157_v52  ;;  %v4165_v62 = vrot.slane %v4163_v50, 1  ;;  %v4187_v56 = vshll.u32 %v5719_v14, 16  ;;  %2951 = vmatmul.mubr.bf16.gmra.mrb[44].mxu0 %v2249_v55  ;;  %v9935_v35 = vld [vmem:[#allocation19_spill] sm:$0xff]  ;;  %v9940_v55 = vld [vmem:[#allocation61_spill] sm:$0xff]  ;;  %v9098_v23 = vld [vmem:[%s7043_s18 + $0x8c] sm:$0xf] }
 0x14c   : > { %v3983_v43 = vor.u32 %v9934_v48, %v8937_v3  ;;  %v4195_v17 = vshll.u32 %v5720_v27, 16  ;;  %v9937_v63 = vcombine.low %v9935_v35, %v9936_v49  ;;  %v9938_v50 = vshll.u32 %v8860_v8, 16  ;;  %9941 = vst [vmem:[#allocation31_spill] sm:$0xff] %v9098_v23 }
 0x14d   : > { %v9071_v0 = vsel %vm265_vm1, %v8762_v18, %v3975_v5  ;;  %v4167_v18 = vshrl.u32 %v9018_v36, 16  ;;  %v4173_v42 = vrot.slane %v4171_v26, 1  ;;  %v4203_v53 = vshll.u32 %v5721_v44, 16  ;;  %v9101_v36 = vld [vmem:[%s7043_s18 + $0x88] sm:$0xf] }
 0x14e   : > { %2958 = vmatprep.mubr.bf16.mxu0 %v9937_v63  ;;  %v9090_v45 = vsel %vm265_vm1, %v8893_v29, %v3983_v43  ;;  %v3991_v5 = vor.u32 %v9938_v50, %v8944_v47  ;;  %v5502_v48 = vcombine.low %v9940_v55, %v9939_v15  ;;  %v4175_v49 = vshrl.u32 %v9040_v30, 16  ;;  %v9943_v50 = vld [vmem:[#allocation39_spill] sm:$0xff]  ;;  %v9944_v15 = vld [vmem:[#allocation62_spill] sm:$0xff] }
 0x14f   : > { %v4181_v29 = vrot.slane %v4179_v38, 1  ;;  %v9942_v8 = vshll.u32 %v8909_v28, 16  ;;  %v4189_v63 = vrot.slane %v4187_v56, 1  ;;  %v1074_v55 = vsel %vm265_vm1, %v9944_v15, %v9943_v50  ;;  %v9952_v50 = vld [vmem:[#allocation24_spill] sm:$0xff] }
 0x150   : > { %v9108_v43 = vsel %vm265_vm1, %v8937_v3, %v3991_v5  ;;  %v4153_v37 = vor.u32 %v4152_v9, %v4148_v10  ;;  %v9116_v60 = vsel %vm1640_vm8, %v4161_v41, %v4165_v62  ;;  %v4183_v35 = vshrl.u32 %v5718_v34, 16  ;;  %v9946_v10 = vld [vmem:[#allocation3_spill] sm:$0xff] }
 0x151   : > { %v3999_v26 = vor.u32 %v9942_v8, %v3996_v20  ;;  %v4197_v23 = vrot.slane %v4195_v17, 1  ;;  %v4169_v3 = vor.u32 %v4167_v18, %v4165_v62  ;;  %v4191_v38 = vshrl.u32 %v5719_v14, 16  ;;  %v9947_v62 = vld [vmem:[#allocation22_spill] sm:$0xff]  ;;  %v9948_v18 = vld [vmem:[#allocation21_spill] sm:$0xff]  ;;  %v9951_v8 = vld [vmem:[#allocation43_spill] sm:$0xff] }
 0x152   : > { %3417 = vmatmul.mubr.bf16.gmra.mrb[60].mxu1 %v1074_v55  ;;  %v4205_v28 = vrot.slane %v4203_v53, 1  ;;  %v9123_v20 = vsel %vm1640_vm8, %v4153_v37, %v4157_v52  ;;  %v4177_v56 = vor.u32 %v4175_v49, %v4173_v42  ;;  %v4199_v5 = vshrl.u32 %v5720_v27, 16 }
 0x153   : > { %v9120_v30 = vsel %vm265_vm1, %v8944_v47, %v3999_v26  ;;  %3424 = vmatprep.mubr.bf16.mxu1 %v5502_v48  ;;  %v2257_v9 = vsel %vm265_vm1, %v9946_v10, %v8901_v6  ;;  %v9129_v34 = vsel %vm1640_vm8, %v4169_v3, %v4173_v42  ;;  %v4185_v41 = vor.u32 %v4183_v35, %v4181_v29  ;;  %v9950_v48 = vld [vmem:[#allocation6_spill] sm:$0xff] }
 0x154   : > { %9945 = vst [vmem:[#allocation32_spill] sm:$0xff] %v9120_v30  ;;  %v1084_v47 = vshrl.u32 %v8925_v46, 16  ;;  %v4207_v14 = vshrl.u32 %v5721_v44, 16  ;;  %2959 = vmatmul.mubr.bf16.gmra.mrb[48].mxu0 %v2257_v9  ;;  %v9133_v52 = vsel %vm1640_vm8, %v4177_v56, %v4181_v29  ;;  %v4193_v37 = vor.u32 %v4191_v38, %v4189_v63  ;;  %v9150_v29 = vld [vmem:[%s7043_s18 + $0x84] sm:$0xf]  ;;  %v9955_v56 = vld [vmem:[#allocation25_spill] sm:$0xff] }
 0x155   : > { %v2262_v27 = vshll.u32 %v8856_v57, 16  ;;  %v9949_v17 = vcombine.low %v9947_v62, %v9948_v18  ;;  %v9140_v6 = vsel %vm1640_vm8, %v4185_v41, %v4189_v63  ;;  %v4201_v42 = vor.u32 %v4199_v5, %v4197_v23  ;;  %v9155_v63 = vld [vmem:[%s7043_s18 + $0x80] sm:$0xf]  ;;  %v9956_v5 = vld [vmem:[#allocation4_spill] sm:$0xff] }
 0x156   : > { %v2267_v53 = vshrl.u32 %v8927_v40, 16  ;;  %v5503_v44 = vcombine.low %v9950_v48, %v8852_v22  ;;  %v9146_v35 = vsel %vm1640_vm8, %v4193_v37, %v4197_v23  ;;  %v4209_v49 = vor.u32 %v4207_v14, %v4205_v28  ;;  %v9957_v9 = vld [vmem:[#allocation12_spill] sm:$0xff]  ;;  %v9958_v14 = vld [vmem:[#allocation5_spill] sm:$0xff] }
 0x157   : > { %2966 = vmatprep.mubr.bf16.mxu0 %v9949_v17  ;;  %v2264_v57 = vor.u32 %v2262_v27, %v8935_v11  ;;  %v2074_v26 = vmul.bf16 %v9150_v29, %v9951_v8  ;;  %v2073_v22 = vmul.bf16 %v9155_v63, %v9952_v50  ;;  %v9160_v15 = vsel %vm1640_vm8, %v4201_v42, %v4205_v28  ;;  %v9959_v28 = vld [vmem:[#allocation27_spill] sm:$0xff]  ;;  %v9186_v27 = vld [vmem:[%s7043_s18 + $0x78] sm:$0xf]  ;;  %v6891_v18 = vld [vmem:[%s7043_s18 + $0xc] sm:$0xf] }
 0x158   : > { %v9162_v23 = vrot.slane %v1084_v47, 7  ;;  %v9953_v55 = vmul.bf16 %v8904_v21, %v8756_v12  ;;  %v9954_v3 = vmul.bf16 %v8912_v39, %v8760_v61  ;;  %v1082_v10 = vsel %vm265_vm1, %v9956_v5, %v9955_v56  ;;  %v9181_v12 = vld [vmem:[%s7043_s18 + $0x7c] sm:$0xf]  ;;  %v9960_v17 = vld [vmem:[#allocation47_spill] sm:$0xff]  ;;  %v6892_v48 = vld [vmem:[%s7043_s18 + $0x8] sm:$0xf] }
 0x159   : > { %v9175_v41 = vsel %vm1640_vm8, %v4209_v49, %v9957_v9  ;;  %v5552_v37 = vcombine.low %v9959_v28, %v9958_v14  ;;  %v1087_v47 = vshll.u32 %v8925_v46, 16  ;;  %v899_v61 = vmul.bf16 %v9181_v12, %v9951_v8  ;;  %v9961_v49 = vld [vmem:[#allocation48_spill] sm:$0xff]  ;;  %v6894_v14 = vld [vmem:[%s7043_s18 + $0x10] sm:$0xf]  ;;  %v9963_v28 = vld [vmem:[#allocation66_spill] sm:$0xff] }
 0x15a   : > { %v5520_v38 = vcombine.low %v9954_v3, %v9953_v55  ;;  %3425 = vmatmul.mubr.bf16.gmra.mrb[64].mxu1 %v1082_v10  ;;  %v898_v62 = vmul.bf16 %v9186_v27, %v9952_v50  ;;  %v2317_v42 = vmul.bf16 %v6891_v18, %v9960_v17  ;;  %v2316_v46 = vmul.bf16 %v6892_v48, %v9961_v49  ;;  %v6893_v10 = vld [vmem:[%s7043_s18 + $0x14] sm:$0xf]  ;;  %v6895_v48 = vld [vmem:[%s7043_s18 + $0x4] sm:$0xf] }
 0x15b   : > { %3432 = vmatprep.mubr.bf16.mxu1 %v5503_v44  ;;  %v9194_v55 = vrot.slane %v2267_v53, 7  ;;  %v5569_v3 = vcombine.low %v2073_v22, %v2074_v26  ;;  %v2265_v8 = vsel %vm265_vm1, %v8849_v25, %v2264_v57  ;;  %v1089_v56 = vor.u32 %v1087_v47, %v9162_v23  ;;  %v9962_v50 = vld [vmem:[#allocation65_spill] sm:$0xff]  ;;  %v6896_v44 = vld [vmem:[%s7043_s18] sm:$0xf] }
 0x15c   : > { %v1092_v5 = vshrl.u32 %v5520_v38, 16  ;;  %v2319_v9 = vmul.bf16 %v6893_v10, %v9962_v50  ;;  %v2318_v18 = vmul.bf16 %v6894_v14, %v9963_v28  ;;  %2967 = vmatmul.mubr.bf16.gmra.mrb[52].mxu0 %v2265_v8  ;;  %v2270_v30 = vshll.u32 %v8927_v40, 16 }
 0x15d   : > { %v1529_v53 = vmul.bf16 %v6895_v48, %v9960_v17  ;;  %v1528_v25 = vmul.bf16 %v6896_v44, %v9961_v49  ;;  %2974 = vmatprep.mubr.bf16.mxu0 %v5552_v37  ;;  %v9208_v57 = vcombine.low %v898_v62, %v899_v61  ;;  %v5570_v26 = vcombine.low %v2316_v46, %v2317_v42  ;;  %v9964_v49 = vld [vmem:[#allocation11_spill] sm:$0xff]  ;;  %v6899_v46 = vld [vmem:[%s7043_s18 + $0x1c] sm:$0xf]  ;;  %v6901_v48 = vld [vmem:[%s7043_s18 + $0x14] sm:$0xf] }
 0x15e   : > { %v5504_v22 = vcombine.low %v8912_v39, %v8904_v21  ;;  %v2272_v47 = vor.u32 %v2270_v30, %v9194_v55  ;;  %v2275_v8 = vshrl.u32 %v5569_v3, 16  ;;  %v5553_v40 = vcombine.low %v9155_v63, %v9150_v29  ;;  %v6897_v21 = vld [vmem:[%s7043_s18 + $0xc] sm:$0xf]  ;;  %v6898_v30 = vld [vmem:[%s7043_s18 + $0x8] sm:$0xf] }
 0x15f   : > { %v9215_v17 = vrot.slane %v1092_v5, 7  ;;  %v9217_v10 = vcombine.low %v2318_v18, %v2319_v9  ;;  %v1090_v37 = vsel %vm265_vm1, %v9964_v49, %v1089_v56  ;;  %v1095_v61 = vshll.u32 %v5520_v38, 16  ;;  %v9965_v5 = vld [vmem:[#allocation28_spill] sm:$0xff]  ;;  %v6900_v9 = vld [vmem:[%s7043_s18 + $0x18] sm:$0xf]  ;;  %v9966_v38 = vld [vmem:[#allocation45_spill] sm:$0xff] }
 0x160   : > { %v9221_v62 = vcombine.low %v1528_v25, %v1529_v53  ;;  %v1531_v39 = vmul.bf16 %v6897_v21, %v9962_v50  ;;  %v1530_v42 = vmul.bf16 %v6898_v30, %v9963_v28  ;;  %v1100_v29 = vshrl.u32 %v9208_v57, 16  ;;  %v6902_v53 = vld [vmem:[%s7043_s18 + $0x10] sm:$0xf]  ;;  %v6904_v30 = vld [vmem:[%s7043_s18 + $0x20] sm:$0xf] }
 0x161   : > { %v2431_v63 = vshll.u32 %v5570_v26, 16  ;;  %v2321_v56 = vmul.bf16 %v6899_v46, %v9965_v5  ;;  %v2320_v14 = vmul.bf16 %v6900_v9, %v9966_v38  ;;  %v2277_v18 = vrot.slane %v2275_v8, 7 }
 0x162   : > { %3433 = vmatmul.mubr.bf16.gmra.mrb[68].mxu1 %v1090_v37  ;;  %v1533_v50 = vmul.bf16 %v6901_v48, %v9965_v5  ;;  %v1532_v28 = vmul.bf16 %v6902_v53, %v9966_v38  ;;  %v2273_v44 = vsel %vm265_vm1, %v8935_v11, %v2272_v47  ;;  %v1097_v25 = vor.u32 %v1095_v61, %v9215_v17  ;;  %v6903_v37 = vld [vmem:[%s7043_s18 + $0x24] sm:$0xf] }
 0x163   : > { %3440 = vmatprep.mubr.bf16.mxu1 %v5504_v22  ;;  %v2436_v49 = vshll.u32 %v9217_v10, 16  ;;  %v2323_v21 = vmul.bf16 %v6903_v37, %v8949_v4  ;;  %v2322_v22 = vmul.bf16 %v6904_v30, %v8953_v1  ;;  %v2278_v8 = vshll.u32 %v5569_v3, 16 }
 0x164   : > { %2975 = vmatmul.mubr.bf16.gmra.mrb[56].mxu0 %v2273_v44  ;;  %v1644_v46 = vshll.u32 %v9221_v62, 16  ;;  %v9245_v5 = vcombine.low %v1530_v42, %v1531_v39  ;;  %v2433_v11 = vrot.slane %v2431_v63, 1  ;;  %v5572_v47 = vcombine.low %v2320_v14, %v2321_v56  ;;  %v6905_v63 = vld [vmem:[%s7043_s18 + $0x1c] sm:$0xf]  ;;  %v6907_v56 = vld [vmem:[%s7043_s18 + $0x2c] sm:$0xf] }
 0x165   : > { %2982 = vmatprep.mubr.bf16.mxu0 %v5553_v40  ;;  %v5505_v61 = vcombine.low %v9186_v27, %v9181_v12  ;;  %v1102_v9 = vrot.slane %v1100_v29, 7  ;;  %v1103_v38 = vshll.u32 %v9208_v57, 16  ;;  %v2280_v48 = vor.u32 %v2278_v8, %v2277_v18  ;;  %v6906_v27 = vld [vmem:[%s7043_s18 + $0x18] sm:$0xf]  ;;  %v6908_v18 = vld [vmem:[%s7043_s18 + $0x28] sm:$0xf] }
 0x166   : > { %v9250_v53 = vcombine.low %v1532_v28, %v1533_v50  ;;  %v2429_v3 = vshrl.u32 %v5570_v26, 16  ;;  %v2438_v44 = vrot.slane %v2436_v49, 1  ;;  %v9252_v37 = vcombine.low %v2322_v22, %v2323_v21  ;;  %v9967_v50 = vld [vmem:[#allocation50_spill] sm:$0xff]  ;;  %v6909_v21 = vld [vmem:[%s7043_s18 + $0x34] sm:$0xf] }
 0x167   : > { %v1098_v40 = vsel %vm265_vm1, %v9162_v23, %v1097_v25  ;;  %v1646_v39 = vrot.slane %v1644_v46, 1  ;;  %v1649_v42 = vshll.u32 %v9245_v5, 16  ;;  %v1535_v12 = vmul.bf16 %v6905_v63, %v8949_v4  ;;  %v6910_v22 = vld [vmem:[%s7043_s18 + $0x30] sm:$0xf] }
 0x168   : > { %v1534_v57 = vmul.bf16 %v6906_v27, %v8953_v1  ;;  %v2434_v29 = vor.u32 %v2433_v11, %v2429_v3  ;;  %v2444_v26 = vshll.u32 %v5572_v47, 16  ;;  %v2325_v14 = vmul.bf16 %v6907_v56, %v8967_v33  ;;  %v6912_v27 = vld [vmem:[%s7043_s18 + $0x20] sm:$0xf] }
 0x169   : > { %v2324_v23 = vmul.bf16 %v6908_v18, %v9967_v50  ;;  %v1105_v28 = vor.u32 %v1103_v38, %v1102_v9  ;;  %v1642_v25 = vshrl.u32 %v9221_v62, 16  ;;  %v1657_v4 = vshll.u32 %v9250_v53, 16 }
 0x16a   : > { %3441 = vmatmul.mubr.bf16.gmra.mrb[72].mxu1 %v1098_v40  ;;  %v2281_v49 = vsel %vm265_vm1, %v9194_v55, %v2280_v48  ;;  %v2452_v1 = vshll.u32 %v9252_v37, 16  ;;  %v2327_v30 = vmul.bf16 %v6909_v21, %v8975_v13  ;;  %v2326_v8 = vmul.bf16 %v6910_v22, %v8979_v32  ;;  %v6911_v40 = vld [vmem:[%s7043_s18 + $0x24] sm:$0xf] }
 0x16b   : > { %3448 = vmatprep.mubr.bf16.mxu1 %v5505_v61  ;;  %v2439_v46 = vsel %vm1640_vm8, %v2434_v29, %v2438_v44  ;;  %v1651_v11 = vrot.slane %v1649_v42, 1  ;;  %v2440_v62 = vshrl.u32 %v9217_v10, 16  ;;  %v9276_v61 = vcombine.low %v1534_v57, %v1535_v12  ;;  %v6917_v22 = vld [vmem:[%s7043_s18 + $0x44] sm:$0xf] }
 0x16c   : > { %2983 = vmatmul.mubr.bf16.gmra.mrb[60].mxu0 %v2281_v49  ;;  %v1647_v55 = vor.u32 %v1646_v39, %v1642_v25  ;;  %v2446_v9 = vrot.slane %v2444_v26, 1  ;;  %v9278_v38 = vcombine.low %v2324_v23, %v2325_v14  ;;  %v2448_v3 = vshrl.u32 %v5572_v47, 16  ;;  %v6913_v26 = vld [vmem:[%s7043_s18 + $0x2c] sm:$0xf]  ;;  %v6801_v14 = vld [vmem:[%s9690_s1 + $0x180] sm:$0xff]  }
 0x16d   : > { %6388 = vmatprep.mubr.bf16.mxu0 %v2439_v46  ;;  %v2442_v48 = vor.u32 %v2440_v62, %v2438_v44  ;;  %v1537_v63 = vmul.bf16 %v6911_v40, %v8967_v33  ;;  %v1536_v42 = vmul.bf16 %v6912_v27, %v9967_v50  ;;  %v1659_v29 = vrot.slane %v1657_v4, 1  ;;  %v6914_v44 = vld [vmem:[%s7043_s18 + $0x28] sm:$0xf]  ;;  %v6915_v50 = vld [vmem:[%s7043_s18 + $0x3c] sm:$0xf] }
 0x16e   : > { %v2454_v10 = vrot.slane %v2452_v1, 1  ;;  %v9284_v12 = vcombine.low %v2326_v8, %v2327_v30  ;;  %v1106_v39 = vsel %vm265_vm1, %v9215_v17, %v1105_v28  ;;  %v1665_v57 = vshll.u32 %v9276_v61, 16  ;;  %v6916_v28 = vld [vmem:[%s7043_s18 + $0x38] sm:$0xf]  ;;  %v6918_v46 = vld [vmem:[%s7043_s18 + $0x40] sm:$0xf] }
 0x16f   : > { %v1539_v47 = vmul.bf16 %v6913_v26, %v8975_v13  ;;  %v1538_v33 = vmul.bf16 %v6914_v44, %v8979_v32  ;;  %v1652_v56 = vsel %vm1640_vm8, %v1647_v55, %v1651_v11  ;;  %v2450_v18 = vor.u32 %v2448_v3, %v2446_v9  ;;  %v9968_v13 = vld [vmem:[#allocation8_spill] sm:$0xff] }
 0x170   : > { %v2460_v17 = vshll.u32 %v9278_v38, 16  ;;  %v2329_v23 = vmul.bf16 %v6915_v50, %v8993_v58  ;;  %v2328_v25 = vmul.bf16 %v6916_v28, %v9968_v13  ;;  %v6802_v32 = vld [vmem:[%s9690_s1 + $0x1c8] sm:$0xff]   ;;  %v1653_v4 = vshrl.u32 %v9245_v5, 16 }
 0x171   : > { %v1661_v49 = vshrl.u32 %v9250_v53, 16  ;;  %v9307_v1 = vcombine.low %v1536_v42, %v1537_v63  ;;  %v2447_v21 = vsel %vm1640_vm8, %v2442_v48, %v2446_v9  ;;  %v2468_v30 = vshll.u32 %v9284_v12, 16  ;;  %v6803_v9 = vld [vmem:[%s9690_s1 + $0x188] sm:$0xff]  }
 0x172   : > { %3449 = vmatmul.mubr.bf16.gmra.mrb[76].mxu1 %v1106_v39  ;;  %v2331_v8 = vmul.bf16 %v6917_v22, %v8999_v31  ;;  %v2330_v62 = vmul.bf16 %v6918_v46, %v9002_v19  ;;  %v2455_v55 = vsel %vm1640_vm8, %v2450_v18, %v2454_v10  ;;  %v1667_v3 = vrot.slane %v1665_v57, 1  ;;  %v6919_v57 = vld [vmem:[%s7043_s18 + $0x34] sm:$0xf]  ;;  %v6818_v18 = vld [vmem:[%s9690_s1 + $0x208] sm:$0xff]  }
 0x173   : > { %6436 = vmatprep.mubr.bf16.mxu1 %v1652_v56  ;;  %v2456_v5 = vshrl.u32 %v9252_v37, 16  ;;  %v9317_v53 = vcombine.low %v1538_v33, %v1539_v47  ;;  %v1655_v48 = vor.u32 %v1653_v4, %v1651_v11  ;;  %v1663_v40 = vor.u32 %v1661_v49, %v1659_v29  ;;  %v6804_v37 = vld [vmem:[%s9690_s1 + $0x1d0] sm:$0xff]  }
 0x174   : > { %6389 = vmatmul.mubr.bf16.vlgmr.msra.gmra.mrb[64].mxu0 %v2447_v21  ;;  %v2462_v63 = vrot.slane %v2460_v17, 1  ;;  %v9322_v27 = vcombine.low %v2328_v25, %v2329_v23  ;;  %v1673_v39 = vshll.u32 %v9307_v1, 16  ;;  %v1541_v26 = vmul.bf16 %v6919_v57, %v8993_v58  ;;  %v6920_v47 = vld [vmem:[%s7043_s18 + $0x30] sm:$0xf]  ;;  %v6921_v17 = vld [vmem:[%s7043_s18 + $0x3c] sm:$0xf] }
 0x175   : > { %6237 = vmatpush3.bf16.msra.mxu0 %v6801_v14  ;;  %6392 = vmatprep.mubr.bf16.mxu0 %v2455_v55  ;;  %v2458_v42 = vor.u32 %v2456_v5, %v2454_v10  ;;  %v1540_v11 = vmul.bf16 %v6920_v47, %v9968_v13  ;;  %v2464_v44 = vshrl.u32 %v9278_v38, 16  ;;  %v2470_v33 = vrot.slane %v2468_v30, 1  ;;  %v6922_v58 = vld [vmem:[%s7043_s18 + $0x38] sm:$0xf]  ;;  %v6805_v38 = vld [vmem:[%s9690_s1 + $0x190] sm:$0xff]   ;;  %v6811_v47 = vld [vmem:[%s9690_s1 + $0x1e8] sm:$0xff]  }
 0x176   : > { %6238 = vmatprep.subr.bf16.mxu0 %v6802_v32  ;;  %v9333_v56 = vcombine.low %v2330_v62, %v2331_v8  ;;  %v1660_v14 = vsel %vm1640_vm8, %v1655_v48, %v1659_v29  ;;  %v1681_v10 = vshll.u32 %v9317_v53, 16  ;;  %v1543_v50 = vmul.bf16 %v6921_v17, %v8999_v31  ;;  %v6806_v25 = vld [vmem:[%s9690_s1 + $0x1d8] sm:$0xff]   ;;  %v9969_v4 = vld [vmem:[#allocation49_spill] sm:$0xff] }
 0x177   : > { %v1542_v23 = vmul.bf16 %v6922_v58, %v9002_v19  ;;  %v1668_v28 = vsel %vm1640_vm8, %v1663_v40, %v1667_v3  ;;  %v2466_v29 = vor.u32 %v2464_v44, %v2462_v63  ;;  %v2476_v13 = vshll.u32 %v9322_v27, 16  ;;  %v6819_v22 = vld [vmem:[%s9690_s1 + $0x210] sm:$0xff]   ;;  %v6812_v58 = vld [vmem:[%s9690_s1 + $0x1a8] sm:$0xff]  }
 0x178   : > { %v1675_v31 = vrot.slane %v1673_v39, 1  ;;  %v5528_v32 = vcombine.low %v1540_v11, %v1541_v26  ;;  %v2463_v19 = vsel %vm1640_vm8, %v2458_v42, %v2462_v63  ;;  %v1669_v49 = vshrl.u32 %v9276_v61, 16  ;;  %v6807_v61 = vld [vmem:[%s9690_s1 + $0x198] sm:$0xff]  }
 0x179   : > { %6239 = vmatpush3.bf16.msra.mxu0 %v6803_v9  ;;  %v2484_v21 = vshll.u32 %v9333_v56, 16  ;;  %v2471_v30 = vsel %vm1640_vm8, %v2466_v29, %v2470_v33  ;;  %v1677_v8 = vshrl.u32 %v9307_v1, 16  ;;  %v1683_v46 = vrot.slane %v1681_v10, 1  ;;  %v6809_v9 = vld [vmem:[%s9690_s1 + $0x1e0] sm:$0xff]  }
 0x17a   : > { %6437 = vmatmul.mubr.bf16.vlgmr.msra.gmra.mrb[80].mxu1 %v1660_v14  ;;  %6240 = vmatprep.subr.bf16.mxu0 %v6804_v37  ;;  %v9361_v62 = vcombine.low %v1542_v23, %v1543_v50  ;;  %v1671_v55 = vor.u32 %v1669_v49, %v1667_v3  ;;  %v2478_v5 = vrot.slane %v2476_v13, 1  ;;  %v2472_v40 = vshrl.u32 %v9284_v12, 16  ;;  %v6820_v3 = vld [vmem:[%s9690_s1 + $0x218] sm:$0xff]   ;;  %v6810_v12 = vld [vmem:[%s9690_s1 + $0x1a0] sm:$0xff]   ;;  %v6814_v49 = vld [vmem:[%s9690_s1 + $0x1b0] sm:$0xff]  }
 0x17b   : > { %6440 = vmatprep.mubr.bf16.mxu1 %v1668_v28  ;;  %6469 = vmatpush3.bf16.msra.mxu1 %v9969_v4  ;;  %v1679_v48 = vor.u32 %v1677_v8, %v1675_v31  ;;  %v1689_v1 = vshll.u32 %v5528_v32, 16  ;;  %v2480_v63 = vshrl.u32 %v9322_v27, 16  ;;  %v2486_v37 = vrot.slane %v2484_v21, 1  ;;  %v6813_v28 = vld [vmem:[%s9690_s1 + $0x1f0] sm:$0xff]   ;;  %v4309_v8 = vld [vmem:[#allocation2 + $0x8] sm:$0xff] }
 0x17c   : > { %6393 = vmatmul.mubr.bf16.gmra.mrb[68].mxu0 %v2463_v19  ;;  %6470 = vmatprep.subr.bf16.mxu1 %v6818_v18  ;;  %v1676_v42 = vsel %vm1640_vm8, %v1671_v55, %v1675_v31  ;;  %v2474_v39 = vor.u32 %v2472_v40, %v2470_v33  ;;  %v1697_v57 = vshll.u32 %v9361_v62, 16  ;;  %v1685_v33 = vshrl.u32 %v9317_v53, 16  ;;  %v6822_v19 = vld [vmem:[%s9690_s1 + $0x228] sm:$0xff]   ;;  %v6824_v40 = vld [vmem:[%s9690_s1 + $0x238] sm:$0xff]  }
 0x17d   : > { %6241 = vmatpush3.bf16.msra.mxu0 %v6805_v38  ;;  %6396 = vmatprep.mubr.bf16.mxu0 %v2471_v30  ;;  %v1684_v26 = vsel %vm1640_vm8, %v1679_v48, %v1683_v46  ;;  %v2482_v27 = vor.u32 %v2480_v63, %v2478_v5  ;;  %v1691_v11 = vrot.slane %v1689_v1, 1  ;;  %v1693_v10 = vshrl.u32 %v5528_v32, 16  ;;  %v4312_v1 = vld [vmem:[#allocation2 + $0x20] sm:$0xff]  ;;  %v9972_v63 = vld [vmem:[#allocation14_spill] sm:$0xff] }
 0x17e   : > { %6242 = vmatprep.subr.bf16.mxu0 %v6806_v25  ;;  %v2479_v44 = vsel %vm1640_vm8, %v2474_v39, %v2478_v5  ;;  %v1699_v17 = vrot.slane %v1697_v57, 1  ;;  %v2488_v50 = vshrl.u32 %v9333_v56, 16  ;;  %v1687_v53 = vor.u32 %v1685_v33, %v1683_v46  ;;  %v9970_v46 = vld [vmem:[#allocation10_spill] sm:$0xff]  ;;  %v6823_v5 = vld [vmem:[%s9690_s1 + $0x230] sm:$0xff]   ;;  %v9975_v33 = vld [vmem:[#allocation23_spill] sm:$0xff] }
 0x17f   : > { %6471 = vmatpush3.bf16.msra.mxu1 %v6818_v18  ;;  %v2487_v14 = vsel %vm1640_vm8, %v2482_v27, %v2486_v37  ;;  %v6821_v18 = vld [vmem:[%s9690_s1 + $0x220] sm:$0xff]   ;;  %v1695_v29 = vor.u32 %v1693_v10, %v1691_v11  ;;  %v1701_v30 = vshrl.u32 %v9361_v62, 16  ;;  %v6816_v62 = vld [vmem:[%s9690_s1 + $0x1b8] sm:$0xff]   ;;  %v4314_v10 = vld [vmem:[#allocation2 + $0x30] sm:$0xff] }
 0x180   : > { %6472 = vmatprep.subr.bf16.mxu1 %v6819_v22  ;;  %v2490_v13 = vor.u32 %v2488_v50, %v2486_v37  ;;  %v1692_v31 = vsel %vm1640_vm8, %v1687_v53, %v1691_v11  ;;  %v4308_v37 = vld [vmem:[#allocation2] sm:$0xff]  ;;  %v4315_v27 = vld [vmem:[#allocation2 + $0x38] sm:$0xff]  ;;  %v9978_v53 = vld [vmem:[#allocation33_spill] sm:$0xff] }
 0x181   : > { %6243 = vmatpush3.bf16.msra.mxu0 %v6807_v61  ;;  %v1700_v4 = vsel %vm1640_vm8, %v1695_v29, %v1699_v17  ;;  %v1703_v55 = vor.u32 %v1701_v30, %v1699_v17  ;;  %v9977_v50 = vld [vmem:[#allocation30_spill] sm:$0xff]  ;;  %v4317_v29 = vld [vmem:[#allocation2 + $0x48] sm:$0xff]  ;;  %v4330_v30 = vld [vmem:[#allocation2 + $0xb0] sm:$0xff] }
 0x182   : > { %6441 = vmatmul.mubr.bf16.gmra.mrb[84].mxu1 %v1676_v42  ;;  %6244 = vmatprep.subr.bf16.mxu0 %v6809_v9  ;;  %v2495_v61 = vsel %vm1640_vm8, %v2490_v13, %v9970_v46  ;;  %v9971_v9 = vld [vmem:[#allocation9_spill] sm:$0xff]  ;;  %v4333_v46 = vld [vmem:[#allocation2 + $0xc8] sm:$0xff] }
 0x183   : > { %6444 = vmatprep.mubr.bf16.mxu1 %v1684_v26  ;;  %6473 = vmatpush3.bf16.msra.mxu1 %v6819_v22  ;;  %v6815_v22 = vld [vmem:[%s9690_s1 + $0x1f8] sm:$0xff]   ;;  %v1708_v48 = vsel %vm1640_vm8, %v1703_v55, %v9971_v9  ;;  %v9973_v26 = vld [vmem:[#allocation17_spill] sm:$0xff] }
 0x184   : > { %6397 = vmatmul.mubr.bf16.gmra.mrb[72].mxu0 %v2479_v44  ;;  %6474 = vmatprep.subr.bf16.mxu1 %v6820_v3  ;;  %v4311_v44 = vld [vmem:[#allocation2 + $0x18] sm:$0xff] }
 0x185   : > { %6245 = vmatpush3.bf16.msra.mxu0 %v6810_v12  ;;  %6400 = vmatprep.mubr.bf16.mxu0 %v2487_v14  ;;  %v4318_v14 = vld [vmem:[#allocation2 + $0x50] sm:$0xff] }
 0x186   : > { %6246 = vmatprep.subr.bf16.mxu0 %v6811_v47  ;;  %v9974_v47 = vld [vmem:[#allocation20_spill] sm:$0xff] }
 0x187   : > { %6475 = vmatpush3.bf16.msra.mxu1 %v6820_v3 }
 0x188   : > { %6476 = vmatprep.subr.bf16.mxu1 %v6821_v18 }
 0x189   : > { %6247 = vmatpush3.bf16.msra.mxu0 %v6812_v58 }
 0x18a   : > { %6445 = vmatmul.mubr.bf16.gmra.mrb[88].mxu1 %v1692_v31  ;;  %6248 = vmatprep.subr.bf16.mxu0 %v6813_v28  ;;  %v9979_v31 = vld [vmem:[#allocation34_spill] sm:$0xff] }
 0x18b   : > { %6448 = vmatprep.mubr.bf16.mxu1 %v1700_v4  ;;  %6477 = vmatpush3.bf16.msra.mxu1 %v6821_v18  ;;  %v9976_v18 = vld [vmem:[#allocation29_spill] sm:$0xff]  ;;  %v4327_v4 = vld [vmem:[#allocation2 + $0x98] sm:$0xff] }
 0x18c   : > { %6401 = vmatmul.mubr.bf16.gmra.mrb[76].mxu0 %v2495_v61  ;;  %6478 = vmatprep.subr.bf16.mxu1 %v6822_v19 }
 0x18d   : > { %v5980_v23 = vpop.f32.mrb[0].mxu0  ;;  %6249 = vmatpush3.bf16.msra.mxu0 %v6814_v49  ;;  %4581 = vmatprep.mubr.bf16.mxu0 %v4309_v8  ;;  %v4323_v49 = vld [vmem:[#allocation2 + $0x78] sm:$0xff] }
 0x18e   : > { %v5981_v38 = vpop.f32.mrb[1].mxu0  ;;  %6250 = vmatprep.subr.bf16.mxu0 %v6815_v22  ;;  %v4326_v22 = vld [vmem:[#allocation2 + $0x90] sm:$0xff] }
 0x18f   : > { %v9396_v25 = vadd.f32 %v5981_v38, %v5980_v23  ;;  %v5983_v56 = vpop.f32.mrb[2].mxu0  ;;  %6479 = vmatpush3.bf16.msra.mxu1 %v6822_v19  ;;  %v4321_v23 = vld [vmem:[#allocation2 + $0x68] sm:$0xff]  ;;  %v4320_v19 = vld [vmem:[#allocation2 + $0x60] sm:$0xff] }
 0x190   : > { %v5984_v32 = vpop.f32.mrb[3].mxu0  ;;  %6480 = vmatprep.subr.bf16.mxu1 %v6823_v5 }
 0x191   : > { %v9406_v21 = vadd.f32 %v5984_v32, %v5983_v56  ;;  %6251 = vmatpush3.bf16.msra.mxu0 %v6816_v62  ;;  %v4324_v32 = vld [vmem:[#allocation2 + $0x80] sm:$0xff] }
 0x192   : > { %6449 = vmatmul.mubr.bf16.gmra.mrb[92].mxu1 %v1708_v48 }
 0x193   : > { %6452 = vmatprep.mubr.bf16.mxu1 %v9972_v63  ;;  %6481 = vmatpush3.bf16.msra.mxu1 %v6823_v5  ;;  %v4334_v63 = vld [vmem:[#allocation2 + $0xd0] sm:$0xff] }
 0x194   : > { %4582 = vmatmul.mubr.bf16.vlgmr.msra.gmra.mrb[80].mxu0 %v4308_v37  ;;  %6482 = vmatprep.subr.bf16.mxu1 %v6824_v40 }
 0x195   : > { %4589 = vmatprep.mubr.bf16.mxu0 %v4312_v1 }
 0x197   : > { %6483 = vmatpush3.bf16.msra.mxu1 %v6824_v40 }
 0x19a   : > { %6453 = vmatmul.mubr.bf16.gmra.mrb[0].mxu1 %v9973_v26 }
 0x19b   : > { %6456 = vmatprep.mubr.bf16.mxu1 %v9974_v47 }
 0x19c   : > { %4590 = vmatmul.mubr.bf16.gmra.mrb[84].mxu0 %v4311_v44 }
 0x19d   : > { %4597 = vmatprep.mubr.bf16.mxu0 %v4315_v27  ;;  %v9981_v27 = vld [vmem:[#allocation46_spill] sm:$0xff] }
 0x19f   : > { %v5986_v42 = vpop.f32.mrb[4].mxu0 }
 0x1a0   : > { %v5987_v3 = vpop.f32.mrb[5].mxu0 }
 0x1a1   : > { %v9426_v39 = vadd.f32 %v5987_v3, %v5986_v42  ;;  %v5989_v57 = vpop.f32.mrb[6].mxu0  ;;  %v4332_v42 = vld [vmem:[#allocation2 + $0xc0] sm:$0xff] }
 0x1a2   : > { %v5990_v12 = vpop.f32.mrb[7].mxu0  ;;  %6457 = vmatmul.mubr.bf16.gmra.mrb[4].mxu1 %v9975_v33 }
 0x1a3   : > { %v9430_v11 = vadd.f32 %v5990_v12, %v5989_v57  ;;  %6460 = vmatprep.mubr.bf16.mxu1 %v9976_v18  ;;  %v9980_v12 = vld [vmem:[#allocation51_spill] sm:$0xff] }
 0x1a4   : > { %4598 = vmatmul.mubr.bf16.gmra.mrb[88].mxu0 %v4314_v10  ;;  %v9982_v47 = vcombine.low %v9980_v12, %v9981_v27  ;;  %v4337_v10 = vld [vmem:[#allocation2 + $0xe8] sm:$0xff] }
 0x1a5   : > { %4605 = vmatprep.mubr.bf16.mxu0 %v4318_v14 }
 0x1aa   : > { %6461 = vmatmul.mubr.bf16.gmra.mrb[8].mxu1 %v9977_v50  ;;  %v9983_v50 = vld [vmem:[#allocation44_spill] sm:$0xff] }
 0x1ab   : > { %6464 = vmatprep.mubr.bf16.mxu1 %v9978_v53  ;;  %v9984_v53 = vld [vmem:[#allocation55_spill] sm:$0xff] }
 0x1ac   : > { %4606 = vmatmul.mubr.bf16.gmra.mrb[92].mxu0 %v4317_v29 }
 0x1ad   : > { %v5992_v17 = vpop.f32.mrb[8].mxu0  ;;  %4613 = vmatprep.mubr.bf16.mxu0 %v4321_v23 }
 0x1ae   : > { %v5993_v58 = vpop.f32.mrb[9].mxu0 }
 0x1af   : > { %v9436_v28 = vadd.f32 %v5993_v58, %v5992_v17  ;;  %v5995_v38 = vpop.f32.mrb[10].mxu0  ;;  %v4340_v17 = vld [vmem:[#allocation2 + $0x100] sm:$0xff] }
 0x1b0   : > { %v5996_v13 = vpop.f32.mrb[11].mxu0 }
 0x1b1   : > { %v9438_v56 = vadd.f32 %v5996_v13, %v5995_v38  ;;  %v9985_v38 = vld [vmem:[#allocation54_spill] sm:$0xff] }
 0x1b2   : > { %6465 = vmatmul.mubr.bf16.gmra.mrb[12].mxu1 %v9979_v31  ;;  %v9986_v29 = vcombine.low %v9984_v53, %v9985_v38  ;;  %v4355_v38 = vld [vmem:[#allocation2 + $0x178] sm:$0xff] }
 0x1b3   : > { %6484 = vmatprep.mubr.bf16.mxu1 %v9123_v20 }
 0x1b4   : > { %4614 = vmatmul.mubr.bf16.gmra.mrb[96].mxu0 %v4320_v19 }
 0x1b5   : > { %4621 = vmatprep.mubr.bf16.mxu0 %v4324_v32 }
 0x1ba   : > { %6485 = vmatmul.mubr.bf16.vlgmr.msra.gmra.mrb[80].mxu1 %v9116_v60 }
 0x1bb   : > { %6488 = vmatprep.mubr.bf16.mxu1 %v9129_v34  ;;  %v4329_v34 = vld [vmem:[#allocation2 + $0xa8] sm:$0xff] }
 0x1bc   : > { %4622 = vmatmul.mubr.bf16.gmra.mrb[100].mxu0 %v4323_v49 }
 0x1bd   : > { %4629 = vmatprep.mubr.bf16.mxu0 %v4327_v4 }
 0x1c2   : > { %6489 = vmatmul.mubr.bf16.gmra.mrb[84].mxu1 %v9133_v52 }
 0x1c3   : > { %6492 = vmatprep.mubr.bf16.mxu1 %v9140_v6 }
 0x1c4   : > { %4630 = vmatmul.mubr.bf16.gmra.mrb[104].mxu0 %v4326_v22 }
 0x1c5   : > { %4637 = vmatprep.mubr.bf16.mxu0 %v4330_v30 }
 0x1c8   : > { %v5998_v20 = vpop.f32.mrb[12].mxu0 }
 0x1c9   : > { %v5999_v8 = vpop.f32.mrb[13].mxu0 }
 0x1ca   : > { %6493 = vmatmul.mubr.bf16.gmra.mrb[88].mxu1 %v9146_v35  ;;  %v9447_v60 = vadd.f32 %v5999_v8, %v5998_v20  ;;  %v6001_v61 = vpop.f32.mrb[14].mxu0 }
 0x1cb   : > { %6496 = vmatprep.mubr.bf16.mxu1 %v9160_v15  ;;  %v6002_v55 = vpop.f32.mrb[15].mxu0 }
 0x1cc   : > { %4638 = vmatmul.mubr.bf16.gmra.mrb[108].mxu0 %v4329_v34  ;;  %v9450_v52 = vadd.f32 %v6002_v55, %v6001_v61  ;;  %v4346_v61 = vld [vmem:[#allocation2 + $0x130] sm:$0xff]  ;;  %v9987_v34 = vld [vmem:[#allocation7_spill] sm:$0xff] }
 0x1cd   : > { %v6116_v5 = vpop.f32.mrb[16].mxu1  ;;  %4645 = vmatprep.mubr.bf16.mxu0 %v4333_v46  ;;  %v4343_v46 = vld [vmem:[#allocation2 + $0x118] sm:$0xff] }
 0x1ce   : > { %v6117_v6 = vpop.f32.mrb[17].mxu1 }
 0x1cf   : > { %v9452_v62 = vadd.f32 %v6117_v6, %v6116_v5  ;;  %v6119_v9 = vpop.f32.mrb[18].mxu1  ;;  %v9988_v5 = vld [vmem:[#allocation59_spill] sm:$0xff]  ;;  %v9989_v6 = vld [vmem:[#allocation58_spill] sm:$0xff] }
 0x1d0   : > { %v6120_v48 = vpop.f32.mrb[19].mxu1  ;;  %v6004_v40 = vpop.f32.mrb[16].mxu0 }
 0x1d1   : > { %v9454_v35 = vadd.f32 %v6120_v48, %v6119_v9  ;;  %v6005_v1 = vpop.f32.mrb[17].mxu0  ;;  %v9990_v9 = vcombine.low %v9988_v5, %v9989_v6 }
 0x1d2   : > { %6497 = vmatmul.mubr.bf16.gmra.mrb[92].mxu1 %v9175_v41  ;;  %v9457_v15 = vadd.f32 %v6005_v1, %v6004_v40  ;;  %v6007_v37 = vpop.f32.mrb[18].mxu0 }
 0x1d3   : > { %6500 = vmatprep.mubr.bf16.mxu1 %v4334_v63  ;;  %v6008_v3 = vpop.f32.mrb[19].mxu0 }
 0x1d4   : > { %4646 = vmatmul.mubr.bf16.gmra.mrb[112].mxu0 %v4332_v42  ;;  %v9459_v57 = vadd.f32 %v6008_v3, %v6007_v37  ;;  %v4349_v42 = vld [vmem:[#allocation2 + $0x148] sm:$0xff]  ;;  %v4352_v3 = vld [vmem:[#allocation2 + $0x160] sm:$0xff] }
 0x1d5   : > { %v6122_v26 = vpop.f32.mrb[20].mxu1  ;;  %4653 = vmatprep.mubr.bf16.mxu0 %v9982_v47 }
 0x1d6   : > { %v6123_v44 = vpop.f32.mrb[21].mxu1 }
 0x1d7   : > { %v9464_v33 = vadd.f32 %v6123_v44, %v6122_v26  ;;  %v6125_v14 = vpop.f32.mrb[22].mxu1 }
 0x1d8   : > { %v6126_v41 = vpop.f32.mrb[23].mxu1 }
 0x1d9   : > { %v9466_v18 = vadd.f32 %v6126_v41, %v6125_v14  ;;  %v9991_v14 = vcombine.low %v8731_v59, %v8725_v54 }
 0x1da   : > { %6501 = vmatmul.mubr.bf16.gmra.mrb[0].mxu1 %v4337_v10  ;;  %v6010_v58 = vpop.f32.mrb[20].mxu0 }
 0x1db   : > { %6504 = vmatprep.mubr.bf16.mxu1 %v4340_v17  ;;  %v6011_v13 = vpop.f32.mrb[21].mxu0 }
 0x1dc   : > { %4654 = vmatmul.mubr.bf16.gmra.mrb[116].mxu0 %v9983_v50  ;;  %v9472_v32 = vadd.f32 %v6011_v13, %v6010_v58  ;;  %v6013_v19 = vpop.f32.mrb[22].mxu0 }
 0x1dd   : > { %v6128_v23 = vpop.f32.mrb[24].mxu1  ;;  %4661 = vmatprep.mubr.bf16.mxu0 %v9986_v29  ;;  %v6014_v30 = vpop.f32.mrb[23].mxu0  ;;  %v9992_v29 = vcombine.low %v9931_v2, %v8787_v24  ;;  %v9993_v24 = vcombine.low %v9080_v16, %v9077_v51 }
 0x1de   : > { %v6129_v31 = vpop.f32.mrb[25].mxu1  ;;  %v9476_v20 = vadd.f32 %v6014_v30, %v6013_v19 }
 0x1df   : > { %v9474_v4 = vadd.f32 %v6129_v31, %v6128_v23  ;;  %v6131_v49 = vpop.f32.mrb[26].mxu1 }
 0x1e0   : > { %v6132_v22 = vpop.f32.mrb[27].mxu1 }
 0x1e1   : > { %v9478_v8 = vadd.f32 %v6132_v22, %v6131_v49 }
 0x1e2   : > { %6505 = vmatmul.mubr.bf16.gmra.mrb[4].mxu1 %v4343_v46 }
 0x1e3   : > { %6508 = vmatprep.mubr.bf16.mxu1 %v4346_v61 }
 0x1e4   : > { %4662 = vmatmul.mubr.bf16.gmra.mrb[120].mxu0 %v9987_v34 }
 0x1e5   : > { %v6134_v55 = vpop.f32.mrb[28].mxu1  ;;  %4669 = vmatprep.mubr.bf16.mxu0 %v9990_v9 }
 0x1e6   : > { %v6135_v48 = vpop.f32.mrb[29].mxu1 }
 0x1e7   : > { %v9484_v40 = vadd.f32 %v6135_v48, %v6134_v55  ;;  %v6137_v1 = vpop.f32.mrb[30].mxu1 }
 0x1e8   : > { %v6138_v63 = vpop.f32.mrb[31].mxu1 }
 0x1e9   : > { %v9486_v37 = vadd.f32 %v6138_v63, %v6137_v1  ;;  %v6016_v26 = vpop.f32.mrb[24].mxu0  ;;  %v9994_v63 = vld [vmem:[#allocation31_spill] sm:$0xff] }
 0x1ea   : > { %6509 = vmatmul.mubr.bf16.gmra.mrb[8].mxu1 %v4349_v42  ;;  %v6017_v12 = vpop.f32.mrb[25].mxu0  ;;  %v9995_v42 = vcombine.low %v9101_v36, %v9994_v63 }
 0x1eb   : > { %6512 = vmatprep.mubr.bf16.mxu1 %v4352_v3  ;;  %v9489_v27 = vadd.f32 %v6017_v12, %v6016_v26  ;;  %v6019_v47 = vpop.f32.mrb[26].mxu0 }
 0x1ec   : > { %4670 = vmatmul.mubr.bf16.gmra.mrb[124].mxu0 %v9050_v7  ;;  %v6020_v41 = vpop.f32.mrb[27].mxu0 }
 0x1ed   : > { %v6140_v44 = vpop.f32.mrb[32].mxu1  ;;  %4677 = vmatprep.mubr.bf16.mxu0 %v9991_v14  ;;  %v9494_v17 = vadd.f32 %v6020_v41, %v6019_v47 }
 0x1ee   : > { %v6141_v10 = vpop.f32.mrb[33].mxu1 }
 0x1ef   : > { %v9496_v50 = vadd.f32 %v6141_v10, %v6140_v44  ;;  %v6143_v58 = vpop.f32.mrb[34].mxu1  ;;  %v9996_v10 = vld [vmem:[#allocation32_spill] sm:$0xff] }
 0x1f0   : > { %v6144_v23 = vpop.f32.mrb[35].mxu1 }
 0x1f1   : > { %v9498_v53 = vadd.f32 %v6144_v23, %v6143_v58 }
 0x1f2   : > { %6513 = vmatmul.mubr.bf16.gmra.mrb[12].mxu1 %v4355_v38 }
 0x1f4   : > { %4678 = vmatmul.mubr.bf16.gmra.mrb[128].mxu0 %v9071_v0 }
 0x1f5   : > { %v6146_v7 = vpop.f32.mrb[36].mxu1  ;;  %4685 = vmatprep.mubr.bf16.mxu0 %v9992_v29 }
 0x1f6   : > { %v6147_v54 = vpop.f32.mrb[37].mxu1  ;;  %v6022_v31 = vpop.f32.mrb[28].mxu0 }
 0x1f7   : > { %v9504_v59 = vadd.f32 %v6147_v54, %v6146_v7  ;;  %v6149_v13 = vpop.f32.mrb[38].mxu1  ;;  %v6023_v49 = vpop.f32.mrb[29].mxu0 }
 0x1f8   : > { %v6150_v19 = vpop.f32.mrb[39].mxu1  ;;  %v9508_v22 = vadd.f32 %v6023_v49, %v6022_v31  ;;  %v6025_v46 = vpop.f32.mrb[30].mxu0 }
 0x1f9   : > { %v9506_v30 = vadd.f32 %v6150_v19, %v6149_v13  ;;  %v6026_v61 = vpop.f32.mrb[31].mxu0 }
 0x1fa   : > { %v9510_v34 = vadd.f32 %v6026_v61, %v6025_v46 }
 0x1fc   : > { %4686 = vmatmul.mubr.bf16.gmra.mrb[132].mxu0 %v9090_v45 }
 0x1fd   : > { %v6152_v0 = vpop.f32.mrb[40].mxu1  ;;  %4693 = vmatprep.mubr.bf16.mxu0 %v9993_v24 }
 0x1fe   : > { %v6153_v2 = vpop.f32.mrb[41].mxu1 }
 0x1ff   : > { %v9516_v55 = vadd.f32 %v6153_v2, %v6152_v0  ;;  %v6155_v5 = vpop.f32.mrb[42].mxu1 }
 0x200   : > { %v6156_v6 = vpop.f32.mrb[43].mxu1 }
 0x201   : > { %v9518_v9 = vadd.f32 %v6156_v6, %v6155_v5 }
 0x204   : > { %4694 = vmatmul.mubr.bf16.gmra.mrb[136].mxu0 %v9108_v43  ;;  %v6028_v1 = vpop.f32.mrb[32].mxu0 }
 0x205   : > { %v6158_v48 = vpop.f32.mrb[44].mxu1  ;;  %4701 = vmatprep.mubr.bf16.mxu0 %v9995_v42  ;;  %v6029_v3 = vpop.f32.mrb[33].mxu0 }
 0x206   : > { %v6159_v45 = vpop.f32.mrb[45].mxu1  ;;  %v6030_v16 = vadd.f32 %v6029_v3, %v6028_v1  ;;  %v6031_v12 = vpop.f32.mrb[34].mxu0 }
 0x207   : > { %v9524_v26 = vadd.f32 %v6159_v45, %v6158_v48  ;;  %v6161_v51 = vpop.f32.mrb[46].mxu1  ;;  %v6032_v44 = vpop.f32.mrb[35].mxu0 }
 0x208   : > { %v6162_v47 = vpop.f32.mrb[47].mxu1  ;;  %v6033_v41 = vadd.f32 %v6032_v44, %v6031_v12 }
 0x209   : > { %v9526_v14 = vadd.f32 %v6162_v47, %v6161_v51 }
 0x20c   : > { %4702 = vmatmul.mubr.bf16.gmra.mrb[140].mxu0 %v9996_v10 }
 0x20d   : > { %v6164_v43 = vpop.f32.mrb[48].mxu1 }
 0x20e   : > { %v6165_v58 = vpop.f32.mrb[49].mxu1  ;;  %v6034_v23 = vpop.f32.mrb[36].mxu0 }
 0x20f   : > { %v6166_v38 = vadd.f32 %v6165_v58, %v6164_v43  ;;  %v6167_v36 = vpop.f32.mrb[50].mxu1  ;;  %v6035_v7 = vpop.f32.mrb[37].mxu0 }
 0x210   : > { %v6168_v29 = vpop.f32.mrb[51].mxu1  ;;  %v6036_v54 = vadd.f32 %v6035_v7, %v6034_v23  ;;  %v6037_v13 = vpop.f32.mrb[38].mxu0 }
 0x211   : > { %v9529_v31 = vadd.f32 %v6166_v38, %v6030_v16  ;;  %v6169_v19 = vadd.f32 %v6168_v29, %v6167_v36  ;;  %v6038_v49 = vpop.f32.mrb[39].mxu0 }
 0x212   : > { %v6039_v46 = vadd.f32 %v6038_v49, %v6037_v13 }
 0x213   : > { %v9531_v61 = vadd.f32 %v6169_v19, %v6033_v41 }
 0x215   : > { %v6170_v0 = vpop.f32.mrb[52].mxu1 }
 0x216   : > { %v6171_v24 = vpop.f32.mrb[53].mxu1  ;;  %v6040_v6 = vpop.f32.mrb[40].mxu0 }
 0x217   : > { %v6172_v2 = vadd.f32 %v6171_v24, %v6170_v0  ;;  %v6173_v5 = vpop.f32.mrb[54].mxu1  ;;  %v6041_v1 = vpop.f32.mrb[41].mxu0 }
 0x218   : > { %v6174_v48 = vpop.f32.mrb[55].mxu1  ;;  %v6042_v45 = vadd.f32 %v6041_v1, %v6040_v6  ;;  %v6043_v3 = vpop.f32.mrb[42].mxu0 }
 0x219   : > { %v9533_v63 = vadd.f32 %v6172_v2, %v6036_v54  ;;  %v6175_v42 = vadd.f32 %v6174_v48, %v6173_v5  ;;  %v6044_v51 = vpop.f32.mrb[43].mxu0 }
 0x21a   : > { %v6045_v12 = vadd.f32 %v6044_v51, %v6043_v3 }
 0x21b   : > { %v9535_v16 = vadd.f32 %v6175_v42, %v6039_v46 }
 0x21d   : > { %v6176_v47 = vpop.f32.mrb[56].mxu1 }
 0x21e   : > { %v6177_v44 = vpop.f32.mrb[57].mxu1  ;;  %v6046_v43 = vpop.f32.mrb[44].mxu0 }
 0x21f   : > { %v6178_v41 = vadd.f32 %v6177_v44, %v6176_v47  ;;  %v6179_v10 = vpop.f32.mrb[58].mxu1  ;;  %v6047_v23 = vpop.f32.mrb[45].mxu0 }
 0x220   : > { %v6180_v58 = vpop.f32.mrb[59].mxu1  ;;  %v6048_v7 = vadd.f32 %v6047_v23, %v6046_v43  ;;  %v6049_v29 = vpop.f32.mrb[46].mxu0 }
 0x221   : > { %v9537_v38 = vadd.f32 %v6178_v41, %v6042_v45  ;;  %v6181_v36 = vadd.f32 %v6180_v58, %v6179_v10  ;;  %v6050_v54 = vpop.f32.mrb[47].mxu0 }
 0x222   : > { %v6051_v19 = vadd.f32 %v6050_v54, %v6049_v29 }
 0x223   : > { %v9539_v13 = vadd.f32 %v6181_v36, %v6045_v12 }
 0x225   : > { %v6182_v49 = vpop.f32.mrb[60].mxu1 }
 0x226   : > { %v6183_v46 = vpop.f32.mrb[61].mxu1 }
 0x227   : > { %v6184_v0 = vadd.f32 %v6183_v46, %v6182_v49  ;;  %v6185_v24 = vpop.f32.mrb[62].mxu1  ;;  %v6052_v2 = vpop.f32.mrb[48].mxu0 }
 0x228   : > { %v6186_v5 = vpop.f32.mrb[63].mxu1  ;;  %v6053_v6 = vpop.f32.mrb[49].mxu0 }
 0x229   : > { %v9541_v48 = vadd.f32 %v6184_v0, %v6048_v7  ;;  %v6187_v1 = vadd.f32 %v6186_v5, %v6185_v24  ;;  %v6054_v42 = vadd.f32 %v6053_v6, %v6052_v2  ;;  %v6055_v45 = vpop.f32.mrb[50].mxu0 }
 0x22a   : > { %v6056_v3 = vpop.f32.mrb[51].mxu0 }
 0x22b   : > { %v9543_v51 = vadd.f32 %v6187_v1, %v6051_v19  ;;  %v6057_v47 = vadd.f32 %v6056_v3, %v6055_v45 }
 0x22d   : > { %v6188_v44 = vpop.f32.mrb[64].mxu1 }
 0x22e   : > { %v6189_v12 = vpop.f32.mrb[65].mxu1 }
 0x22f   : > { %v6190_v41 = vadd.f32 %v6189_v12, %v6188_v44  ;;  %v6191_v10 = vpop.f32.mrb[66].mxu1  ;;  %v6058_v43 = vpop.f32.mrb[52].mxu0 }
 0x230   : > { %v6192_v58 = vpop.f32.mrb[67].mxu1  ;;  %v6059_v23 = vpop.f32.mrb[53].mxu0 }
 0x231   : > { %v9545_v36 = vadd.f32 %v6190_v41, %v6054_v42  ;;  %v6193_v29 = vadd.f32 %v6192_v58, %v6191_v10  ;;  %v6060_v54 = vadd.f32 %v6059_v23, %v6058_v43  ;;  %v6061_v7 = vpop.f32.mrb[54].mxu0 }
 0x232   : > { %v6062_v49 = vpop.f32.mrb[55].mxu0 }
 0x233   : > { %9997 = vst [vmem:[#allocation52_spill] sm:$0xff] %v9545_v36  ;;  %v9547_v46 = vadd.f32 %v6193_v29, %v6057_v47  ;;  %v6063_v0 = vadd.f32 %v6062_v49, %v6061_v7 }
 0x235   : > { %9998 = vst [vmem:[#allocation53_spill] sm:$0xff] %v9547_v46  ;;  %v6194_v24 = vpop.f32.mrb[68].mxu1 }
 0x236   : > { %v6195_v19 = vpop.f32.mrb[69].mxu1 }
 0x237   : > { %v6196_v2 = vadd.f32 %v6195_v19, %v6194_v24  ;;  %v6197_v5 = vpop.f32.mrb[70].mxu1  ;;  %v6064_v6 = vpop.f32.mrb[56].mxu0 }
 0x238   : > { %v6198_v1 = vpop.f32.mrb[71].mxu1  ;;  %v6065_v45 = vpop.f32.mrb[57].mxu0 }
 0x239   : > { %v9549_v3 = vadd.f32 %v6196_v2, %v6060_v54  ;;  %v6199_v44 = vadd.f32 %v6198_v1, %v6197_v5  ;;  %v6066_v12 = vadd.f32 %v6065_v45, %v6064_v6  ;;  %v6067_v42 = vpop.f32.mrb[58].mxu0 }
 0x23a   : > { %v6068_v41 = vpop.f32.mrb[59].mxu0 }
 0x23b   : > { %v9551_v10 = vadd.f32 %v6199_v44, %v6063_v0  ;;  %v6069_v43 = vadd.f32 %v6068_v41, %v6067_v42 }
 0x23d   : > { %9999 = vst [vmem:[#allocation35_spill] sm:$0xff] %v9551_v10  ;;  %v6200_v58 = vpop.f32.mrb[72].mxu1 }
 0x23e   : > { %v6201_v47 = vpop.f32.mrb[73].mxu1 }
 0x23f   : > { %v6202_v23 = vadd.f32 %v6201_v47, %v6200_v58  ;;  %v6203_v29 = vpop.f32.mrb[74].mxu1  ;;  %v6070_v7 = vpop.f32.mrb[60].mxu0 }
 0x240   : > { %v6204_v49 = vpop.f32.mrb[75].mxu1  ;;  %v6071_v24 = vpop.f32.mrb[61].mxu0 }
 0x241   : > { %v9553_v19 = vadd.f32 %v6202_v23, %v6066_v12  ;;  %v6205_v46 = vadd.f32 %v6204_v49, %v6203_v29  ;;  %v6072_v36 = vadd.f32 %v6071_v24, %v6070_v7  ;;  %v6073_v54 = vpop.f32.mrb[62].mxu0 }
 0x242   : > { %v6074_v2 = vpop.f32.mrb[63].mxu0 }
 0x243   : > { %v9555_v5 = vadd.f32 %v6205_v46, %v6069_v43  ;;  %v6075_v6 = vadd.f32 %v6074_v2, %v6073_v54 }
 0x245   : > { %v6206_v1 = vpop.f32.mrb[76].mxu1 }
 0x246   : > { %v6207_v0 = vpop.f32.mrb[77].mxu1 }
 0x247   : > { %v6208_v45 = vadd.f32 %v6207_v0, %v6206_v1  ;;  %v6209_v44 = vpop.f32.mrb[78].mxu1  ;;  %v6390_v42 = vpop.f32.mrb[64].mxu0 }
 0x248   : > { %v6210_v41 = vpop.f32.mrb[79].mxu1  ;;  %v3034_v58 = vadd.f32 %v6390_v42, %v9426_v39  ;;  %v3025_v47 = vpop.f32.mrb[65].mxu0 }
 0x249   : > { %v9558_v10 = vadd.f32 %v6208_v45, %v6072_v36  ;;  %v6211_v12 = vadd.f32 %v6210_v41, %v6209_v44  ;;  %v3026_v23 = vadd.f32 %v9396_v25, %v3025_v47  ;;  %v6391_v29 = vpop.f32.mrb[66].mxu0 }
 0x24a   : > { %v3339_v7 = vadd.f32 %v9464_v33, %v3034_v58  ;;  %v3037_v46 = vadd.f32 %v6391_v29, %v9430_v11  ;;  %v3028_v43 = vpop.f32.mrb[67].mxu0 }
 0x24b   : > { %v9563_v49 = vadd.f32 %v6211_v12, %v6075_v6  ;;  %v3331_v24 = vadd.f32 %v9452_v62, %v3026_v23  ;;  %v3029_v54 = vadd.f32 %v9406_v21, %v3028_v43 }
 0x24c   : > { %v3342_v39 = vadd.f32 %v9466_v18, %v3037_v46 }
 0x24d   : > { %v3334_v36 = vadd.f32 %v9454_v35, %v3029_v54 }
 0x24f   : > { %v6394_v2 = vpop.f32.mrb[68].mxu0 }
 0x250   : > { %v3050_v1 = vadd.f32 %v6394_v2, %v9447_v60  ;;  %v3041_v25 = vpop.f32.mrb[69].mxu0 }
 0x251   : > { %v3042_v0 = vadd.f32 %v9436_v28, %v3041_v25  ;;  %v6395_v33 = vpop.f32.mrb[70].mxu0 }
 0x252   : > { %v9572_v11 = vadd.f32 %v9484_v40, %v3050_v1  ;;  %v3053_v6 = vadd.f32 %v6395_v33, %v9450_v52  ;;  %v3044_v45 = vpop.f32.mrb[71].mxu0 }
 0x253   : > { %v3347_v62 = vadd.f32 %v9474_v4, %v3042_v0  ;;  %v3045_v21 = vadd.f32 %v9438_v56, %v3044_v45 }
 0x254   : > { %v3358_v18 = vadd.f32 %v9486_v37, %v3053_v6 }
 0x255   : > { %v3350_v35 = vadd.f32 %v9478_v8, %v3045_v21 }
 0x257   : > { %v6398_v44 = vpop.f32.mrb[72].mxu0 }
 0x258   : > { %v3066_v60 = vadd.f32 %v6398_v44, %v9472_v32  ;;  %v3057_v42 = vpop.f32.mrb[73].mxu0 }
 0x259   : > { %v3058_v28 = vadd.f32 %v9457_v15, %v3057_v42  ;;  %v6399_v41 = vpop.f32.mrb[74].mxu0 }
 0x25a   : > { %v9582_v40 = vadd.f32 %v9504_v59, %v3066_v60  ;;  %v3069_v52 = vadd.f32 %v6399_v41, %v9476_v20  ;;  %v3060_v58 = vpop.f32.mrb[75].mxu0 }
 0x25b   : > { %v3363_v4 = vadd.f32 %v9496_v50, %v3058_v28  ;;  %v3061_v56 = vadd.f32 %v9459_v57, %v3060_v58 }
 0x25c   : > { %v9588_v37 = vadd.f32 %v9506_v30, %v3069_v52  ;;  %v5098_v52 = vpop.permute.xlu0 %5097 }
 0x25d   : > { %v3366_v8 = vadd.f32 %v9498_v53, %v3061_v56 }
 0x25f   : > { %v6402_v32 = vpop.f32.mrb[76].mxu0 }
 0x260   : > { %v3082_v47 = vadd.f32 %v6402_v32, %v9508_v22  ;;  %v3073_v15 = vpop.f32.mrb[77].mxu0 }
 0x261   : > { %v3074_v12 = vadd.f32 %v9489_v27, %v3073_v15  ;;  %v6403_v59 = vpop.f32.mrb[78].mxu0 }
 0x262   : > { %v9594_v23 = vadd.f32 %v9524_v26, %v3082_v47  ;;  %v3085_v20 = vadd.f32 %v6403_v59, %v9510_v34  ;;  %v3076_v50 = vpop.f32.mrb[79].mxu0 }
 0x263   : > { %v9598_v57 = vadd.f32 %v9516_v55, %v3074_v12  ;;  %v3077_v30 = vadd.f32 %v9494_v17, %v3076_v50 }
 0x264   : > { %v9602_v53 = vadd.f32 %v9526_v14, %v3085_v20 }
 0x265   : > { %v9605_v22 = vadd.f32 %v9518_v9, %v3077_v30 }
 0x267   : > { %v6252_v29 = vpop.f32.mrb[80].mxu0 }
 0x268   : > { %v6253_v27 = vpop.f32.mrb[81].mxu0 }
 0x269   : > { %v6254_v46 = vadd.f32 %v6253_v27, %v6252_v29  ;;  %v6255_v43 = vpop.f32.mrb[82].mxu0 }
 0x26a   : > { %v6256_v26 = vpop.f32.mrb[83].mxu0 }
 0x26b   : > { %v6257_v54 = vadd.f32 %v6256_v26, %v6255_v43  ;;  %v6538_v2 = vadd.f32 %v6254_v46, %v3331_v24 }
 0x26d   : > { %v6546_v34 = vadd.f32 %v6257_v54, %v3334_v36  ;;  %v5103_v36 = vpop.permute.xlu1 %5102 }
 0x26f   : > { %v6258_v1 = vpop.f32.mrb[84].mxu0 }
 0x270   : > { %v6259_v25 = vpop.f32.mrb[85].mxu0 }
 0x271   : > { %v6260_v55 = vadd.f32 %v6259_v25, %v6258_v1  ;;  %v6261_v0 = vpop.f32.mrb[86].mxu0  ;;  %v5113_v59 = vpop.permute.xlu1 %5112 }
 0x272   : > { %v6262_v33 = vpop.f32.mrb[87].mxu0 }
 0x273   : > { %v6263_v17 = vadd.f32 %v6262_v33, %v6261_v0  ;;  %v6534_v6 = vadd.f32 %v6260_v55, %v3339_v7 }
 0x275   : > { %v6542_v14 = vadd.f32 %v6263_v17, %v3342_v39  ;;  %v5108_v39 = vpop.permute.xlu0 %5107  ;;  %v9612_v43 = vpop.permute.xlu1 %5122 }
 0x277   : > { %v6264_v45 = vpop.f32.mrb[88].mxu0 }
 0x278   : > { %v6265_v21 = vpop.f32.mrb[89].mxu0 }
 0x279   : > { %v6266_v9 = vadd.f32 %v6265_v21, %v6264_v45  ;;  %v6267_v44 = vpop.f32.mrb[90].mxu0 }
 0x27a   : > { %v6268_v60 = vpop.f32.mrb[91].mxu0 }
 0x27b   : > { %v6269_v42 = vadd.f32 %v6268_v60, %v6267_v44  ;;  %v6554_v28 = vadd.f32 %v6266_v9, %v3347_v62  ;;  %v5133_v44 = vpop.permute.xlu1 %5132 }
 0x27d   : > { %v9607_v41 = vadd.f32 %v6269_v42, %v3350_v35  ;;  %v5118_v35 = vpop.permute.xlu0 %5117 }
 0x27f   : > { %v6270_v24 = vpop.f32.mrb[92].mxu0 }
 0x280   : > { %v6271_v58 = vpop.f32.mrb[93].mxu0 }
 0x281   : > { %v6272_v56 = vadd.f32 %v6271_v58, %v6270_v24  ;;  %v6273_v32 = vpop.f32.mrb[94].mxu0  ;;  %v5128_v17 = vpop.permute.xlu0 %5127 }
 0x282   : > { %v6274_v47 = vpop.f32.mrb[95].mxu0 }
 0x283   : > { %v6275_v15 = vadd.f32 %v6274_v47, %v6273_v32  ;;  %v6550_v7 = vadd.f32 %v6272_v56, %v9572_v11 }
 0x285   : > { %v6558_v12 = vadd.f32 %v6275_v15, %v3358_v18 }
 0x287   : > { %v6276_v20 = vpop.f32.mrb[96].mxu0 }
 0x288   : > { %v6277_v50 = vpop.f32.mrb[97].mxu0 }
 0x289   : > { %v6278_v30 = vadd.f32 %v6277_v50, %v6276_v20  ;;  %v6279_v62 = vpop.f32.mrb[98].mxu0 }
 0x28a   : > { %v6280_v29 = vpop.f32.mrb[99].mxu0 }
 0x28b   : > { %v6281_v27 = vadd.f32 %v6280_v29, %v6279_v62  ;;  %v9610_v46 = vadd.f32 %v6278_v30, %v3363_v4  ;;  %v5138_v30 = vpop.permute.xlu0 %5137 }
 0x28d   : > { %v6486_v26 = vpop.f32.mrb[80].mxu1  ;;  %v9615_v11 = vadd.f32 %v6281_v27, %v3366_v8 }
 0x28e   : > { %v6535_v54 = vadd.f32 %v6534_v6, %v6486_v26  ;;  %v4744_v1 = vpop.f32.mrb[81].mxu1 }
 0x28f   : > { %v6539_v25 = vadd.f32 %v6538_v2, %v4744_v1  ;;  %v6487_v18 = vpop.f32.mrb[82].mxu1  ;;  %v6282_v55 = vpop.f32.mrb[100].mxu0 }
 0x290   : > { %v6543_v0 = vadd.f32 %v6542_v14, %v6487_v18  ;;  %v4747_v33 = vpop.f32.mrb[83].mxu1  ;;  %v6283_v45 = vpop.f32.mrb[101].mxu0  ;;  %v5257_v60 = vmul.f32 %v6535_v54, %v5108_v39 }
 0x291   : > { %v5255_v21 = vmul.f32 %v6539_v25, %v5098_v52  ;;  %v6547_v4 = vadd.f32 %v6546_v34, %v4747_v33  ;;  %v6284_v6 = vadd.f32 %v6283_v45, %v6282_v55  ;;  %v6285_v9 = vpop.f32.mrb[102].mxu0 }
 0x292   : > { %v5877_v8 = vpack.c.bf16 %v6543_v0, %v6535_v54  ;;  %v6286_v2 = vpop.f32.mrb[103].mxu0  ;;  %v5258_v58 = vmul.f32 %v6543_v0, %v5113_v59  ;;  %v5327_v62 = vmul.f32 %v6535_v54, %v5257_v60 }
 0x293   : > { %v5872_v42 = vpack.c.bf16 %v6547_v4, %v6539_v25  ;;  %v5256_v14 = vmul.f32 %v6547_v4, %v5103_v36  ;;  %v6287_v24 = vadd.f32 %v6286_v2, %v6285_v9  ;;  %v6566_v52 = vadd.f32 %v6284_v6, %v9582_v40  ;;  %v5143_v40 = vpop.permute.xlu1 %5142 }
 0x294   : > { %5949 = vst [vmem:[%s9620_s19 + $0x8] sm:$0xff] %v5877_v8   ;;  %v5325_v56 = vmul.f32 %v6539_v25, %v5255_v21  ;;  %v5328_v1 = vmul.f32 %v6543_v0, %v5258_v58 }
 0x295   : > { %5873 = vst [vmem:[%s9620_s19] sm:$0xff] %v5872_v42   ;;  %v5287_v32 = vadd.f32 %v5256_v14, %v5255_v21  ;;  %v5326_v47 = vmul.f32 %v6547_v4, %v5256_v14  ;;  %v6490_v15 = vpop.f32.mrb[84].mxu1  ;;  %v6574_v50 = vadd.f32 %v6287_v24, %v9588_v37 }
 0x296   : > { %v6551_v20 = vadd.f32 %v6550_v7, %v6490_v15  ;;  %v4760_v34 = vpop.f32.mrb[85].mxu1 }
 0x297   : > { %v5288_v29 = vadd.f32 %v5287_v32, %v5257_v60  ;;  %v5357_v39 = vadd.f32 %v5326_v47, %v5325_v56  ;;  %v6555_v27 = vadd.f32 %v6554_v28, %v4760_v34  ;;  %v6491_v36 = vpop.f32.mrb[86].mxu1  ;;  %v6288_v26 = vpop.f32.mrb[104].mxu0 }
 0x298   : > { %v6559_v59 = vadd.f32 %v6558_v12, %v6491_v36  ;;  %v4763_v18 = vpop.f32.mrb[87].mxu1  ;;  %v6289_v25 = vpop.f32.mrb[105].mxu0  ;;  %v5261_v12 = vmul.f32 %v6551_v20, %v5128_v17 }
 0x299   : > { %v5358_v55 = vadd.f32 %v5357_v39, %v5327_v62  ;;  %v5259_v33 = vmul.f32 %v6555_v27, %v5118_v35  ;;  %v5289_v45 = vadd.f32 %v5288_v29, %v5258_v58  ;;  %v6563_v7 = vadd.f32 %v9607_v41, %v4763_v18  ;;  %v6291_v37 = vpop.f32.mrb[106].mxu0  ;;  %v5148_v35 = vpop.permute.xlu0 %5147 }
 0x29a   : > { %v6290_v21 = vadd.f32 %v6289_v25, %v6288_v26  ;;  %v5887_v54 = vpack.c.bf16 %v6559_v59, %v6551_v20  ;;  %v6292_v4 = vpop.f32.mrb[107].mxu0  ;;  %v5262_v14 = vmul.f32 %v6559_v59, %v5133_v44  ;;  %v5153_v15 = vpop.permute.xlu1 %5152  ;;  %v5331_v29 = vmul.f32 %v6551_v20, %v5261_v12 }
 0x29b   : > { %v5290_v6 = vadd.f32 %v5289_v45, %v5259_v33  ;;  %v5329_v28 = vmul.f32 %v6555_v27, %v5259_v33  ;;  %v5359_v9 = vadd.f32 %v5358_v55, %v5328_v1  ;;  %v5882_v8 = vpack.c.bf16 %v6563_v7, %v6555_v27 }
 0x29c   : > { %v6293_v0 = vadd.f32 %v6292_v4, %v6291_v37  ;;  %5951 = vst [vmem:[%s9620_s19 + $0x18] sm:$0xff] %v5887_v54   ;;  %v5260_v2 = vmul.f32 %v6563_v7, %v9612_v43  ;;  %v6586_v60 = vadd.f32 %v6290_v21, %v9598_v57  ;;  %v5332_v18 = vmul.f32 %v6559_v59, %v5262_v14 }
 0x29d   : > { %v5360_v42 = vadd.f32 %v5359_v9, %v5329_v28  ;;  %5950 = vst [vmem:[%s9620_s19 + $0x10] sm:$0xff] %v5882_v8   ;;  %v6494_v41 = vpop.f32.mrb[88].mxu1  ;;  %v5158_v55 = vpop.permute.xlu0 %5157 }
 0x29e   : > { %v5291_v24 = vadd.f32 %v5290_v6, %v5260_v2  ;;  %v5330_v58 = vmul.f32 %v6563_v7, %v5260_v2  ;;  %v6567_v56 = vadd.f32 %v6566_v52, %v6494_v41  ;;  %v4776_v32 = vpop.f32.mrb[89].mxu1  ;;  %v6594_v47 = vadd.f32 %v6293_v0, %v9605_v22  ;;  %v5163_v6 = vpop.permute.xlu1 %5162 }
 0x29f   : > { %v6571_v34 = vadd.f32 %v9610_v46, %v4776_v32  ;;  %v6495_v17 = vpop.f32.mrb[90].mxu1  ;;  %v6294_v62 = vpop.f32.mrb[108].mxu0 }
 0x2a0   : > { %v5292_v43 = vadd.f32 %v5291_v24, %v5261_v12  ;;  %v5361_v39 = vadd.f32 %v5360_v42, %v5330_v58  ;;  %v6575_v57 = vadd.f32 %v6574_v50, %v6495_v17  ;;  %v4779_v27 = vpop.f32.mrb[91].mxu1  ;;  %v6295_v36 = vpop.f32.mrb[109].mxu0  ;;  %v5265_v33 = vmul.f32 %v6567_v56, %v5148_v35 }
 0x2a1   : > { %v5263_v44 = vmul.f32 %v6571_v34, %v5138_v30  ;;  %v6579_v26 = vadd.f32 %v9615_v11, %v4779_v27  ;;  %v6296_v1 = vadd.f32 %v6295_v36, %v6294_v62  ;;  %v6297_v52 = vpop.f32.mrb[110].mxu0  ;;  %v5168_v32 = vpop.permute.xlu0 %5167 }
 0x2a2   : > { %v5362_v22 = vadd.f32 %v5361_v39, %v5331_v29  ;;  %v5293_v25 = vadd.f32 %v5292_v43, %v5262_v14  ;;  %v6298_v46 = vpop.f32.mrb[111].mxu0  ;;  %v5897_v20 = vpack.c.bf16 %v6575_v57, %v6567_v56  ;;  %v5266_v30 = vmul.f32 %v6575_v57, %v5153_v15 }
 0x2a3   : > { %v5333_v45 = vmul.f32 %v6571_v34, %v5263_v44  ;;  %v5892_v7 = vpack.c.bf16 %v6579_v26, %v6571_v34  ;;  %v6299_v21 = vadd.f32 %v6298_v46, %v6297_v52  ;;  %v5264_v54 = vmul.f32 %v6579_v26, %v5143_v40 }
 0x2a4   : > { %v5294_v50 = vadd.f32 %v5293_v25, %v5263_v44  ;;  %v5363_v37 = vadd.f32 %v5362_v22, %v5332_v18  ;;  %5953 = vst [vmem:[%s9620_s19 + $0x28] sm:$0xff] %v5897_v20   ;;  %v6582_v4 = vadd.f32 %v6296_v1, %v9594_v23  ;;  %v5335_v14 = vmul.f32 %v6567_v56, %v5265_v33  ;;  %v5173_v44 = vpop.permute.xlu1 %5172 }
 0x2a5   : > { %5952 = vst [vmem:[%s9620_s19 + $0x20] sm:$0xff] %v5892_v7   ;;  %v6498_v11 = vpop.f32.mrb[92].mxu1  ;;  %v5334_v9 = vmul.f32 %v6579_v26, %v5264_v54  ;;  %v6590_v0 = vadd.f32 %v6299_v21, %v9602_v53  ;;  %v5336_v34 = vmul.f32 %v6575_v57, %v5266_v30  ;;  %v5178_v20 = vpop.permute.xlu0 %5177 }
 0x2a6   : > { %v5364_v59 = vadd.f32 %v5363_v37, %v5333_v45  ;;  %v5295_v28 = vadd.f32 %v5294_v50, %v5264_v54  ;;  %v4792_v8 = vpop.f32.mrb[93].mxu1  ;;  %v6583_v12 = vadd.f32 %v6582_v4, %v6498_v11 }
 0x2a7   : > { %v6587_v2 = vadd.f32 %v6586_v60, %v4792_v8  ;;  %v6499_v35 = vpop.f32.mrb[94].mxu1  ;;  %v6300_v42 = vpop.f32.mrb[112].mxu0 }
 0x2a8   : > { %v5296_v41 = vadd.f32 %v5295_v28, %v5265_v33  ;;  %v5365_v40 = vadd.f32 %v5364_v59, %v5334_v9  ;;  %v6591_v24 = vadd.f32 %v6590_v0, %v6499_v35  ;;  %v4795_v58 = vpop.f32.mrb[95].mxu1  ;;  %v6301_v15 = vpop.f32.mrb[113].mxu0  ;;  %v5269_v27 = vmul.f32 %v6583_v12, %v5168_v32 }
 0x2a9   : > { %v5267_v23 = vmul.f32 %v6587_v2, %v5158_v55  ;;  %v6595_v17 = vadd.f32 %v6594_v47, %v4795_v58  ;;  %v6302_v62 = vadd.f32 %v6301_v15, %v6300_v42  ;;  %v6303_v29 = vpop.f32.mrb[114].mxu0  ;;  %v5183_v28 = vpop.permute.xlu1 %5182 }
 0x2aa   : > { %v5366_v43 = vadd.f32 %v5365_v40, %v5335_v14  ;;  %v5297_v53 = vadd.f32 %v5296_v41, %v5266_v30  ;;  %v5907_v39 = vpack.c.bf16 %v6591_v24, %v6583_v12  ;;  %v6304_v60 = vpop.f32.mrb[115].mxu0  ;;  %v5270_v57 = vmul.f32 %v6591_v24, %v5173_v44 }
 0x2ab   : > { %v5337_v36 = vmul.f32 %v6587_v2, %v5267_v23  ;;  %v5902_v56 = vpack.c.bf16 %v6595_v17, %v6587_v2  ;;  %v6305_v26 = vadd.f32 %v6304_v60, %v6303_v29  ;;  %v5268_v18 = vmul.f32 %v6595_v17, %v5163_v6  ;;  %v5188_v29 = vpop.permute.xlu0 %5187 }
 0x2ac   : > { %v5298_v1 = vadd.f32 %v5297_v53, %v5267_v23  ;;  %v5367_v52 = vadd.f32 %v5366_v43, %v5336_v34  ;;  %5955 = vst [vmem:[%s9620_s19 + $0x38] sm:$0xff] %v5907_v39   ;;  %v6600_v47 = vadd.f32 %v9529_v31, %v6302_v62  ;;  %v5339_v37 = vmul.f32 %v6583_v12, %v5269_v27 }
 0x2ad   : > { %5954 = vst [vmem:[%s9620_s19 + $0x30] sm:$0xff] %v5902_v56   ;;  %v6502_v22 = vpop.f32.mrb[0].mxu1  ;;  %v5338_v46 = vmul.f32 %v6595_v17, %v5268_v18  ;;  %v6606_v45 = vadd.f32 %v9531_v61, %v6305_v26  ;;  %v5340_v8 = vmul.f32 %v6591_v24, %v5270_v57 }
 0x2ae   : > { %v5368_v25 = vadd.f32 %v5367_v52, %v5337_v36  ;;  %v5299_v55 = vadd.f32 %v5298_v1, %v5268_v18  ;;  %v4808_v33 = vpop.f32.mrb[1].mxu1 }
 0x2af   : > { %v6601_v7 = vadd.f32 %v6600_v47, %v4808_v33  ;;  %v6503_v21 = vpop.f32.mrb[2].mxu1  ;;  %v6306_v50 = vpop.f32.mrb[116].mxu0 }
 0x2b0   : > { %v5300_v54 = vadd.f32 %v5299_v55, %v5269_v27  ;;  %v5369_v30 = vadd.f32 %v5368_v25, %v5338_v46  ;;  %v4811_v11 = vpop.f32.mrb[3].mxu1  ;;  %v6307_v4 = vpop.f32.mrb[117].mxu0 }
 0x2b1   : > { %v5271_v6 = vmul.f32 %v6601_v7, %v5178_v20  ;;  %v6607_v59 = vadd.f32 %v6606_v45, %v4811_v11  ;;  %v6308_v31 = vadd.f32 %v6307_v4, %v6306_v50  ;;  %v6309_v9 = vpop.f32.mrb[118].mxu0  ;;  %v5198_v50 = vpop.permute.xlu0 %5197 }
 0x2b2   : > { %v5370_v0 = vadd.f32 %v5369_v30, %v5339_v37  ;;  %v5301_v2 = vadd.f32 %v5300_v54, %v5270_v57  ;;  %v6310_v35 = vpop.f32.mrb[119].mxu0 }
 0x2b3   : > { %v5341_v61 = vmul.f32 %v6601_v7, %v5271_v6  ;;  %v5912_v42 = vpack.c.bf16 %v6607_v59, %v6601_v7  ;;  %v5272_v14 = vmul.f32 %v6607_v59, %v5183_v28  ;;  %v6311_v41 = vadd.f32 %v6310_v35, %v6309_v9 }
 0x2b4   : > { %v6597_v12 = vadd.f32 %v9533_v63, %v6308_v31  ;;  %v5302_v40 = vadd.f32 %v5301_v2, %v5271_v6  ;;  %v5371_v58 = vadd.f32 %v5370_v0, %v5340_v8  ;;  %v5193_v63 = vpop.permute.xlu1 %5192 }
 0x2b5   : > { %5956 = vst [vmem:[%s9620_s19 + $0x40] sm:$0xff] %v5912_v42   ;;  %v5342_v32 = vmul.f32 %v6607_v59, %v5272_v14  ;;  %v6506_v15 = vpop.f32.mrb[4].mxu1  ;;  %v6603_v17 = vadd.f32 %v9535_v16, %v6311_v41 }
 0x2b6   : > { %v6598_v34 = vadd.f32 %v6597_v12, %v6502_v22  ;;  %v5372_v23 = vadd.f32 %v5371_v58, %v5341_v61  ;;  %v5303_v62 = vadd.f32 %v5302_v40, %v5272_v14  ;;  %v4824_v24 = vpop.f32.mrb[5].mxu1 }
 0x2b7   : > { %v6507_v43 = vpop.f32.mrb[6].mxu1  ;;  %v6312_v53 = vpop.f32.mrb[120].mxu0  ;;  %v6604_v60 = vadd.f32 %v6603_v17, %v6503_v21 }
 0x2b8   : > { %v5273_v39 = vmul.f32 %v6598_v34, %v5188_v29  ;;  %v5373_v27 = vadd.f32 %v5372_v23, %v5342_v32  ;;  %v4827_v36 = vpop.f32.mrb[7].mxu1  ;;  %v6313_v56 = vpop.f32.mrb[121].mxu0 }
 0x2b9   : > { %v6314_v44 = vadd.f32 %v6313_v56, %v6312_v53  ;;  %v6315_v26 = vpop.f32.mrb[122].mxu0  ;;  %v5917_v52 = vpack.c.bf16 %v6604_v60, %v6598_v34  ;;  %v5274_v18 = vmul.f32 %v6604_v60, %v5193_v63  ;;  %v5203_v59 = vpop.permute.xlu1 %5202 }
 0x2ba   : > { %v5343_v1 = vmul.f32 %v6598_v34, %v5273_v39  ;;  %v6316_v57 = vpop.f32.mrb[123].mxu0  ;;  %v5304_v22 = vadd.f32 %v5303_v62, %v5273_v39  ;;  %v5208_v32 = vpop.permute.xlu0 %5207 }
 0x2bb   : > { %v6317_v16 = vadd.f32 %v6316_v57, %v6315_v26  ;;  %5957 = vst [vmem:[%s9620_s19 + $0x48] sm:$0xff] %v5917_v52   ;;  %v5344_v47 = vmul.f32 %v6604_v60, %v5274_v18  ;;  %v6612_v55 = vadd.f32 %v9537_v38, %v6314_v44 }
 0x2bc   : > { %v5374_v25 = vadd.f32 %v5373_v27, %v5343_v1  ;;  %v5305_v46 = vadd.f32 %v5304_v22, %v5274_v18  ;;  %v10000_v1 = vld [vmem:[#allocation52_spill] sm:$0xff]  ;;  %v10001_v22 = vld [vmem:[#allocation53_spill] sm:$0xff] }
 0x2bd   : > { %v9647_v33 = vpop.f32.mrb[8].mxu1  ;;  %v6613_v45 = vadd.f32 %v6612_v55, %v4824_v24  ;;  %v6618_v7 = vadd.f32 %v9539_v13, %v6317_v16  ;;  %v5213_v29 = vpop.permute.xlu1 %5212 }
 0x2be   : > { %v5375_v20 = vadd.f32 %v5374_v25, %v5344_v47  ;;  %v4840_v21 = vpop.f32.mrb[9].mxu1  ;;  %v5218_v47 = vpop.permute.xlu0 %5217 }
 0x2bf   : > { %v9650_v37 = vpop.f32.mrb[10].mxu1  ;;  %v6318_v54 = vpop.f32.mrb[124].mxu0  ;;  %v5275_v30 = vmul.f32 %v6613_v45, %v5198_v50  ;;  %v6619_v11 = vadd.f32 %v6618_v7, %v4827_v36 }
 0x2c0   : > { %v4843_v4 = vpop.f32.mrb[11].mxu1  ;;  %v6319_v6 = vpop.f32.mrb[125].mxu0 }
 0x2c1   : > { %v6320_v28 = vadd.f32 %v6319_v6, %v6318_v54  ;;  %v6321_v38 = vpop.f32.mrb[126].mxu0  ;;  %v5306_v31 = vadd.f32 %v5305_v46, %v5275_v30  ;;  %v5345_v9 = vmul.f32 %v6613_v45, %v5275_v30  ;;  %v5922_v8 = vpack.c.bf16 %v6619_v11, %v6613_v45 }
 0x2c2   : > { %v6322_v0 = vpop.f32.mrb[127].mxu0  ;;  %v5276_v2 = vmul.f32 %v6619_v11, %v5203_v59 }
 0x2c3   : > { %v6323_v35 = vadd.f32 %v6322_v0, %v6321_v38  ;;  %v6609_v13 = vadd.f32 %v9541_v48, %v6320_v28  ;;  %v5376_v61 = vadd.f32 %v5375_v20, %v5345_v9  ;;  %5958 = vst [vmem:[%s9620_s19 + $0x50] sm:$0xff] %v5922_v8   ;;  %v5223_v20 = vpop.permute.xlu1 %5222  ;;  %v10002_v0 = vld [vmem:[#allocation35_spill] sm:$0xff] }
 0x2c4   : > { %v5307_v42 = vadd.f32 %v5306_v31, %v5276_v2  ;;  %v5346_v14 = vmul.f32 %v6619_v11, %v5276_v2  ;;  %v5228_v2 = vpop.permute.xlu0 %5227 }
 0x2c5   : > { %v9654_v41 = vpop.f32.mrb[12].mxu1  ;;  %v6610_v12 = vadd.f32 %v6609_v13, %v6506_v15  ;;  %v6615_v40 = vadd.f32 %v9543_v51, %v6323_v35 }
 0x2c6   : > { %v9657_v58 = vpop.f32.mrb[13].mxu1  ;;  %v5377_v34 = vadd.f32 %v5376_v61, %v5346_v14 }
 0x2c7   : > { %v9659_v23 = vpop.f32.mrb[14].mxu1  ;;  %v6324_v17 = vpop.f32.mrb[128].mxu0  ;;  %v5277_v62 = vmul.f32 %v6610_v12, %v5208_v32  ;;  %v6616_v24 = vadd.f32 %v6615_v40, %v6507_v43 }
 0x2c8   : > { %v9661_v48 = vpop.f32.mrb[15].mxu1  ;;  %v6325_v53 = vpop.f32.mrb[129].mxu0 }
 0x2c9   : > { %v6326_v39 = vadd.f32 %v6325_v53, %v6324_v17  ;;  %v6327_v60 = vpop.f32.mrb[130].mxu0  ;;  %v5347_v27 = vmul.f32 %v6610_v12, %v5277_v62  ;;  %v5927_v15 = vpack.c.bf16 %v6616_v24, %v6610_v12  ;;  %v5278_v36 = vmul.f32 %v6616_v24, %v5213_v29  ;;  %v5233_v14 = vpop.permute.xlu1 %5232 }
 0x2ca   : > { %v6328_v51 = vpop.f32.mrb[131].mxu0  ;;  %v5308_v63 = vadd.f32 %v5307_v42, %v5277_v62 }
 0x2cb   : > { %v6329_v56 = vadd.f32 %v6328_v51, %v6327_v60  ;;  %5959 = vst [vmem:[%s9620_s19 + $0x58] sm:$0xff] %v5927_v15   ;;  %v5348_v44 = vmul.f32 %v6616_v24, %v5278_v36  ;;  %v5378_v26 = vadd.f32 %v5377_v34, %v5347_v27  ;;  %v6624_v52 = vadd.f32 %v10000_v1, %v6326_v39 }
 0x2cc   : > { %v5309_v18 = vadd.f32 %v5308_v63, %v5278_v36  ;;  %v5238_v36 = vpop.permute.xlu0 %5237 }
 0x2cd   : > { %v6625_v57 = vadd.f32 %v6624_v52, %v4840_v21  ;;  %v5379_v43 = vadd.f32 %v5378_v26, %v5348_v44  ;;  %v6630_v16 = vadd.f32 %v10001_v22, %v6329_v56  ;;  %v5243_v26 = vpop.permute.xlu1 %5242 }
 0x2cf   : > { %v6330_v25 = vpop.f32.mrb[132].mxu0  ;;  %v5279_v55 = vmul.f32 %v6625_v57, %v5218_v47  ;;  %v6631_v46 = vadd.f32 %v6630_v16, %v4843_v4 }
 0x2d0   : > { %v6331_v45 = vpop.f32.mrb[133].mxu0 }
 0x2d1   : > { %v6332_v7 = vadd.f32 %v6331_v45, %v6330_v25  ;;  %v6333_v50 = vpop.f32.mrb[134].mxu0  ;;  %v5310_v54 = vadd.f32 %v5309_v18, %v5279_v55  ;;  %v5349_v30 = vmul.f32 %v6625_v57, %v5279_v55  ;;  %v5932_v11 = vpack.c.bf16 %v6631_v46, %v6625_v57 }
 0x2d2   : > { %v6334_v6 = vpop.f32.mrb[135].mxu0  ;;  %v5280_v59 = vmul.f32 %v6631_v46, %v5223_v20 }
 0x2d3   : > { %v6335_v28 = vadd.f32 %v6334_v6, %v6333_v50  ;;  %v6621_v21 = vadd.f32 %v9549_v3, %v6332_v7  ;;  %v5380_v38 = vadd.f32 %v5379_v43, %v5349_v30  ;;  %5960 = vst [vmem:[%s9620_s19 + $0x60] sm:$0xff] %v5932_v11   ;;  %v5253_v50 = vpop.permute.xlu1 %5252 }
 0x2d4   : > { %v5311_v31 = vadd.f32 %v5310_v54, %v5280_v59  ;;  %v5350_v9 = vmul.f32 %v6631_v46, %v5280_v59  ;;  %v5248_v46 = vpop.permute.xlu0 %5247 }
 0x2d5   : > { %v6622_v8 = vadd.f32 %v6621_v21, %v9647_v33  ;;  %v6627_v4 = vadd.f32 %v10002_v0, %v6335_v28 }
 0x2d6   : > { %v5381_v35 = vadd.f32 %v5380_v38, %v5350_v9 }
 0x2d7   : > { %v5281_v13 = vmul.f32 %v6622_v8, %v5228_v2  ;;  %v6336_v61 = vpop.f32.mrb[136].mxu0  ;;  %v6628_v42 = vadd.f32 %v6627_v4, %v9650_v37 }
 0x2d8   : > { %v6337_v12 = vpop.f32.mrb[137].mxu0 }
 0x2d9   : > { %v5351_v40 = vmul.f32 %v6622_v8, %v5281_v13  ;;  %v5937_v32 = vpack.c.bf16 %v6628_v42, %v6622_v8  ;;  %v5282_v3 = vmul.f32 %v6628_v42, %v5233_v14  ;;  %v6338_v34 = vadd.f32 %v6337_v12, %v6336_v61  ;;  %v6339_v17 = vpop.f32.mrb[138].mxu0 }
 0x2da   : > { %v5312_v62 = vadd.f32 %v5311_v31, %v5281_v13  ;;  %v6340_v24 = vpop.f32.mrb[139].mxu0 }
 0x2db   : > { %5961 = vst [vmem:[%s9620_s19 + $0x68] sm:$0xff] %v5937_v32   ;;  %v5352_v33 = vmul.f32 %v6628_v42, %v5282_v3  ;;  %v5382_v29 = vadd.f32 %v5381_v35, %v5351_v40  ;;  %v6341_v53 = vadd.f32 %v6340_v24, %v6339_v17  ;;  %v6636_v39 = vadd.f32 %v9553_v19, %v6338_v34 }
 0x2dc   : > { %v5313_v60 = vadd.f32 %v5312_v62, %v5282_v3 }
 0x2dd   : > { %v6637_v27 = vadd.f32 %v6636_v39, %v9657_v58  ;;  %v5383_v15 = vadd.f32 %v5382_v29, %v5352_v33  ;;  %v6642_v37 = vadd.f32 %v9555_v5, %v6341_v53 }
 0x2df   : > { %v5283_v51 = vmul.f32 %v6637_v27, %v5238_v36  ;;  %v6342_v63 = vpop.f32.mrb[140].mxu0  ;;  %v6643_v56 = vadd.f32 %v6642_v37, %v9661_v48 }
 0x2e0   : > { %v6343_v44 = vpop.f32.mrb[141].mxu0 }
 0x2e1   : > { %v5314_v1 = vadd.f32 %v5313_v60, %v5283_v51  ;;  %v5353_v52 = vmul.f32 %v6637_v27, %v5283_v51  ;;  %v6344_v18 = vadd.f32 %v6343_v44, %v6342_v63  ;;  %v5942_v57 = vpack.c.bf16 %v6643_v56, %v6637_v27  ;;  %v6345_v43 = vpop.f32.mrb[142].mxu0 }
 0x2e2   : > { %v5284_v19 = vmul.f32 %v6643_v56, %v5243_v26  ;;  %v6346_v22 = vpop.f32.mrb[143].mxu0 }
 0x2e3   : > { %v5384_v16 = vadd.f32 %v5383_v15, %v5353_v52  ;;  %v6633_v58 = vadd.f32 %v9558_v10, %v6344_v18  ;;  %5962 = vst [vmem:[%s9620_s19 + $0x70] sm:$0xff] %v5942_v57   ;;  %v6347_v5 = vadd.f32 %v6346_v22, %v6345_v43 }
 0x2e4   : > { %v5315_v47 = vadd.f32 %v5314_v1, %v5284_v19  ;;  %v5354_v25 = vmul.f32 %v6643_v56, %v5284_v19 }
 0x2e5   : > { %v6634_v55 = vadd.f32 %v6633_v58, %v9654_v41  ;;  %v6639_v48 = vadd.f32 %v9563_v49, %v6347_v5 }
 0x2e6   : > { %v5385_v45 = vadd.f32 %v5384_v16, %v5354_v25 }
 0x2e7   : > { %v5285_v20 = vmul.f32 %v6634_v55, %v5248_v46  ;;  %v6640_v7 = vadd.f32 %v6639_v48, %v9659_v23 }
 0x2e9   : > { %v5355_v54 = vmul.f32 %v6634_v55, %v5285_v20  ;;  %v5316_v30 = vadd.f32 %v5315_v47, %v5285_v20  ;;  %v5947_v11 = vpack.c.bf16 %v6640_v7, %v6634_v55  ;;  %v5286_v10 = vmul.f32 %v6640_v7, %v5253_v50 }
 0x2eb   : > { %v5386_v6 = vadd.f32 %v5385_v45, %v5355_v54  ;;  %5963 = vst [vmem:[%s9620_s19 + $0x78] sm:$0xff] %v5947_v11   ;;  %v5317_v59 = vadd.f32 %v5316_v30, %v5286_v10  ;;  %v5356_v28 = vmul.f32 %v6640_v7, %v5286_v10 }
 0x2ed   : > { %v5318_v21 = vrot.slane %v5317_v59, 4  ;;  %v5387_v38 = vadd.f32 %v5386_v6, %v5356_v28 }
 0x2ef   : > { %v5319_v41 = vadd.f32 %v5318_v21, %v5317_v59  ;;  %v5388_v31 = vrot.slane %v5387_v38, 4 }
 0x2f1   : > { %v5320_v49 = vrot.slane %v5319_v41, 2  ;;  %v5389_v9 = vadd.f32 %v5388_v31, %v5387_v38 }
 0x2f3   : > { %v5321_v8 = vadd.f32 %v5320_v49, %v5319_v41  ;;  %v5390_v0 = vrot.slane %v5389_v9, 2 }
 0x2f5   : > { %v5322_v23 = vrot.slane %v5321_v8, 1  ;;  %v5391_v4 = vadd.f32 %v5390_v0, %v5389_v9 }
 0x2f7   : > { %v5323_v2 = vadd.f32 %v5322_v23, %v5321_v8  ;;  %v5392_v35 = vrot.slane %v5391_v4, 1 }
 0x2f9   : > { %5324 = vst [vmem:[%s262_s25] sm:$0x1] %v5323_v2  ;;  %v5393_v13 = vadd.f32 %v5392_v35, %v5391_v4 }
 0x2fb   : > { %5394 = vst [vmem:[%s262_s25 + $0x1] sm:$0x1] %v5393_v13 }
 0x2fc PF: > { %s17_s21 = sadd.s32 1, %s6929_s21  }
 0x2fd   : > { %p14_p4 = scmp.ge.s32.totalorder %s17_s21, 4  }
 0x2ff   :  { %16 = sbr.rel (!%p14_p4) target bundleno = 1 (0x1), region = 84 }

</bundles_post_ra>
